<compile_context>
chip_gen: v6e
topology: v6e:2x2x1
jax: 0.10.0
libtpu: 0.0.40
codegen_flags: <defaults>
</compile_context>

<pallas_src>
import math

import jax
import jax.numpy as jnp
from jax.experimental import pallas as pl
from jax.experimental.pallas import tpu as pltpu

# ----------------------------- config ---------------------------------------
B, S, H = 2, 16, 64          # batch, sequence, hidden
BS = B * S
NUM_HEADS = 4
HEAD_DIM = H // NUM_HEADS
FFN = 128
LAYERS = 2
VOCAB = 300
MAG_SIZE = 12
PRE_SIZE = 12
TOP_DIGIT = 12
LOW_DIGIT = 12
ORDER_SIZE = 32
FMT_FEAT = 11
FMT_PAD = 16                 # format features zero-padded to 16 for clean layout
TREE_DEPTH = 4
NODE_MAX = 16                # tree coordinate vocab per level = NODE_MAX + 1
NUM_TRIPLET = 3              # triplet-head classes (logits returned)
LANE = 128                   # lane-dense padded classifier width
ATTN_DIST = 8.0              # tree-attention distance threshold
NEG_INF = -1.0e4
LN_EPS = 1e-12

# ---- packed small-vector operand layout (rows of a (VEC_ROWS, 3H) f32 array) ----
R_FMT_B, R_ELN_G, R_ELN_B, R_HBU, R_HBC = 0, 1, 2, 3, 4
R_LAYER0 = 5
ROWS_PER_LAYER = 8           # bqkv, bo, ln1_g, ln1_b, b1, b2, ln2_g, ln2_b
VEC_ROWS = R_LAYER0 + LAYERS * ROWS_PER_LAYER


# --------------------------- in-kernel helpers -------------------------------
def _layer_norm(x, g, b):
    mu = jnp.mean(x, axis=-1, keepdims=True)
    var = jnp.mean(jnp.square(x - mu), axis=-1, keepdims=True)
    return (x - mu) * jax.lax.rsqrt(var + LN_EPS) * g + b


def _gelu_tanh(x):
    c = math.sqrt(2.0 / math.pi)
    return 0.5 * x * (1.0 + jnp.tanh(c * (x + 0.044715 * x * x * x)))


# ------------------------------ fused kernel ---------------------------------
def _fused_kernel(emb_ref, fmt_ref, bias_ref, fmtw_ref, wqkv_ref, wo_ref,
                  w1_ref, w2_ref, wu_ref, wc_ref, vec_ref, o_ref):
    # ---- embedding finalize: + linear(format_vec) -> LayerNorm ----
    x = emb_ref[...]                                                    # (BS, H) f32
    fmt = fmt_ref[...].astype(jnp.bfloat16)                             # (BS, FMT_PAD)
    x = (x + jnp.dot(fmt, fmtw_ref[...], preferred_element_type=jnp.float32)
         + vec_ref[R_FMT_B:R_FMT_B + 1, :H])
    x = _layer_norm(x, vec_ref[R_ELN_G:R_ELN_G + 1, :H],
                    vec_ref[R_ELN_B:R_ELN_B + 1, :H])

    bias = bias_ref[...]                                                # (BS, BS) f32

    # head lane-masks, built once (VPU/iota, trivially cheap)
    lane = jax.lax.broadcasted_iota(jnp.int32, (1, H), 1)
    head_masks = [
        jnp.logical_and(lane >= h * HEAD_DIM, lane < (h + 1) * HEAD_DIM
                        ).astype(jnp.bfloat16)
        for h in range(NUM_HEADS)
    ]

    inv_sqrt_d = 1.0 / math.sqrt(HEAD_DIM)

    # ---- transformer encoder layers (weights stacked over LAYERS) ----
    for l in range(LAYERS):                                             # static unroll
        base = R_LAYER0 + l * ROWS_PER_LAYER
        xb = x.astype(jnp.bfloat16)

        # fused QKV: one (32,64)x(64,192) matmul per layer
        qkv = (jnp.dot(xb, wqkv_ref[l], preferred_element_type=jnp.float32)
               + vec_ref[base + 0:base + 1, :3 * H])                    # (BS, 3H)
        q = (qkv[:, 0:H] * inv_sqrt_d).astype(jnp.bfloat16)             # pre-scaled
        k = qkv[:, H:2 * H].astype(jnp.bfloat16)
        v = qkv[:, 2 * H:3 * H].astype(jnp.bfloat16)

        # block-diagonal attention over all BS rows, head-masked K/V so each
        # head's context lands at its own lane offset with zero lane shuffles.
        ctx = jnp.zeros((BS, H), jnp.float32)
        for h in range(NUM_HEADS):                                      # static unroll
            m = head_masks[h]
            kh = k * m
            vh = v * m
            s = jax.lax.dot_general(q, kh, (((1,), (1,)), ((), ())),
                                    preferred_element_type=jnp.float32) + bias
            s = s - jnp.max(s, axis=-1, keepdims=True)
            e = jnp.exp(s)
            p = e * pl.reciprocal(jnp.sum(e, axis=-1, keepdims=True), approx=True)
            ctx = ctx + jnp.dot(p.astype(jnp.bfloat16), vh,
                                preferred_element_type=jnp.float32)

        # single full-width output projection
        attn = (jnp.dot(ctx.astype(jnp.bfloat16), wo_ref[l],
                        preferred_element_type=jnp.float32)
                + vec_ref[base + 1:base + 2, :H])

        h1 = _layer_norm(x + attn, vec_ref[base + 2:base + 3, :H],
                         vec_ref[base + 3:base + 4, :H])
        ff = _gelu_tanh(jnp.dot(h1.astype(jnp.bfloat16), w1_ref[l],
                                preferred_element_type=jnp.float32)
                        + vec_ref[base + 4:base + 5, :FFN])
        ff = (jnp.dot(ff.astype(jnp.bfloat16), w2_ref[l],
                      preferred_element_type=jnp.float32)
              + vec_ref[base + 5:base + 6, :H])
        x = _layer_norm(h1 + ff, vec_ref[base + 6:base + 7, :H],
                        vec_ref[base + 7:base + 8, :H])

    # ---- triplet head: gelu(linear) -> classifier (lane-padded to 128) ----
    hdn = _gelu_tanh(jnp.dot(x.astype(jnp.bfloat16), wu_ref[...],
                             preferred_element_type=jnp.float32)
                     + vec_ref[R_HBU:R_HBU + 1, :H])
    o_ref[...] = (jnp.dot(hdn.astype(jnp.bfloat16), wc_ref[...],
                          preferred_element_type=jnp.float32)
                  + vec_ref[R_HBC:R_HBC + 1, :LANE])                    # lane-dense store


# --------------------------- pallas_call wrapper ------------------------------
def _full_spec(shape):
    nd = len(shape)
    return pl.BlockSpec(tuple(shape), lambda i, _nd=nd: (0,) * _nd)


# ------------------------------ parameters ------------------------------------
def init_params(key):
    ks = iter(jax.random.split(key, 64))

    def nrm(shape, scale=0.02, dtype=jnp.float32):
        return (jax.random.normal(next(ks), shape, jnp.float32) * scale).astype(dtype)

    # classifier zero-padded to LANE lanes
    wc = jnp.zeros((H, LANE), jnp.float32)
    wc = wc.at[:, :NUM_TRIPLET].set(
        jax.random.normal(next(ks), (H, NUM_TRIPLET), jnp.float32) * 0.02)

    # format-vector weight zero-padded to FMT_PAD rows
    fw = jnp.zeros((FMT_PAD, H), jnp.float32)
    fw = fw.at[:FMT_FEAT, :].set(
        jax.random.normal(next(ks), (FMT_FEAT, H), jnp.float32) * 0.02)

    # packed small vectors: zeros everywhere, LayerNorm gains set to 1
    vecs = jnp.zeros((VEC_ROWS, 3 * H), jnp.float32)
    vecs = vecs.at[R_ELN_G, :H].set(1.0)
    for l in range(LAYERS):
        base = R_LAYER0 + l * ROWS_PER_LAYER
        vecs = vecs.at[base + 2, :H].set(1.0)   # ln1 gain
        vecs = vecs.at[base + 6, :H].set(1.0)   # ln2 gain

    p = {
        # embedding tables (gathered in JAX glue)
        "tok": nrm((VOCAB, H)),
        "mag": nrm((MAG_SIZE, H)),
        "pre": nrm((PRE_SIZE, H)),
        "topd": nrm((TOP_DIGIT, H)),
        "lowd": nrm((LOW_DIGIT, H)),
        "order": nrm((ORDER_SIZE, H)),
        "tree_top": nrm((TREE_DEPTH, NODE_MAX + 1, H)),
        "tree_left": nrm((TREE_DEPTH, NODE_MAX + 1, H)),
        # fused / stacked kernel weights (bf16 operands, f32 accumulation)
        "fmt_w": fw.astype(jnp.bfloat16),                       # (FMT_PAD, H)
        "wqkv": nrm((LAYERS, H, 3 * H), dtype=jnp.bfloat16),    # fused Q|K|V
        "wo": nrm((LAYERS, H, H), dtype=jnp.bfloat16),
        "w1": nrm((LAYERS, H, FFN), dtype=jnp.bfloat16),
        "w2": nrm((LAYERS, FFN, H), dtype=jnp.bfloat16),
        "head_wu": nrm((H, H), dtype=jnp.bfloat16),
        "head_wc": wc.astype(jnp.bfloat16),                     # (H, LANE)
        # packed biases / LN params
        "vecs": vecs,                                           # (VEC_ROWS, 3H) f32
    }
    return p


# ------------------------------ glue --------------------------------------------
def gather_embeddings(p, token_id, num_mag, num_pre, num_top, num_low,
                      token_order, pos_top, pos_left):
    # Embedding-table gathers (glue); sum + LayerNorm happens inside the kernel.
    e = (p["tok"][token_id] + p["mag"][num_mag] + p["pre"][num_pre]
         + p["topd"][num_top] + p["lowd"][num_low] + p["order"][token_order])
    for lvl in range(TREE_DEPTH):
        e = e + p["tree_top"][lvl][pos_top[..., lvl]] + p["tree_left"][lvl][pos_left[..., lvl]]
    return e.astype(jnp.float32)


def build_attn_bias(pos_top, pos_left, indicator):
    # Tree-attention bias, block-diagonal over the folded batch: (BS, BS) f32.
    top = pos_top.astype(jnp.float32)                               # (B, S, T)
    left = pos_left.astype(jnp.float32)
    dt = jnp.sum(jnp.abs(top[:, :, None, :] - top[:, None, :, :]), axis=-1)    # (B,S,S)
    dl = jnp.sum(jnp.abs(left[:, :, None, :] - left[:, None, :, :]), axis=-1)
    dist = jnp.maximum(dt, dl)
    valid_key = (indicator != 0).astype(jnp.float32)[:, None, :]                # (B,1,S)
    keep = jnp.where(dist <= ATTN_DIST, 1.0, 0.0) * valid_key
    blk = (1.0 - keep) * NEG_INF                                                # (B,S,S)
    full = jnp.full((BS, BS), 2.0 * NEG_INF, jnp.float32)       # cross-batch fully masked
    for b in range(B):
        full = full.at[b * S:(b + 1) * S, b * S:(b + 1) * S].set(blk[b])
    return full


# ------------------------------ forward ----------------------------------------
def tuta_for_triplet(p, token_id, num_mag, num_pre, num_top, num_low, token_order,
                     pos_row, pos_col, pos_top, pos_left, format_vec, indicator):
    del pos_row, pos_col  # tree backbone uses pos_top / pos_left only (see TODO above)

    emb = gather_embeddings(p, token_id, num_mag, num_pre, num_top, num_low,
                            token_order, pos_top, pos_left).reshape(BS, H)
    fmt = jnp.zeros((BS, FMT_PAD), jnp.float32).at[:, :FMT_FEAT].set(
        format_vec.astype(jnp.float32).reshape(BS, FMT_FEAT))
    bias = build_attn_bias(pos_top, pos_left, indicator)            # (BS, BS)

    operands = [emb, fmt, bias,
                p["fmt_w"], p["wqkv"], p["wo"], p["w1"], p["w2"],
                p["head_wu"], p["head_wc"], p["vecs"]]

    per_layer_flops = (2 * BS * H * 3 * H                                  # fused QKV
                       + NUM_HEADS * (2 * BS * BS * H + 2 * BS * BS * H)   # scores + PV
                       + 2 * BS * H * H                                    # wo
                       + 2 * BS * H * FFN + 2 * BS * FFN * H)              # FFN
    flops = (2 * BS * FMT_PAD * H + LAYERS * per_layer_flops
             + 2 * BS * H * H + 2 * BS * H * LANE)
    transc = LAYERS * (NUM_HEADS * (BS * BS + BS) + BS * FFN) + BS * H
    bytes_acc = int(sum(int(o.size) * o.dtype.itemsize for o in operands)) + BS * LANE * 4

    logits_pad = pl.pallas_call(
        _fused_kernel,
        out_shape=jax.ShapeDtypeStruct((BS, LANE), jnp.float32),
        grid=(1,),
        in_specs=[_full_spec(o.shape) for o in operands],
        out_specs=_full_spec((BS, LANE)),
        compiler_params=pltpu.CompilerParams(dimension_semantics=("arbitrary",)),
        cost_estimate=pl.CostEstimate(flops=flops, transcendentals=transc,
                                      bytes_accessed=bytes_acc),
    )(*operands)

    return logits_pad.reshape(B, S, LANE)[..., :NUM_TRIPLET]   # (B, S, NUM_TRIPLET)


# ------------------------------- main -------------------------------------------
if __name__ == "__main__":
    key = jax.random.PRNGKey(0)
    pkey, *iks = jax.random.split(key, 16)
    params = init_params(pkey)

    token_id = jax.random.randint(iks[0], (B, S), 0, VOCAB)
    num_mag = jax.random.randint(iks[1], (B, S), 0, MAG_SIZE)
    num_pre = jax.random.randint(iks[2], (B, S), 0, PRE_SIZE)
    num_top = jax.random.randint(iks[3], (B, S), 0, TOP_DIGIT)
    num_low = jax.random.randint(iks[4], (B, S), 0, LOW_DIGIT)
    token_order = jax.random.randint(iks[5], (B, S), 0, ORDER_SIZE)
    pos_row = jax.random.randint(iks[6], (B, S), 0, 32)
    pos_col = jax.random.randint(iks[7], (B, S), 0, 32)
    pos_top = jax.random.randint(iks[8], (B, S, TREE_DEPTH), 0, NODE_MAX + 1)
    pos_left = jax.random.randint(iks[9], (B, S, TREE_DEPTH), 0, NODE_MAX + 1)
    format_vec = jax.random.uniform(iks[10], (B, S, FMT_FEAT), jnp.float32)
    indicator = jax.random.randint(iks[11], (B, S), -2, 3)    # <0 SEP, 0 pad, >0 token

    fwd = jax.jit(tuta_for_triplet)
    logits = fwd(params, token_id, num_mag, num_pre, num_top, num_low, token_order,
                 pos_row, pos_col, pos_top, pos_left, format_vec, indicator)
    jax.block_until_ready(logits)
    assert logits.shape == (B, S, NUM_TRIPLET)
    assert bool(jnp.all(jnp.isfinite(logits)))
    print("KERNEL_OK")
</pallas_src>

<mosaic_0001>
module attributes {stable_mosaic.version = 11 : i64} {
  func.func @_fused_kernel(%arg0: i32, %arg1: memref<32x64xf32, #tpu.memory_space<vmem>>, %arg2: memref<32x16xf32, #tpu.memory_space<vmem>>, %arg3: memref<32x32xf32, #tpu.memory_space<vmem>>, %arg4: memref<16x64xbf16, #tpu.memory_space<vmem>>, %arg5: memref<2x64x192xbf16, #tpu.memory_space<vmem>>, %arg6: memref<2x64x64xbf16, #tpu.memory_space<vmem>>, %arg7: memref<2x64x128xbf16, #tpu.memory_space<vmem>>, %arg8: memref<2x128x64xbf16, #tpu.memory_space<vmem>>, %arg9: memref<64x64xbf16, #tpu.memory_space<vmem>>, %arg10: memref<64x128xbf16, #tpu.memory_space<vmem>>, %arg11: memref<21x192xf32, #tpu.memory_space<vmem>>, %arg12: memref<32x128xf32, #tpu.memory_space<vmem>>) attributes {dimension_semantics = [#tpu.dimension_semantics<arbitrary>], iteration_bounds = array<i64: 1>, scalar_prefetch = 0 : i64, scratch_operands = 0 : i64, tpu.core_type = #tpu.core_type<tc>, window_params = [{pipeline_mode = #tpu.pipeline_mode<synchronous>, transform_indices = @transform_0, window_bounds = array<i64: 32, 64>}, {pipeline_mode = #tpu.pipeline_mode<synchronous>, transform_indices = @transform_1, window_bounds = array<i64: 32, 16>}, {pipeline_mode = #tpu.pipeline_mode<synchronous>, transform_indices = @transform_2, window_bounds = array<i64: 32, 32>}, {pipeline_mode = #tpu.pipeline_mode<synchronous>, transform_indices = @transform_3, window_bounds = array<i64: 16, 64>}, {pipeline_mode = #tpu.pipeline_mode<synchronous>, transform_indices = @transform_4, window_bounds = array<i64: 2, 64, 192>}, {pipeline_mode = #tpu.pipeline_mode<synchronous>, transform_indices = @transform_5, window_bounds = array<i64: 2, 64, 64>}, {pipeline_mode = #tpu.pipeline_mode<synchronous>, transform_indices = @transform_6, window_bounds = array<i64: 2, 64, 128>}, {pipeline_mode = #tpu.pipeline_mode<synchronous>, transform_indices = @transform_7, window_bounds = array<i64: 2, 128, 64>}, {pipeline_mode = #tpu.pipeline_mode<synchronous>, transform_indices = @transform_8, window_bounds = array<i64: 64, 64>}, {pipeline_mode = #tpu.pipeline_mode<synchronous>, transform_indices = @transform_9, window_bounds = array<i64: 64, 128>}, {pipeline_mode = #tpu.pipeline_mode<synchronous>, transform_indices = @transform_10, window_bounds = array<i64: 21, 192>}, {pipeline_mode = #tpu.pipeline_mode<synchronous>, transform_indices = @transform_11, window_bounds = array<i64: 32, 128>}]} {
    %c0 = arith.constant 0 : index
    %c0_0 = arith.constant 0 : index
    %0 = vector.load %arg1[%c0, %c0_0] : memref<32x64xf32, #tpu.memory_space<vmem>>, vector<32x64xf32>
    %c0_1 = arith.constant 0 : index
    %c0_2 = arith.constant 0 : index
    %1 = vector.load %arg2[%c0_1, %c0_2] : memref<32x16xf32, #tpu.memory_space<vmem>>, vector<32x16xf32>
    %2 = arith.truncf %1 : vector<32x16xf32> to vector<32x16xbf16>
    %c0_3 = arith.constant 0 : index
    %c0_4 = arith.constant 0 : index
    %3 = vector.load %arg4[%c0_3, %c0_4] : memref<16x64xbf16, #tpu.memory_space<vmem>>, vector<16x64xbf16>
    %cst = arith.constant dense<0.000000e+00> : vector<32x64xf32>
    %4 = tpu.matmul %2, %3, %cst {dimension_numbers = #tpu.dot_dimension_numbers<[1], [0], [0], [1], [0, 0, 1, 1], [], []>} : vector<32x16xbf16>, vector<16x64xbf16>, vector<32x64xf32> -> vector<32x64xf32>
    %5 = arith.addf %0, %4 : vector<32x64xf32>
    %c0_5 = arith.constant 0 : index
    %c0_6 = arith.constant 0 : index
    %6 = vector.load %arg11[%c0_5, %c0_6] : memref<21x192xf32, #tpu.memory_space<vmem>>, vector<1x64xf32>
    %7 = vector.broadcast %6 : vector<1x64xf32> to vector<32x64xf32>
    %8 = arith.addf %5, %7 : vector<32x64xf32>
    %c1 = arith.constant 1 : index
    %c0_7 = arith.constant 0 : index
    %9 = vector.load %arg11[%c1, %c0_7] : memref<21x192xf32, #tpu.memory_space<vmem>>, vector<1x64xf32>
    %c2 = arith.constant 2 : index
    %c0_8 = arith.constant 0 : index
    %10 = vector.load %arg11[%c2, %c0_8] : memref<21x192xf32, #tpu.memory_space<vmem>>, vector<1x64xf32>
    %cst_9 = arith.constant dense<0.000000e+00> : vector<32xf32>
    %11 = vector.multi_reduction <add>, %8, %cst_9 [1] : vector<32x64xf32> to vector<32xf32>
    %12 = vector.shape_cast %11 : vector<32xf32> to vector<32x1xf32>
    %cst_10 = arith.constant 6.400000e+01 : f32
    %13 = vector.broadcast %cst_10 : f32 to vector<32x1xf32>
    %14 = arith.divf %12, %13 : vector<32x1xf32>
    %15 = vector.broadcast %14 : vector<32x1xf32> to vector<32x64xf32>
    %16 = arith.subf %8, %15 : vector<32x64xf32>
    %17 = arith.mulf %16, %16 : vector<32x64xf32>
    %cst_11 = arith.constant dense<0.000000e+00> : vector<32xf32>
    %18 = vector.multi_reduction <add>, %17, %cst_11 [1] : vector<32x64xf32> to vector<32xf32>
    %19 = vector.shape_cast %18 : vector<32xf32> to vector<32x1xf32>
    %cst_12 = arith.constant 6.400000e+01 : f32
    %20 = vector.broadcast %cst_12 : f32 to vector<32x1xf32>
    %21 = arith.divf %19, %20 : vector<32x1xf32>
    %22 = vector.broadcast %14 : vector<32x1xf32> to vector<32x64xf32>
    %23 = arith.subf %8, %22 : vector<32x64xf32>
    %cst_13 = arith.constant 9.99999996E-13 : f32
    %24 = vector.broadcast %cst_13 : f32 to vector<32x1xf32>
    %25 = arith.addf %21, %24 : vector<32x1xf32>
    %26 = math.rsqrt %25 : vector<32x1xf32>
    %27 = vector.broadcast %26 : vector<32x1xf32> to vector<32x64xf32>
    %28 = arith.mulf %23, %27 : vector<32x64xf32>
    %29 = vector.broadcast %9 : vector<1x64xf32> to vector<32x64xf32>
    %30 = arith.mulf %28, %29 : vector<32x64xf32>
    %31 = vector.broadcast %10 : vector<1x64xf32> to vector<32x64xf32>
    %32 = arith.addf %30, %31 : vector<32x64xf32>
    %c0_14 = arith.constant 0 : index
    %c0_15 = arith.constant 0 : index
    %33 = vector.load %arg3[%c0_14, %c0_15] : memref<32x32xf32, #tpu.memory_space<vmem>>, vector<32x32xf32>
    %34 = tpu.iota {dimensions = array<i32: 1>} : vector<1x64xi32>
    %c0_i32 = arith.constant 0 : i32
    %35 = vector.broadcast %c0_i32 : i32 to vector<1x64xi32>
    %36 = arith.cmpi sge, %34, %35 : vector<1x64xi32>
    %c16_i32 = arith.constant 16 : i32
    %37 = vector.broadcast %c16_i32 : i32 to vector<1x64xi32>
    %38 = arith.cmpi slt, %34, %37 : vector<1x64xi32>
    %39 = arith.andi %36, %38 : vector<1x64xi1>
    %40 = arith.extui %39 : vector<1x64xi1> to vector<1x64xi32>
    %41 = arith.sitofp %40 : vector<1x64xi32> to vector<1x64xf32>
    %42 = arith.truncf %41 : vector<1x64xf32> to vector<1x64xbf16>
    %c16_i32_16 = arith.constant 16 : i32
    %43 = vector.broadcast %c16_i32_16 : i32 to vector<1x64xi32>
    %44 = arith.cmpi sge, %34, %43 : vector<1x64xi32>
    %c32_i32 = arith.constant 32 : i32
    %45 = vector.broadcast %c32_i32 : i32 to vector<1x64xi32>
    %46 = arith.cmpi slt, %34, %45 : vector<1x64xi32>
    %47 = arith.andi %44, %46 : vector<1x64xi1>
    %48 = arith.extui %47 : vector<1x64xi1> to vector<1x64xi32>
    %49 = arith.sitofp %48 : vector<1x64xi32> to vector<1x64xf32>
    %50 = arith.truncf %49 : vector<1x64xf32> to vector<1x64xbf16>
    %c32_i32_17 = arith.constant 32 : i32
    %51 = vector.broadcast %c32_i32_17 : i32 to vector<1x64xi32>
    %52 = arith.cmpi sge, %34, %51 : vector<1x64xi32>
    %c48_i32 = arith.constant 48 : i32
    %53 = vector.broadcast %c48_i32 : i32 to vector<1x64xi32>
    %54 = arith.cmpi slt, %34, %53 : vector<1x64xi32>
    %55 = arith.andi %52, %54 : vector<1x64xi1>
    %56 = arith.extui %55 : vector<1x64xi1> to vector<1x64xi32>
    %57 = arith.sitofp %56 : vector<1x64xi32> to vector<1x64xf32>
    %58 = arith.truncf %57 : vector<1x64xf32> to vector<1x64xbf16>
    %c48_i32_18 = arith.constant 48 : i32
    %59 = vector.broadcast %c48_i32_18 : i32 to vector<1x64xi32>
    %60 = arith.cmpi sge, %34, %59 : vector<1x64xi32>
    %c64_i32 = arith.constant 64 : i32
    %61 = vector.broadcast %c64_i32 : i32 to vector<1x64xi32>
    %62 = arith.cmpi slt, %34, %61 : vector<1x64xi32>
    %63 = arith.andi %60, %62 : vector<1x64xi1>
    %64 = arith.extui %63 : vector<1x64xi1> to vector<1x64xi32>
    %65 = arith.sitofp %64 : vector<1x64xi32> to vector<1x64xf32>
    %66 = arith.truncf %65 : vector<1x64xf32> to vector<1x64xbf16>
    %67 = arith.truncf %32 : vector<32x64xf32> to vector<32x64xbf16>
    %c0_19 = arith.constant 0 : index
    %c0_20 = arith.constant 0 : index
    %c0_21 = arith.constant 0 : index
    %68 = vector.load %arg5[%c0_19, %c0_20, %c0_21] : memref<2x64x192xbf16, #tpu.memory_space<vmem>>, vector<1x64x192xbf16>
    %69 = vector.shape_cast %68 : vector<1x64x192xbf16> to vector<64x192xbf16>
    %cst_22 = arith.constant dense<0.000000e+00> : vector<32x192xf32>
    %70 = tpu.matmul %67, %69, %cst_22 {dimension_numbers = #tpu.dot_dimension_numbers<[1], [0], [0], [1], [0, 0, 1, 1], [], []>} : vector<32x64xbf16>, vector<64x192xbf16>, vector<32x192xf32> -> vector<32x192xf32>
    %c5 = arith.constant 5 : index
    %c0_23 = arith.constant 0 : index
    %71 = vector.load %arg11[%c5, %c0_23] : memref<21x192xf32, #tpu.memory_space<vmem>>, vector<1x192xf32>
    %72 = vector.broadcast %71 : vector<1x192xf32> to vector<32x192xf32>
    %73 = arith.addf %70, %72 : vector<32x192xf32>
    %74 = vector.extract_strided_slice %73 {offsets = [0, 0], sizes = [32, 64], strides = [1, 1]} : vector<32x192xf32> to vector<32x64xf32>
    %cst_24 = arith.constant 2.500000e-01 : f32
    %75 = vector.broadcast %cst_24 : f32 to vector<32x64xf32>
    %76 = arith.mulf %74, %75 : vector<32x64xf32>
    %77 = arith.truncf %76 : vector<32x64xf32> to vector<32x64xbf16>
    %78 = vector.extract_strided_slice %73 {offsets = [0, 64], sizes = [32, 64], strides = [1, 1]} : vector<32x192xf32> to vector<32x64xf32>
    %79 = arith.truncf %78 : vector<32x64xf32> to vector<32x64xbf16>
    %80 = vector.extract_strided_slice %73 {offsets = [0, 128], sizes = [32, 64], strides = [1, 1]} : vector<32x192xf32> to vector<32x64xf32>
    %81 = arith.truncf %80 : vector<32x64xf32> to vector<32x64xbf16>
    %cst_25 = arith.constant 0.000000e+00 : f32
    %82 = vector.broadcast %cst_25 : f32 to vector<32x64xf32>
    %83 = vector.broadcast %42 : vector<1x64xbf16> to vector<32x64xbf16>
    %84 = arith.mulf %79, %83 : vector<32x64xbf16>
    %85 = vector.broadcast %42 : vector<1x64xbf16> to vector<32x64xbf16>
    %86 = arith.mulf %81, %85 : vector<32x64xbf16>
    %cst_26 = arith.constant dense<0.000000e+00> : vector<32x32xf32>
    %87 = tpu.matmul %77, %84, %cst_26 {dimension_numbers = #tpu.dot_dimension_numbers<[1], [1], [0], [0], [0, 0, 1, 0], [], []>} : vector<32x64xbf16>, vector<32x64xbf16>, vector<32x32xf32> -> vector<32x32xf32>
    %88 = arith.addf %87, %33 : vector<32x32xf32>
    %cst_27 = arith.constant dense<0xFF800000> : vector<32xf32>
    %89 = vector.multi_reduction <maximumf>, %88, %cst_27 [1] : vector<32x32xf32> to vector<32xf32>
    %90 = vector.shape_cast %89 : vector<32xf32> to vector<32x1xf32>
    %91 = vector.broadcast %90 : vector<32x1xf32> to vector<32x32xf32>
    %92 = arith.subf %88, %91 : vector<32x32xf32>
    %93 = math.exp %92 : vector<32x32xf32>
    %cst_28 = arith.constant dense<0.000000e+00> : vector<32xf32>
    %94 = vector.multi_reduction <add>, %93, %cst_28 [1] : vector<32x32xf32> to vector<32xf32>
    %95 = vector.shape_cast %94 : vector<32xf32> to vector<32x1xf32>
    %96 = tpu.reciprocal %95 {approx = true} : vector<32x1xf32> -> vector<32x1xf32>
    %97 = vector.broadcast %96 : vector<32x1xf32> to vector<32x32xf32>
    %98 = arith.mulf %93, %97 : vector<32x32xf32>
    %99 = arith.truncf %98 : vector<32x32xf32> to vector<32x32xbf16>
    %cst_29 = arith.constant dense<0.000000e+00> : vector<32x64xf32>
    %100 = tpu.matmul %99, %86, %cst_29 {dimension_numbers = #tpu.dot_dimension_numbers<[1], [0], [0], [1], [0, 0, 1, 1], [], []>} : vector<32x32xbf16>, vector<32x64xbf16>, vector<32x64xf32> -> vector<32x64xf32>
    %101 = arith.addf %82, %100 : vector<32x64xf32>
    %102 = vector.broadcast %50 : vector<1x64xbf16> to vector<32x64xbf16>
    %103 = arith.mulf %79, %102 : vector<32x64xbf16>
    %104 = vector.broadcast %50 : vector<1x64xbf16> to vector<32x64xbf16>
    %105 = arith.mulf %81, %104 : vector<32x64xbf16>
    %cst_30 = arith.constant dense<0.000000e+00> : vector<32x32xf32>
    %106 = tpu.matmul %77, %103, %cst_30 {dimension_numbers = #tpu.dot_dimension_numbers<[1], [1], [0], [0], [0, 0, 1, 0], [], []>} : vector<32x64xbf16>, vector<32x64xbf16>, vector<32x32xf32> -> vector<32x32xf32>
    %107 = arith.addf %106, %33 : vector<32x32xf32>
    %cst_31 = arith.constant dense<0xFF800000> : vector<32xf32>
    %108 = vector.multi_reduction <maximumf>, %107, %cst_31 [1] : vector<32x32xf32> to vector<32xf32>
    %109 = vector.shape_cast %108 : vector<32xf32> to vector<32x1xf32>
    %110 = vector.broadcast %109 : vector<32x1xf32> to vector<32x32xf32>
    %111 = arith.subf %107, %110 : vector<32x32xf32>
    %112 = math.exp %111 : vector<32x32xf32>
    %cst_32 = arith.constant dense<0.000000e+00> : vector<32xf32>
    %113 = vector.multi_reduction <add>, %112, %cst_32 [1] : vector<32x32xf32> to vector<32xf32>
    %114 = vector.shape_cast %113 : vector<32xf32> to vector<32x1xf32>
    %115 = tpu.reciprocal %114 {approx = true} : vector<32x1xf32> -> vector<32x1xf32>
    %116 = vector.broadcast %115 : vector<32x1xf32> to vector<32x32xf32>
    %117 = arith.mulf %112, %116 : vector<32x32xf32>
    %118 = arith.truncf %117 : vector<32x32xf32> to vector<32x32xbf16>
    %cst_33 = arith.constant dense<0.000000e+00> : vector<32x64xf32>
    %119 = tpu.matmul %118, %105, %cst_33 {dimension_numbers = #tpu.dot_dimension_numbers<[1], [0], [0], [1], [0, 0, 1, 1], [], []>} : vector<32x32xbf16>, vector<32x64xbf16>, vector<32x64xf32> -> vector<32x64xf32>
    %120 = arith.addf %101, %119 : vector<32x64xf32>
    %121 = vector.broadcast %58 : vector<1x64xbf16> to vector<32x64xbf16>
    %122 = arith.mulf %79, %121 : vector<32x64xbf16>
    %123 = vector.broadcast %58 : vector<1x64xbf16> to vector<32x64xbf16>
    %124 = arith.mulf %81, %123 : vector<32x64xbf16>
    %cst_34 = arith.constant dense<0.000000e+00> : vector<32x32xf32>
    %125 = tpu.matmul %77, %122, %cst_34 {dimension_numbers = #tpu.dot_dimension_numbers<[1], [1], [0], [0], [0, 0, 1, 0], [], []>} : vector<32x64xbf16>, vector<32x64xbf16>, vector<32x32xf32> -> vector<32x32xf32>
    %126 = arith.addf %125, %33 : vector<32x32xf32>
    %cst_35 = arith.constant dense<0xFF800000> : vector<32xf32>
    %127 = vector.multi_reduction <maximumf>, %126, %cst_35 [1] : vector<32x32xf32> to vector<32xf32>
    %128 = vector.shape_cast %127 : vector<32xf32> to vector<32x1xf32>
    %129 = vector.broadcast %128 : vector<32x1xf32> to vector<32x32xf32>
    %130 = arith.subf %126, %129 : vector<32x32xf32>
    %131 = math.exp %130 : vector<32x32xf32>
    %cst_36 = arith.constant dense<0.000000e+00> : vector<32xf32>
    %132 = vector.multi_reduction <add>, %131, %cst_36 [1] : vector<32x32xf32> to vector<32xf32>
    %133 = vector.shape_cast %132 : vector<32xf32> to vector<32x1xf32>
    %134 = tpu.reciprocal %133 {approx = true} : vector<32x1xf32> -> vector<32x1xf32>
    %135 = vector.broadcast %134 : vector<32x1xf32> to vector<32x32xf32>
    %136 = arith.mulf %131, %135 : vector<32x32xf32>
    %137 = arith.truncf %136 : vector<32x32xf32> to vector<32x32xbf16>
    %cst_37 = arith.constant dense<0.000000e+00> : vector<32x64xf32>
    %138 = tpu.matmul %137, %124, %cst_37 {dimension_numbers = #tpu.dot_dimension_numbers<[1], [0], [0], [1], [0, 0, 1, 1], [], []>} : vector<32x32xbf16>, vector<32x64xbf16>, vector<32x64xf32> -> vector<32x64xf32>
    %139 = arith.addf %120, %138 : vector<32x64xf32>
    %140 = vector.broadcast %66 : vector<1x64xbf16> to vector<32x64xbf16>
    %141 = arith.mulf %79, %140 : vector<32x64xbf16>
    %142 = vector.broadcast %66 : vector<1x64xbf16> to vector<32x64xbf16>
    %143 = arith.mulf %81, %142 : vector<32x64xbf16>
    %cst_38 = arith.constant dense<0.000000e+00> : vector<32x32xf32>
    %144 = tpu.matmul %77, %141, %cst_38 {dimension_numbers = #tpu.dot_dimension_numbers<[1], [1], [0], [0], [0, 0, 1, 0], [], []>} : vector<32x64xbf16>, vector<32x64xbf16>, vector<32x32xf32> -> vector<32x32xf32>
    %145 = arith.addf %144, %33 : vector<32x32xf32>
    %cst_39 = arith.constant dense<0xFF800000> : vector<32xf32>
    %146 = vector.multi_reduction <maximumf>, %145, %cst_39 [1] : vector<32x32xf32> to vector<32xf32>
    %147 = vector.shape_cast %146 : vector<32xf32> to vector<32x1xf32>
    %148 = vector.broadcast %147 : vector<32x1xf32> to vector<32x32xf32>
    %149 = arith.subf %145, %148 : vector<32x32xf32>
    %150 = math.exp %149 : vector<32x32xf32>
    %cst_40 = arith.constant dense<0.000000e+00> : vector<32xf32>
    %151 = vector.multi_reduction <add>, %150, %cst_40 [1] : vector<32x32xf32> to vector<32xf32>
    %152 = vector.shape_cast %151 : vector<32xf32> to vector<32x1xf32>
    %153 = tpu.reciprocal %152 {approx = true} : vector<32x1xf32> -> vector<32x1xf32>
    %154 = vector.broadcast %153 : vector<32x1xf32> to vector<32x32xf32>
    %155 = arith.mulf %150, %154 : vector<32x32xf32>
    %156 = arith.truncf %155 : vector<32x32xf32> to vector<32x32xbf16>
    %cst_41 = arith.constant dense<0.000000e+00> : vector<32x64xf32>
    %157 = tpu.matmul %156, %143, %cst_41 {dimension_numbers = #tpu.dot_dimension_numbers<[1], [0], [0], [1], [0, 0, 1, 1], [], []>} : vector<32x32xbf16>, vector<32x64xbf16>, vector<32x64xf32> -> vector<32x64xf32>
    %158 = arith.addf %139, %157 : vector<32x64xf32>
    %159 = arith.truncf %158 : vector<32x64xf32> to vector<32x64xbf16>
    %c0_42 = arith.constant 0 : index
    %c0_43 = arith.constant 0 : index
    %c0_44 = arith.constant 0 : index
    %160 = vector.load %arg6[%c0_42, %c0_43, %c0_44] : memref<2x64x64xbf16, #tpu.memory_space<vmem>>, vector<1x64x64xbf16>
    %161 = vector.shape_cast %160 : vector<1x64x64xbf16> to vector<64x64xbf16>
    %cst_45 = arith.constant dense<0.000000e+00> : vector<32x64xf32>
    %162 = tpu.matmul %159, %161, %cst_45 {dimension_numbers = #tpu.dot_dimension_numbers<[1], [0], [0], [1], [0, 0, 1, 1], [], []>} : vector<32x64xbf16>, vector<64x64xbf16>, vector<32x64xf32> -> vector<32x64xf32>
    %c6 = arith.constant 6 : index
    %c0_46 = arith.constant 0 : index
    %163 = vector.load %arg11[%c6, %c0_46] : memref<21x192xf32, #tpu.memory_space<vmem>>, vector<1x64xf32>
    %164 = vector.broadcast %163 : vector<1x64xf32> to vector<32x64xf32>
    %165 = arith.addf %162, %164 : vector<32x64xf32>
    %166 = arith.addf %32, %165 : vector<32x64xf32>
    %c7 = arith.constant 7 : index
    %c0_47 = arith.constant 0 : index
    %167 = vector.load %arg11[%c7, %c0_47] : memref<21x192xf32, #tpu.memory_space<vmem>>, vector<1x64xf32>
    %c8 = arith.constant 8 : index
    %c0_48 = arith.constant 0 : index
    %168 = vector.load %arg11[%c8, %c0_48] : memref<21x192xf32, #tpu.memory_space<vmem>>, vector<1x64xf32>
    %cst_49 = arith.constant dense<0.000000e+00> : vector<32xf32>
    %169 = vector.multi_reduction <add>, %166, %cst_49 [1] : vector<32x64xf32> to vector<32xf32>
    %170 = vector.shape_cast %169 : vector<32xf32> to vector<32x1xf32>
    %cst_50 = arith.constant 6.400000e+01 : f32
    %171 = vector.broadcast %cst_50 : f32 to vector<32x1xf32>
    %172 = arith.divf %170, %171 : vector<32x1xf32>
    %173 = vector.broadcast %172 : vector<32x1xf32> to vector<32x64xf32>
    %174 = arith.subf %166, %173 : vector<32x64xf32>
    %175 = arith.mulf %174, %174 : vector<32x64xf32>
    %cst_51 = arith.constant dense<0.000000e+00> : vector<32xf32>
    %176 = vector.multi_reduction <add>, %175, %cst_51 [1] : vector<32x64xf32> to vector<32xf32>
    %177 = vector.shape_cast %176 : vector<32xf32> to vector<32x1xf32>
    %cst_52 = arith.constant 6.400000e+01 : f32
    %178 = vector.broadcast %cst_52 : f32 to vector<32x1xf32>
    %179 = arith.divf %177, %178 : vector<32x1xf32>
    %180 = vector.broadcast %172 : vector<32x1xf32> to vector<32x64xf32>
    %181 = arith.subf %166, %180 : vector<32x64xf32>
    %cst_53 = arith.constant 9.99999996E-13 : f32
    %182 = vector.broadcast %cst_53 : f32 to vector<32x1xf32>
    %183 = arith.addf %179, %182 : vector<32x1xf32>
    %184 = math.rsqrt %183 : vector<32x1xf32>
    %185 = vector.broadcast %184 : vector<32x1xf32> to vector<32x64xf32>
    %186 = arith.mulf %181, %185 : vector<32x64xf32>
    %187 = vector.broadcast %167 : vector<1x64xf32> to vector<32x64xf32>
    %188 = arith.mulf %186, %187 : vector<32x64xf32>
    %189 = vector.broadcast %168 : vector<1x64xf32> to vector<32x64xf32>
    %190 = arith.addf %188, %189 : vector<32x64xf32>
    %191 = arith.truncf %190 : vector<32x64xf32> to vector<32x64xbf16>
    %c0_54 = arith.constant 0 : index
    %c0_55 = arith.constant 0 : index
    %c0_56 = arith.constant 0 : index
    %192 = vector.load %arg7[%c0_54, %c0_55, %c0_56] : memref<2x64x128xbf16, #tpu.memory_space<vmem>>, vector<1x64x128xbf16>
    %193 = vector.shape_cast %192 : vector<1x64x128xbf16> to vector<64x128xbf16>
    %cst_57 = arith.constant dense<0.000000e+00> : vector<32x128xf32>
    %194 = tpu.matmul %191, %193, %cst_57 {dimension_numbers = #tpu.dot_dimension_numbers<[1], [0], [0], [1], [0, 0, 1, 1], [], []>} : vector<32x64xbf16>, vector<64x128xbf16>, vector<32x128xf32> -> vector<32x128xf32>
    %c9 = arith.constant 9 : index
    %c0_58 = arith.constant 0 : index
    %195 = vector.load %arg11[%c9, %c0_58] : memref<21x192xf32, #tpu.memory_space<vmem>>, vector<1x128xf32>
    %196 = vector.broadcast %195 : vector<1x128xf32> to vector<32x128xf32>
    %197 = arith.addf %194, %196 : vector<32x128xf32>
    %cst_59 = arith.constant 5.000000e-01 : f32
    %198 = vector.broadcast %cst_59 : f32 to vector<32x128xf32>
    %199 = arith.mulf %198, %197 : vector<32x128xf32>
    %cst_60 = arith.constant 4.471500e-02 : f32
    %200 = vector.broadcast %cst_60 : f32 to vector<32x128xf32>
    %201 = arith.mulf %200, %197 : vector<32x128xf32>
    %202 = arith.mulf %201, %197 : vector<32x128xf32>
    %203 = arith.mulf %202, %197 : vector<32x128xf32>
    %204 = arith.addf %197, %203 : vector<32x128xf32>
    %cst_61 = arith.constant 0.797884583 : f32
    %205 = vector.broadcast %cst_61 : f32 to vector<32x128xf32>
    %206 = arith.mulf %205, %204 : vector<32x128xf32>
    %207 = math.tanh %206 : vector<32x128xf32>
    %cst_62 = arith.constant 1.000000e+00 : f32
    %208 = vector.broadcast %cst_62 : f32 to vector<32x128xf32>
    %209 = arith.addf %208, %207 : vector<32x128xf32>
    %210 = arith.mulf %199, %209 : vector<32x128xf32>
    %211 = arith.truncf %210 : vector<32x128xf32> to vector<32x128xbf16>
    %c0_63 = arith.constant 0 : index
    %c0_64 = arith.constant 0 : index
    %c0_65 = arith.constant 0 : index
    %212 = vector.load %arg8[%c0_63, %c0_64, %c0_65] : memref<2x128x64xbf16, #tpu.memory_space<vmem>>, vector<1x128x64xbf16>
    %213 = vector.shape_cast %212 : vector<1x128x64xbf16> to vector<128x64xbf16>
    %cst_66 = arith.constant dense<0.000000e+00> : vector<32x64xf32>
    %214 = tpu.matmul %211, %213, %cst_66 {dimension_numbers = #tpu.dot_dimension_numbers<[1], [0], [0], [1], [0, 0, 1, 1], [], []>} : vector<32x128xbf16>, vector<128x64xbf16>, vector<32x64xf32> -> vector<32x64xf32>
    %c10 = arith.constant 10 : index
    %c0_67 = arith.constant 0 : index
    %215 = vector.load %arg11[%c10, %c0_67] : memref<21x192xf32, #tpu.memory_space<vmem>>, vector<1x64xf32>
    %216 = vector.broadcast %215 : vector<1x64xf32> to vector<32x64xf32>
    %217 = arith.addf %214, %216 : vector<32x64xf32>
    %218 = arith.addf %190, %217 : vector<32x64xf32>
    %c11 = arith.constant 11 : index
    %c0_68 = arith.constant 0 : index
    %219 = vector.load %arg11[%c11, %c0_68] : memref<21x192xf32, #tpu.memory_space<vmem>>, vector<1x64xf32>
    %c12 = arith.constant 12 : index
    %c0_69 = arith.constant 0 : index
    %220 = vector.load %arg11[%c12, %c0_69] : memref<21x192xf32, #tpu.memory_space<vmem>>, vector<1x64xf32>
    %cst_70 = arith.constant dense<0.000000e+00> : vector<32xf32>
    %221 = vector.multi_reduction <add>, %218, %cst_70 [1] : vector<32x64xf32> to vector<32xf32>
    %222 = vector.shape_cast %221 : vector<32xf32> to vector<32x1xf32>
    %cst_71 = arith.constant 6.400000e+01 : f32
    %223 = vector.broadcast %cst_71 : f32 to vector<32x1xf32>
    %224 = arith.divf %222, %223 : vector<32x1xf32>
    %225 = vector.broadcast %224 : vector<32x1xf32> to vector<32x64xf32>
    %226 = arith.subf %218, %225 : vector<32x64xf32>
    %227 = arith.mulf %226, %226 : vector<32x64xf32>
    %cst_72 = arith.constant dense<0.000000e+00> : vector<32xf32>
    %228 = vector.multi_reduction <add>, %227, %cst_72 [1] : vector<32x64xf32> to vector<32xf32>
    %229 = vector.shape_cast %228 : vector<32xf32> to vector<32x1xf32>
    %cst_73 = arith.constant 6.400000e+01 : f32
    %230 = vector.broadcast %cst_73 : f32 to vector<32x1xf32>
    %231 = arith.divf %229, %230 : vector<32x1xf32>
    %232 = vector.broadcast %224 : vector<32x1xf32> to vector<32x64xf32>
    %233 = arith.subf %218, %232 : vector<32x64xf32>
    %cst_74 = arith.constant 9.99999996E-13 : f32
    %234 = vector.broadcast %cst_74 : f32 to vector<32x1xf32>
    %235 = arith.addf %231, %234 : vector<32x1xf32>
    %236 = math.rsqrt %235 : vector<32x1xf32>
    %237 = vector.broadcast %236 : vector<32x1xf32> to vector<32x64xf32>
    %238 = arith.mulf %233, %237 : vector<32x64xf32>
    %239 = vector.broadcast %219 : vector<1x64xf32> to vector<32x64xf32>
    %240 = arith.mulf %238, %239 : vector<32x64xf32>
    %241 = vector.broadcast %220 : vector<1x64xf32> to vector<32x64xf32>
    %242 = arith.addf %240, %241 : vector<32x64xf32>
    %243 = arith.truncf %242 : vector<32x64xf32> to vector<32x64xbf16>
    %c1_75 = arith.constant 1 : index
    %c0_76 = arith.constant 0 : index
    %c0_77 = arith.constant 0 : index
    %244 = vector.load %arg5[%c1_75, %c0_76, %c0_77] : memref<2x64x192xbf16, #tpu.memory_space<vmem>>, vector<1x64x192xbf16>
    %245 = vector.shape_cast %244 : vector<1x64x192xbf16> to vector<64x192xbf16>
    %cst_78 = arith.constant dense<0.000000e+00> : vector<32x192xf32>
    %246 = tpu.matmul %243, %245, %cst_78 {dimension_numbers = #tpu.dot_dimension_numbers<[1], [0], [0], [1], [0, 0, 1, 1], [], []>} : vector<32x64xbf16>, vector<64x192xbf16>, vector<32x192xf32> -> vector<32x192xf32>
    %c13 = arith.constant 13 : index
    %c0_79 = arith.constant 0 : index
    %247 = vector.load %arg11[%c13, %c0_79] : memref<21x192xf32, #tpu.memory_space<vmem>>, vector<1x192xf32>
    %248 = vector.broadcast %247 : vector<1x192xf32> to vector<32x192xf32>
    %249 = arith.addf %246, %248 : vector<32x192xf32>
    %250 = vector.extract_strided_slice %249 {offsets = [0, 0], sizes = [32, 64], strides = [1, 1]} : vector<32x192xf32> to vector<32x64xf32>
    %cst_80 = arith.constant 2.500000e-01 : f32
    %251 = vector.broadcast %cst_80 : f32 to vector<32x64xf32>
    %252 = arith.mulf %250, %251 : vector<32x64xf32>
    %253 = arith.truncf %252 : vector<32x64xf32> to vector<32x64xbf16>
    %254 = vector.extract_strided_slice %249 {offsets = [0, 64], sizes = [32, 64], strides = [1, 1]} : vector<32x192xf32> to vector<32x64xf32>
    %255 = arith.truncf %254 : vector<32x64xf32> to vector<32x64xbf16>
    %256 = vector.extract_strided_slice %249 {offsets = [0, 128], sizes = [32, 64], strides = [1, 1]} : vector<32x192xf32> to vector<32x64xf32>
    %257 = arith.truncf %256 : vector<32x64xf32> to vector<32x64xbf16>
    %cst_81 = arith.constant 0.000000e+00 : f32
    %258 = vector.broadcast %cst_81 : f32 to vector<32x64xf32>
    %259 = vector.broadcast %42 : vector<1x64xbf16> to vector<32x64xbf16>
    %260 = arith.mulf %255, %259 : vector<32x64xbf16>
    %261 = vector.broadcast %42 : vector<1x64xbf16> to vector<32x64xbf16>
    %262 = arith.mulf %257, %261 : vector<32x64xbf16>
    %cst_82 = arith.constant dense<0.000000e+00> : vector<32x32xf32>
    %263 = tpu.matmul %253, %260, %cst_82 {dimension_numbers = #tpu.dot_dimension_numbers<[1], [1], [0], [0], [0, 0, 1, 0], [], []>} : vector<32x64xbf16>, vector<32x64xbf16>, vector<32x32xf32> -> vector<32x32xf32>
    %264 = arith.addf %263, %33 : vector<32x32xf32>
    %cst_83 = arith.constant dense<0xFF800000> : vector<32xf32>
    %265 = vector.multi_reduction <maximumf>, %264, %cst_83 [1] : vector<32x32xf32> to vector<32xf32>
    %266 = vector.shape_cast %265 : vector<32xf32> to vector<32x1xf32>
    %267 = vector.broadcast %266 : vector<32x1xf32> to vector<32x32xf32>
    %268 = arith.subf %264, %267 : vector<32x32xf32>
    %269 = math.exp %268 : vector<32x32xf32>
    %cst_84 = arith.constant dense<0.000000e+00> : vector<32xf32>
    %270 = vector.multi_reduction <add>, %269, %cst_84 [1] : vector<32x32xf32> to vector<32xf32>
    %271 = vector.shape_cast %270 : vector<32xf32> to vector<32x1xf32>
    %272 = tpu.reciprocal %271 {approx = true} : vector<32x1xf32> -> vector<32x1xf32>
    %273 = vector.broadcast %272 : vector<32x1xf32> to vector<32x32xf32>
    %274 = arith.mulf %269, %273 : vector<32x32xf32>
    %275 = arith.truncf %274 : vector<32x32xf32> to vector<32x32xbf16>
    %cst_85 = arith.constant dense<0.000000e+00> : vector<32x64xf32>
    %276 = tpu.matmul %275, %262, %cst_85 {dimension_numbers = #tpu.dot_dimension_numbers<[1], [0], [0], [1], [0, 0, 1, 1], [], []>} : vector<32x32xbf16>, vector<32x64xbf16>, vector<32x64xf32> -> vector<32x64xf32>
    %277 = arith.addf %258, %276 : vector<32x64xf32>
    %278 = vector.broadcast %50 : vector<1x64xbf16> to vector<32x64xbf16>
    %279 = arith.mulf %255, %278 : vector<32x64xbf16>
    %280 = vector.broadcast %50 : vector<1x64xbf16> to vector<32x64xbf16>
    %281 = arith.mulf %257, %280 : vector<32x64xbf16>
    %cst_86 = arith.constant dense<0.000000e+00> : vector<32x32xf32>
    %282 = tpu.matmul %253, %279, %cst_86 {dimension_numbers = #tpu.dot_dimension_numbers<[1], [1], [0], [0], [0, 0, 1, 0], [], []>} : vector<32x64xbf16>, vector<32x64xbf16>, vector<32x32xf32> -> vector<32x32xf32>
    %283 = arith.addf %282, %33 : vector<32x32xf32>
    %cst_87 = arith.constant dense<0xFF800000> : vector<32xf32>
    %284 = vector.multi_reduction <maximumf>, %283, %cst_87 [1] : vector<32x32xf32> to vector<32xf32>
    %285 = vector.shape_cast %284 : vector<32xf32> to vector<32x1xf32>
    %286 = vector.broadcast %285 : vector<32x1xf32> to vector<32x32xf32>
    %287 = arith.subf %283, %286 : vector<32x32xf32>
    %288 = math.exp %287 : vector<32x32xf32>
    %cst_88 = arith.constant dense<0.000000e+00> : vector<32xf32>
    %289 = vector.multi_reduction <add>, %288, %cst_88 [1] : vector<32x32xf32> to vector<32xf32>
    %290 = vector.shape_cast %289 : vector<32xf32> to vector<32x1xf32>
    %291 = tpu.reciprocal %290 {approx = true} : vector<32x1xf32> -> vector<32x1xf32>
    %292 = vector.broadcast %291 : vector<32x1xf32> to vector<32x32xf32>
    %293 = arith.mulf %288, %292 : vector<32x32xf32>
    %294 = arith.truncf %293 : vector<32x32xf32> to vector<32x32xbf16>
    %cst_89 = arith.constant dense<0.000000e+00> : vector<32x64xf32>
    %295 = tpu.matmul %294, %281, %cst_89 {dimension_numbers = #tpu.dot_dimension_numbers<[1], [0], [0], [1], [0, 0, 1, 1], [], []>} : vector<32x32xbf16>, vector<32x64xbf16>, vector<32x64xf32> -> vector<32x64xf32>
    %296 = arith.addf %277, %295 : vector<32x64xf32>
    %297 = vector.broadcast %58 : vector<1x64xbf16> to vector<32x64xbf16>
    %298 = arith.mulf %255, %297 : vector<32x64xbf16>
    %299 = vector.broadcast %58 : vector<1x64xbf16> to vector<32x64xbf16>
    %300 = arith.mulf %257, %299 : vector<32x64xbf16>
    %cst_90 = arith.constant dense<0.000000e+00> : vector<32x32xf32>
    %301 = tpu.matmul %253, %298, %cst_90 {dimension_numbers = #tpu.dot_dimension_numbers<[1], [1], [0], [0], [0, 0, 1, 0], [], []>} : vector<32x64xbf16>, vector<32x64xbf16>, vector<32x32xf32> -> vector<32x32xf32>
    %302 = arith.addf %301, %33 : vector<32x32xf32>
    %cst_91 = arith.constant dense<0xFF800000> : vector<32xf32>
    %303 = vector.multi_reduction <maximumf>, %302, %cst_91 [1] : vector<32x32xf32> to vector<32xf32>
    %304 = vector.shape_cast %303 : vector<32xf32> to vector<32x1xf32>
    %305 = vector.broadcast %304 : vector<32x1xf32> to vector<32x32xf32>
    %306 = arith.subf %302, %305 : vector<32x32xf32>
    %307 = math.exp %306 : vector<32x32xf32>
    %cst_92 = arith.constant dense<0.000000e+00> : vector<32xf32>
    %308 = vector.multi_reduction <add>, %307, %cst_92 [1] : vector<32x32xf32> to vector<32xf32>
    %309 = vector.shape_cast %308 : vector<32xf32> to vector<32x1xf32>
    %310 = tpu.reciprocal %309 {approx = true} : vector<32x1xf32> -> vector<32x1xf32>
    %311 = vector.broadcast %310 : vector<32x1xf32> to vector<32x32xf32>
    %312 = arith.mulf %307, %311 : vector<32x32xf32>
    %313 = arith.truncf %312 : vector<32x32xf32> to vector<32x32xbf16>
    %cst_93 = arith.constant dense<0.000000e+00> : vector<32x64xf32>
    %314 = tpu.matmul %313, %300, %cst_93 {dimension_numbers = #tpu.dot_dimension_numbers<[1], [0], [0], [1], [0, 0, 1, 1], [], []>} : vector<32x32xbf16>, vector<32x64xbf16>, vector<32x64xf32> -> vector<32x64xf32>
    %315 = arith.addf %296, %314 : vector<32x64xf32>
    %316 = vector.broadcast %66 : vector<1x64xbf16> to vector<32x64xbf16>
    %317 = arith.mulf %255, %316 : vector<32x64xbf16>
    %318 = vector.broadcast %66 : vector<1x64xbf16> to vector<32x64xbf16>
    %319 = arith.mulf %257, %318 : vector<32x64xbf16>
    %cst_94 = arith.constant dense<0.000000e+00> : vector<32x32xf32>
    %320 = tpu.matmul %253, %317, %cst_94 {dimension_numbers = #tpu.dot_dimension_numbers<[1], [1], [0], [0], [0, 0, 1, 0], [], []>} : vector<32x64xbf16>, vector<32x64xbf16>, vector<32x32xf32> -> vector<32x32xf32>
    %321 = arith.addf %320, %33 : vector<32x32xf32>
    %cst_95 = arith.constant dense<0xFF800000> : vector<32xf32>
    %322 = vector.multi_reduction <maximumf>, %321, %cst_95 [1] : vector<32x32xf32> to vector<32xf32>
    %323 = vector.shape_cast %322 : vector<32xf32> to vector<32x1xf32>
    %324 = vector.broadcast %323 : vector<32x1xf32> to vector<32x32xf32>
    %325 = arith.subf %321, %324 : vector<32x32xf32>
    %326 = math.exp %325 : vector<32x32xf32>
    %cst_96 = arith.constant dense<0.000000e+00> : vector<32xf32>
    %327 = vector.multi_reduction <add>, %326, %cst_96 [1] : vector<32x32xf32> to vector<32xf32>
    %328 = vector.shape_cast %327 : vector<32xf32> to vector<32x1xf32>
    %329 = tpu.reciprocal %328 {approx = true} : vector<32x1xf32> -> vector<32x1xf32>
    %330 = vector.broadcast %329 : vector<32x1xf32> to vector<32x32xf32>
    %331 = arith.mulf %326, %330 : vector<32x32xf32>
    %332 = arith.truncf %331 : vector<32x32xf32> to vector<32x32xbf16>
    %cst_97 = arith.constant dense<0.000000e+00> : vector<32x64xf32>
    %333 = tpu.matmul %332, %319, %cst_97 {dimension_numbers = #tpu.dot_dimension_numbers<[1], [0], [0], [1], [0, 0, 1, 1], [], []>} : vector<32x32xbf16>, vector<32x64xbf16>, vector<32x64xf32> -> vector<32x64xf32>
    %334 = arith.addf %315, %333 : vector<32x64xf32>
    %335 = arith.truncf %334 : vector<32x64xf32> to vector<32x64xbf16>
    %c1_98 = arith.constant 1 : index
    %c0_99 = arith.constant 0 : index
    %c0_100 = arith.constant 0 : index
    %336 = vector.load %arg6[%c1_98, %c0_99, %c0_100] : memref<2x64x64xbf16, #tpu.memory_space<vmem>>, vector<1x64x64xbf16>
    %337 = vector.shape_cast %336 : vector<1x64x64xbf16> to vector<64x64xbf16>
    %cst_101 = arith.constant dense<0.000000e+00> : vector<32x64xf32>
    %338 = tpu.matmul %335, %337, %cst_101 {dimension_numbers = #tpu.dot_dimension_numbers<[1], [0], [0], [1], [0, 0, 1, 1], [], []>} : vector<32x64xbf16>, vector<64x64xbf16>, vector<32x64xf32> -> vector<32x64xf32>
    %c14 = arith.constant 14 : index
    %c0_102 = arith.constant 0 : index
    %339 = vector.load %arg11[%c14, %c0_102] : memref<21x192xf32, #tpu.memory_space<vmem>>, vector<1x64xf32>
    %340 = vector.broadcast %339 : vector<1x64xf32> to vector<32x64xf32>
    %341 = arith.addf %338, %340 : vector<32x64xf32>
    %342 = arith.addf %242, %341 : vector<32x64xf32>
    %c15 = arith.constant 15 : index
    %c0_103 = arith.constant 0 : index
    %343 = vector.load %arg11[%c15, %c0_103] : memref<21x192xf32, #tpu.memory_space<vmem>>, vector<1x64xf32>
    %c16 = arith.constant 16 : index
    %c0_104 = arith.constant 0 : index
    %344 = vector.load %arg11[%c16, %c0_104] : memref<21x192xf32, #tpu.memory_space<vmem>>, vector<1x64xf32>
    %cst_105 = arith.constant dense<0.000000e+00> : vector<32xf32>
    %345 = vector.multi_reduction <add>, %342, %cst_105 [1] : vector<32x64xf32> to vector<32xf32>
    %346 = vector.shape_cast %345 : vector<32xf32> to vector<32x1xf32>
    %cst_106 = arith.constant 6.400000e+01 : f32
    %347 = vector.broadcast %cst_106 : f32 to vector<32x1xf32>
    %348 = arith.divf %346, %347 : vector<32x1xf32>
    %349 = vector.broadcast %348 : vector<32x1xf32> to vector<32x64xf32>
    %350 = arith.subf %342, %349 : vector<32x64xf32>
    %351 = arith.mulf %350, %350 : vector<32x64xf32>
    %cst_107 = arith.constant dense<0.000000e+00> : vector<32xf32>
    %352 = vector.multi_reduction <add>, %351, %cst_107 [1] : vector<32x64xf32> to vector<32xf32>
    %353 = vector.shape_cast %352 : vector<32xf32> to vector<32x1xf32>
    %cst_108 = arith.constant 6.400000e+01 : f32
    %354 = vector.broadcast %cst_108 : f32 to vector<32x1xf32>
    %355 = arith.divf %353, %354 : vector<32x1xf32>
    %356 = vector.broadcast %348 : vector<32x1xf32> to vector<32x64xf32>
    %357 = arith.subf %342, %356 : vector<32x64xf32>
    %cst_109 = arith.constant 9.99999996E-13 : f32
    %358 = vector.broadcast %cst_109 : f32 to vector<32x1xf32>
    %359 = arith.addf %355, %358 : vector<32x1xf32>
    %360 = math.rsqrt %359 : vector<32x1xf32>
    %361 = vector.broadcast %360 : vector<32x1xf32> to vector<32x64xf32>
    %362 = arith.mulf %357, %361 : vector<32x64xf32>
    %363 = vector.broadcast %343 : vector<1x64xf32> to vector<32x64xf32>
    %364 = arith.mulf %362, %363 : vector<32x64xf32>
    %365 = vector.broadcast %344 : vector<1x64xf32> to vector<32x64xf32>
    %366 = arith.addf %364, %365 : vector<32x64xf32>
    %367 = arith.truncf %366 : vector<32x64xf32> to vector<32x64xbf16>
    %c1_110 = arith.constant 1 : index
    %c0_111 = arith.constant 0 : index
    %c0_112 = arith.constant 0 : index
    %368 = vector.load %arg7[%c1_110, %c0_111, %c0_112] : memref<2x64x128xbf16, #tpu.memory_space<vmem>>, vector<1x64x128xbf16>
    %369 = vector.shape_cast %368 : vector<1x64x128xbf16> to vector<64x128xbf16>
    %cst_113 = arith.constant dense<0.000000e+00> : vector<32x128xf32>
    %370 = tpu.matmul %367, %369, %cst_113 {dimension_numbers = #tpu.dot_dimension_numbers<[1], [0], [0], [1], [0, 0, 1, 1], [], []>} : vector<32x64xbf16>, vector<64x128xbf16>, vector<32x128xf32> -> vector<32x128xf32>
    %c17 = arith.constant 17 : index
    %c0_114 = arith.constant 0 : index
    %371 = vector.load %arg11[%c17, %c0_114] : memref<21x192xf32, #tpu.memory_space<vmem>>, vector<1x128xf32>
    %372 = vector.broadcast %371 : vector<1x128xf32> to vector<32x128xf32>
    %373 = arith.addf %370, %372 : vector<32x128xf32>
    %cst_115 = arith.constant 5.000000e-01 : f32
    %374 = vector.broadcast %cst_115 : f32 to vector<32x128xf32>
    %375 = arith.mulf %374, %373 : vector<32x128xf32>
    %cst_116 = arith.constant 4.471500e-02 : f32
    %376 = vector.broadcast %cst_116 : f32 to vector<32x128xf32>
    %377 = arith.mulf %376, %373 : vector<32x128xf32>
    %378 = arith.mulf %377, %373 : vector<32x128xf32>
    %379 = arith.mulf %378, %373 : vector<32x128xf32>
    %380 = arith.addf %373, %379 : vector<32x128xf32>
    %cst_117 = arith.constant 0.797884583 : f32
    %381 = vector.broadcast %cst_117 : f32 to vector<32x128xf32>
    %382 = arith.mulf %381, %380 : vector<32x128xf32>
    %383 = math.tanh %382 : vector<32x128xf32>
    %cst_118 = arith.constant 1.000000e+00 : f32
    %384 = vector.broadcast %cst_118 : f32 to vector<32x128xf32>
    %385 = arith.addf %384, %383 : vector<32x128xf32>
    %386 = arith.mulf %375, %385 : vector<32x128xf32>
    %387 = arith.truncf %386 : vector<32x128xf32> to vector<32x128xbf16>
    %c1_119 = arith.constant 1 : index
    %c0_120 = arith.constant 0 : index
    %c0_121 = arith.constant 0 : index
    %388 = vector.load %arg8[%c1_119, %c0_120, %c0_121] : memref<2x128x64xbf16, #tpu.memory_space<vmem>>, vector<1x128x64xbf16>
    %389 = vector.shape_cast %388 : vector<1x128x64xbf16> to vector<128x64xbf16>
    %cst_122 = arith.constant dense<0.000000e+00> : vector<32x64xf32>
    %390 = tpu.matmul %387, %389, %cst_122 {dimension_numbers = #tpu.dot_dimension_numbers<[1], [0], [0], [1], [0, 0, 1, 1], [], []>} : vector<32x128xbf16>, vector<128x64xbf16>, vector<32x64xf32> -> vector<32x64xf32>
    %c18 = arith.constant 18 : index
    %c0_123 = arith.constant 0 : index
    %391 = vector.load %arg11[%c18, %c0_123] : memref<21x192xf32, #tpu.memory_space<vmem>>, vector<1x64xf32>
    %392 = vector.broadcast %391 : vector<1x64xf32> to vector<32x64xf32>
    %393 = arith.addf %390, %392 : vector<32x64xf32>
    %394 = arith.addf %366, %393 : vector<32x64xf32>
    %c19 = arith.constant 19 : index
    %c0_124 = arith.constant 0 : index
    %395 = vector.load %arg11[%c19, %c0_124] : memref<21x192xf32, #tpu.memory_space<vmem>>, vector<1x64xf32>
    %c20 = arith.constant 20 : index
    %c0_125 = arith.constant 0 : index
    %396 = vector.load %arg11[%c20, %c0_125] : memref<21x192xf32, #tpu.memory_space<vmem>>, vector<1x64xf32>
    %cst_126 = arith.constant dense<0.000000e+00> : vector<32xf32>
    %397 = vector.multi_reduction <add>, %394, %cst_126 [1] : vector<32x64xf32> to vector<32xf32>
    %398 = vector.shape_cast %397 : vector<32xf32> to vector<32x1xf32>
    %cst_127 = arith.constant 6.400000e+01 : f32
    %399 = vector.broadcast %cst_127 : f32 to vector<32x1xf32>
    %400 = arith.divf %398, %399 : vector<32x1xf32>
    %401 = vector.broadcast %400 : vector<32x1xf32> to vector<32x64xf32>
    %402 = arith.subf %394, %401 : vector<32x64xf32>
    %403 = arith.mulf %402, %402 : vector<32x64xf32>
    %cst_128 = arith.constant dense<0.000000e+00> : vector<32xf32>
    %404 = vector.multi_reduction <add>, %403, %cst_128 [1] : vector<32x64xf32> to vector<32xf32>
    %405 = vector.shape_cast %404 : vector<32xf32> to vector<32x1xf32>
    %cst_129 = arith.constant 6.400000e+01 : f32
    %406 = vector.broadcast %cst_129 : f32 to vector<32x1xf32>
    %407 = arith.divf %405, %406 : vector<32x1xf32>
    %408 = vector.broadcast %400 : vector<32x1xf32> to vector<32x64xf32>
    %409 = arith.subf %394, %408 : vector<32x64xf32>
    %cst_130 = arith.constant 9.99999996E-13 : f32
    %410 = vector.broadcast %cst_130 : f32 to vector<32x1xf32>
    %411 = arith.addf %407, %410 : vector<32x1xf32>
    %412 = math.rsqrt %411 : vector<32x1xf32>
    %413 = vector.broadcast %412 : vector<32x1xf32> to vector<32x64xf32>
    %414 = arith.mulf %409, %413 : vector<32x64xf32>
    %415 = vector.broadcast %395 : vector<1x64xf32> to vector<32x64xf32>
    %416 = arith.mulf %414, %415 : vector<32x64xf32>
    %417 = vector.broadcast %396 : vector<1x64xf32> to vector<32x64xf32>
    %418 = arith.addf %416, %417 : vector<32x64xf32>
    %419 = arith.truncf %418 : vector<32x64xf32> to vector<32x64xbf16>
    %c0_131 = arith.constant 0 : index
    %c0_132 = arith.constant 0 : index
    %420 = vector.load %arg9[%c0_131, %c0_132] : memref<64x64xbf16, #tpu.memory_space<vmem>>, vector<64x64xbf16>
    %cst_133 = arith.constant dense<0.000000e+00> : vector<32x64xf32>
    %421 = tpu.matmul %419, %420, %cst_133 {dimension_numbers = #tpu.dot_dimension_numbers<[1], [0], [0], [1], [0, 0, 1, 1], [], []>} : vector<32x64xbf16>, vector<64x64xbf16>, vector<32x64xf32> -> vector<32x64xf32>
    %c3 = arith.constant 3 : index
    %c0_134 = arith.constant 0 : index
    %422 = vector.load %arg11[%c3, %c0_134] : memref<21x192xf32, #tpu.memory_space<vmem>>, vector<1x64xf32>
    %423 = vector.broadcast %422 : vector<1x64xf32> to vector<32x64xf32>
    %424 = arith.addf %421, %423 : vector<32x64xf32>
    %cst_135 = arith.constant 5.000000e-01 : f32
    %425 = vector.broadcast %cst_135 : f32 to vector<32x64xf32>
    %426 = arith.mulf %425, %424 : vector<32x64xf32>
    %cst_136 = arith.constant 4.471500e-02 : f32
    %427 = vector.broadcast %cst_136 : f32 to vector<32x64xf32>
    %428 = arith.mulf %427, %424 : vector<32x64xf32>
    %429 = arith.mulf %428, %424 : vector<32x64xf32>
    %430 = arith.mulf %429, %424 : vector<32x64xf32>
    %431 = arith.addf %424, %430 : vector<32x64xf32>
    %cst_137 = arith.constant 0.797884583 : f32
    %432 = vector.broadcast %cst_137 : f32 to vector<32x64xf32>
    %433 = arith.mulf %432, %431 : vector<32x64xf32>
    %434 = math.tanh %433 : vector<32x64xf32>
    %cst_138 = arith.constant 1.000000e+00 : f32
    %435 = vector.broadcast %cst_138 : f32 to vector<32x64xf32>
    %436 = arith.addf %435, %434 : vector<32x64xf32>
    %437 = arith.mulf %426, %436 : vector<32x64xf32>
    %438 = arith.truncf %437 : vector<32x64xf32> to vector<32x64xbf16>
    %c0_139 = arith.constant 0 : index
    %c0_140 = arith.constant 0 : index
    %439 = vector.load %arg10[%c0_139, %c0_140] : memref<64x128xbf16, #tpu.memory_space<vmem>>, vector<64x128xbf16>
    %cst_141 = arith.constant dense<0.000000e+00> : vector<32x128xf32>
    %440 = tpu.matmul %438, %439, %cst_141 {dimension_numbers = #tpu.dot_dimension_numbers<[1], [0], [0], [1], [0, 0, 1, 1], [], []>} : vector<32x64xbf16>, vector<64x128xbf16>, vector<32x128xf32> -> vector<32x128xf32>
    %c4 = arith.constant 4 : index
    %c0_142 = arith.constant 0 : index
    %441 = vector.load %arg11[%c4, %c0_142] : memref<21x192xf32, #tpu.memory_space<vmem>>, vector<1x128xf32>
    %442 = vector.broadcast %441 : vector<1x128xf32> to vector<32x128xf32>
    %443 = arith.addf %440, %442 : vector<32x128xf32>
    %c0_143 = arith.constant 0 : index
    %c0_144 = arith.constant 0 : index
    %444 = vector.load %arg12[%c0_143, %c0_144] : memref<32x128xf32, #tpu.memory_space<vmem>>, vector<32x128xf32>
    tpu.vector_store %arg12[%c0_143, %c0_144], %443 {strides = array<i32>} : memref<32x128xf32, #tpu.memory_space<vmem>>, vector<32x128xf32>,
    return
  }
  func.func @transform_0(%arg0: i32) -> (i32, i32) {
    %c0_i32 = arith.constant 0 : i32
    %c0_i32_0 = arith.constant 0 : i32
    %c0_i32_1 = arith.constant 0 : i32
    return %c0_i32, %c0_i32_0 : i32, i32
  }
  func.func @transform_1(%arg0: i32) -> (i32, i32) {
    %c0_i32 = arith.constant 0 : i32
    %c0_i32_0 = arith.constant 0 : i32
    %c0_i32_1 = arith.constant 0 : i32
    return %c0_i32, %c0_i32_0 : i32, i32
  }
  func.func @transform_2(%arg0: i32) -> (i32, i32) {
    %c0_i32 = arith.constant 0 : i32
    %c0_i32_0 = arith.constant 0 : i32
    %c0_i32_1 = arith.constant 0 : i32
    return %c0_i32, %c0_i32_0 : i32, i32
  }
  func.func @transform_3(%arg0: i32) -> (i32, i32) {
    %c0_i32 = arith.constant 0 : i32
    %c0_i32_0 = arith.constant 0 : i32
    %c0_i32_1 = arith.constant 0 : i32
    return %c0_i32, %c0_i32_0 : i32, i32
  }
  func.func @transform_4(%arg0: i32) -> (i32, i32, i32) {
    %c0_i32 = arith.constant 0 : i32
    %c0_i32_0 = arith.constant 0 : i32
    %c0_i32_1 = arith.constant 0 : i32
    %c0_i32_2 = arith.constant 0 : i32
    return %c0_i32, %c0_i32_0, %c0_i32_1 : i32, i32, i32
  }
  func.func @transform_5(%arg0: i32) -> (i32, i32, i32) {
    %c0_i32 = arith.constant 0 : i32
    %c0_i32_0 = arith.constant 0 : i32
    %c0_i32_1 = arith.constant 0 : i32
    %c0_i32_2 = arith.constant 0 : i32
    return %c0_i32, %c0_i32_0, %c0_i32_1 : i32, i32, i32
  }
  func.func @transform_6(%arg0: i32) -> (i32, i32, i32) {
    %c0_i32 = arith.constant 0 : i32
    %c0_i32_0 = arith.constant 0 : i32
    %c0_i32_1 = arith.constant 0 : i32
    %c0_i32_2 = arith.constant 0 : i32
    return %c0_i32, %c0_i32_0, %c0_i32_1 : i32, i32, i32
  }
  func.func @transform_7(%arg0: i32) -> (i32, i32, i32) {
    %c0_i32 = arith.constant 0 : i32
    %c0_i32_0 = arith.constant 0 : i32
    %c0_i32_1 = arith.constant 0 : i32
    %c0_i32_2 = arith.constant 0 : i32
    return %c0_i32, %c0_i32_0, %c0_i32_1 : i32, i32, i32
  }
  func.func @transform_8(%arg0: i32) -> (i32, i32) {
    %c0_i32 = arith.constant 0 : i32
    %c0_i32_0 = arith.constant 0 : i32
    %c0_i32_1 = arith.constant 0 : i32
    return %c0_i32, %c0_i32_0 : i32, i32
  }
  func.func @transform_9(%arg0: i32) -> (i32, i32) {
    %c0_i32 = arith.constant 0 : i32
    %c0_i32_0 = arith.constant 0 : i32
    %c0_i32_1 = arith.constant 0 : i32
    return %c0_i32, %c0_i32_0 : i32, i32
  }
  func.func @transform_10(%arg0: i32) -> (i32, i32) {
    %c0_i32 = arith.constant 0 : i32
    %c0_i32_0 = arith.constant 0 : i32
    %c0_i32_1 = arith.constant 0 : i32
    return %c0_i32, %c0_i32_0 : i32, i32
  }
  func.func @transform_11(%arg0: i32) -> (i32, i32) {
    %c0_i32 = arith.constant 0 : i32
    %c0_i32_0 = arith.constant 0 : i32
    %c0_i32_1 = arith.constant 0 : i32
    return %c0_i32, %c0_i32_0 : i32, i32
  }
}

</mosaic_0001>

<bundles_post_ra>
// kernel: tuta_for_triplet.1
= control target key start
LH: loop header
LB: loop body
LE: loop exit
PB: predicated region body
PF: predicated region fallthrough
CT: control target
= control target key end

     0   :  { %vm57_vm0 = vcmask 130048   ;;  %vm124_vm1 = vcmask 523264   ;;  %v3811_v49 = vmov 0   ;;  %v190_v57 = vlaneseq  ;;  %s3813_s30 = smov 64   ;;  %s4797_s3 = inlined_call_operand.vmem [shape: bf16[16,64], index: 3, kind: input, shape index: {}]   ;;  %s4798_s1 = inlined_call_operand.vmem [shape: f32[32,16], index: 1, kind: input, shape index: {}]   ;;  %s4799_s0 = inlined_call_operand.vmem [shape: f32[32,64], index: 0, kind: input, shape index: {}]   ;;  %s4800_s10 = inlined_call_operand.vmem [shape: f32[21,192], index: 10, kind: input, shape index: {}]   ;;  %s4801_s4 = inlined_call_operand.vmem [shape: bf16[2,64,192], index: 4, kind: input, shape index: {}]   ;;  %s4802_s2 = inlined_call_operand.vmem [shape: f32[32,32], index: 2, kind: input, shape index: {}]   ;;  %s4803_s5 = inlined_call_operand.vmem [shape: bf16[2,64,64], index: 5, kind: input, shape index: {}]   ;;  %s4804_s6 = inlined_call_operand.vmem [shape: bf16[2,64,128], index: 6, kind: input, shape index: {}]   ;;  %s4805_s7 = inlined_call_operand.vmem [shape: bf16[2,128,64], index: 7, kind: input, shape index: {}]   ;;  %s4806_s8 = inlined_call_operand.vmem [shape: bf16[64,64], index: 8, kind: input, shape index: {}]   ;;  %s4807_s9 = inlined_call_operand.vmem [shape: bf16[64,128], index: 9, kind: input, shape index: {}]   ;;  %s4808_s11 = inlined_call_operand.vmem [shape: f32[32,128], index: 11, kind: output, shape index: {}]  }
   0x1   :  { %v3550_v0 = vld [vmem:[%s4797_s3] sm:$0xff]   ;;  %v44_v2 = vld [vmem:[%s4798_s1 + $0x8] sm:$0xff]  ;;  %v45_v3 = vld [vmem:[%s4798_s1 + $0x10] sm:$0xff]  ;;  %317 = vmatprep.mubr.bf16.mxu1 %v3811_v49  ;;  %v3812_v59 = vmov 0.0   ;;  %vm423_vm12 = vcmask 261120  }
   0x2   :  { %v43_v1 = vld [vmem:[%s4798_s1] sm:$0xff]  ;;  %3285 = vmatprep.subr.bf16.mxu0 %v3550_v0  ;;  %v46_v5 = vld [vmem:[%s4798_s1 + $0x18] sm:$0xff]  ;;  %v41_v7 = vld [vmem:[%s4799_s0 + $0x10] sm:$0xff]  ;;  %v3953_v58 = vand.u32 127, %v190_v57 }
   0x3   :  { %v47_v4 = vpack.c.bf16 %v44_v2, %v43_v1  ;;  %3286 = vmatpush3.bf16.msra.mxu0 %v3550_v0  ;;  %v48_v6 = vpack.c.bf16 %v46_v5, %v45_v3  ;;  %v39_v9 = vld [vmem:[%s4799_s0] sm:$0xff]  ;;  %v42_v13 = vld [vmem:[%s4799_s0 + $0x18] sm:$0xff]  ;;  %v40_v17 = vld [vmem:[%s4799_s0 + $0x8] sm:$0xff] }
   0x4   :  { %v117_v10 = vld [vmem:[%s4800_s10] ss:$0 sm:$0xff]  ;;  %v3551_v48 = vld [vmem:[%s4801_s4 + $0x34] ss:$8 sps:$4 sm:$0xff]   ;;  %v3553_v50 = vld [vmem:[%s4801_s4 + $0x30] ss:$8 sps:$4 sm:$0xff]  }
   0x5   :  { %3287 = vmatprep.mubr.msk.bf16.mxu0 %vm57_vm0, %v47_v4  ;;  %293 = vmatprep.subr.bf16.mxu1 %v3551_v48  ;;  %v3554_v51 = vld [vmem:[%s4801_s4 + $0x24] ss:$8 sps:$4 sm:$0xff]   ;;  %v3556_v52 = vld [vmem:[%s4801_s4 + $0x20] ss:$8 sps:$4 sm:$0xff]   ;;  %v3557_v53 = vld [vmem:[%s4801_s4 + $0x14] ss:$8 sps:$4 sm:$0xff]  }
   0x6   :  { %3288 = vmatmul.mubr.msk.bf16.vlgmr.msra.gmra.mxu0 %vm57_vm0, %v48_v6  ;;  %294 = vmatpush1.bf16.msra.mxu1 %v3553_v50  ;;  %v3559_v54 = vld [vmem:[%s4801_s4 + $0x10] ss:$8 sps:$4 sm:$0xff]   ;;  %v3560_v55 = vld [vmem:[%s4801_s4 + $0x4] ss:$8 sps:$4 sm:$0xff]   ;;  %v3562_v56 = vld [vmem:[%s4801_s4] ss:$8 sps:$4 sm:$0xff]  }
   0x7   :  { %295 = vmatprep.subr.bf16.mxu1 %v3554_v51  ;;  %vm193_vm2 = vcmp.lt.s32.totalorder %v3953_v58, 16  ;;  %vm198_vm3 = vcmp.ge.s32.totalorder %v3953_v58, 16  ;;  %vm199_vm4 = vcmp.lt.s32.totalorder %v3953_v58, 32  ;;  %vm204_vm5 = vcmp.ge.s32.totalorder %v3953_v58, 32 }
   0x8   :  { %v3012_v60 = vsel %vm193_vm2, 1.0, %v3812_v59  ;;  %vm200_vm6 = vmand %vm198_vm3, %vm199_vm4  ;;  %vm205_vm7 = vcmp.lt.s32.totalorder %v3953_v58, 48  ;;  %vm210_vm9 = vcmp.ge.s32.totalorder %v3953_v58, 48  ;;  %vm211_vm10 = vcmp.lt.s32.totalorder %v3953_v58, 64 }
   0x9   :  { %v3961_v61 = vpack.c.bf16 %v3012_v60, %v3012_v60  ;;  %v3013_v62 = vsel %vm200_vm6, 1.0, %v3812_v59  ;;  %vm206_vm8 = vmand %vm204_vm5, %vm205_vm7 }
   0xa   :  { %296 = vmatpush1.bf16.msra.mxu1 %v3556_v52  ;;  %v3964_v63 = vpack.c.bf16 %v3013_v62, %v3013_v62  ;;  %v3014_v0 = vsel %vm206_vm8, 1.0, %v3812_v59  ;;  %vm212_vm11 = vmand %vm210_vm9, %vm211_vm10 }
   0xb   :  { %297 = vmatprep.subr.bf16.mxu1 %v3557_v53  ;;  %v3969_v1 = vpack.c.bf16 %v3014_v0, %v3014_v0  ;;  %v3015_v58 = vsel %vm212_vm11, 1.0, %v3812_v59 }
   0xe   :  { %298 = vmatpush1.bf16.msra.mxu1 %v3559_v54 }
   0xf   :  { %299 = vmatprep.subr.bf16.mxu1 %v3560_v55 }
  0x12   :  { %300 = vmatpush1.bf16.msra.mxu1 %v3562_v56 }
  0xc6   :  { %v3289_v8 = vpop.f32.mrf.mxu0 }
  0xc7   :  { %v115_v11 = vadd.f32 %v3289_v8, %v41_v7 }
  0xc8   :  { %v98_v12 = vpop.f32.mrf.mxu0 }
  0xc9   :  { %v113_v14 = vadd.f32 %v98_v12, %v39_v9  ;;  %v120_v15 = vadd.f32 %v117_v10, %v115_v11 }
  0xca   :  { %v3290_v16 = vpop.f32.mrf.mxu0 }
  0xcb   :  { %v116_v18 = vadd.f32 %v3290_v16, %v42_v13  ;;  %v131_v19 = vsel %vm124_vm1, %v120_v15, 0.0  ;;  %v118_v20 = vadd.f32 %v117_v10, %v113_v14  ;;  %v122_v16 = vld [vmem:[%s4800_s10 + $0x1] ss:$0 sm:$0xff] }
  0xcc   :  { %v101_v21 = vpop.f32.mrf.mxu0  ;;  %132 = vadd.xlane.f32.xlu1 %v131_v19 }
  0xcd   :  { %v114_v22 = vadd.f32 %v101_v21, %v40_v17  ;;  %v125_v23 = vsel %vm124_vm1, %v118_v20, 0.0  ;;  %v121_v24 = vadd.f32 %v117_v10, %v116_v18  ;;  %v123_v21 = vld [vmem:[%s4800_s10 + $0x2] ss:$0 sm:$0xff] }
  0xce   :  { %126 = vadd.xlane.f32.xlu0 %v125_v23 }
  0xcf   :  { %v134_v25 = vsel %vm124_vm1, %v121_v24, 0.0  ;;  %v119_v26 = vadd.f32 %v117_v10, %v114_v22 }
  0xd0   :  { %135 = vadd.xlane.f32.xlu1 %v134_v25 }
  0xd1   :  { %v128_v27 = vsel %vm124_vm1, %v119_v26, 0.0 }
  0xd2   :  { %129 = vadd.xlane.f32.xlu0 %v128_v27 }
 0x155   :  { %v133_v28 = vpop.xlane.xlu1 %132 }
 0x156   :  { %v140_v29 = vmul.f32 0.015625, %v133_v28 }
 0x157   :  { %v127_v30 = vpop.xlane.xlu0 %126 }
 0x158   :  { %v138_v31 = vmul.f32 0.015625, %v127_v30  ;;  %v3908_v33 = vsub.f32 %v120_v15, %v140_v29 }
 0x159   :  { %v136_v32 = vpop.xlane.xlu1 %135 }
 0x15a   :  { %v3910_v34 = vsub.f32 %v118_v20, %v138_v31  ;;  %v141_v35 = vmul.f32 0.015625, %v136_v32  ;;  %v148_v42 = vmul.f32 %v3908_v33, %v3908_v33 }
 0x15b   :  { %v130_v36 = vpop.xlane.xlu0 %129 }
 0x15c   :  { %v139_v37 = vmul.f32 0.015625, %v130_v36  ;;  %v146_v38 = vmul.f32 %v3910_v34, %v3910_v34  ;;  %v3914_v39 = vsub.f32 %v121_v24, %v141_v35  ;;  %v156_v44 = vsel %vm124_vm1, %v148_v42, 0.0  ;;  %v3016_v36 = vld [vmem:[%s4800_s10 + $0x5] ss:$8 sm:$0x3] }
 0x15e   :  { %v3916_v40 = vsub.f32 %v119_v26, %v139_v37  ;;  %v150_v41 = vsel %vm124_vm1, %v146_v38, 0.0  ;;  %v149_v46 = vmul.f32 %v3914_v39, %v3914_v39 }
 0x15f   :  { %151 = vadd.xlane.f32.xlu0 %v150_v41 }
 0x160   :  { %v147_v43 = vmul.f32 %v3916_v40, %v3916_v40  ;;  %v159_v47 = vsel %vm124_vm1, %v149_v46, 0.0 }
 0x162   :  { %v153_v45 = vsel %vm124_vm1, %v147_v43, 0.0 }
 0x163   :  { %157 = vadd.xlane.f32.xlu0 %v156_v44  ;;  %154 = vadd.xlane.f32.xlu1 %v153_v45 }
 0x167   :  { %160 = vadd.xlane.f32.xlu1 %v159_v47 }
 0x178   :  { %349 = vrot.lane.b32.xlu1 %v3961_v61, %s3813_s30 }
 0x179   :  { %471 = vrot.lane.b32.xlu0 %v3964_v63, %s3813_s30 }
 0x17c   :  { %696 = vrot.lane.b32.xlu1 %v3969_v1, %s3813_s30 }
 0x1e8   :  { %v152_v2 = vpop.xlane.xlu0 %151 }
 0x1e9   :  { %v162_v3 = vmul.f32 0.015625, %v152_v2 }
 0x1eb   :  { %v166_v4 = vadd.f32 1e-12, %v162_v3 }
 0x1ec   :  { %v155_v5 = vpop.xlane.xlu1 %154  ;;  %v158_v6 = vpop.xlane.xlu0 %157 }
 0x1ed   :  { %3615 = vrsqrt.f32 %v166_v4  ;;  %v163_v7 = vmul.f32 0.015625, %v155_v5  ;;  %v164_v8 = vmul.f32 0.015625, %v158_v6 }
 0x1ef   :  { %v167_v9 = vadd.f32 1e-12, %v163_v7  ;;  %v168_v10 = vadd.f32 1e-12, %v164_v8 }
 0x1f0   :  { %v161_v11 = vpop.xlane.xlu1 %160  ;;  %v4023_v3 = vpop.permute.xlu0 %471 }
 0x1f1   :  { %3617 = vrsqrt.f32 %v167_v9  ;;  %v165_v12 = vmul.f32 0.015625, %v161_v11 }
 0x1f2   :  { %3619 = vrsqrt.f32 %v168_v10 }
 0x1f3   :  { %v169_v13 = vadd.f32 1e-12, %v165_v12 }
 0x1f4   :  { %v4021_v2 = vpop.permute.xlu1 %349 }
 0x1f5   :  { %3621 = vrsqrt.f32 %v169_v13 }
 0x1f8   :  { %v4039_v10 = vpop.permute.xlu1 %696 }
 0x1fa   :  { %v3616_v14 = vpop.eup %3615 }
 0x1fb   :  { %v174_v15 = vmul.f32 %v3616_v14, %v3910_v34 }
 0x1fd   :  { %v178_v19 = vmul.f32 %v174_v15, %v122_v16 }
 0x1fe   :  { %v3618_v17 = vpop.eup %3617 }
 0x1ff   :  { %v175_v18 = vmul.f32 %v3618_v17, %v3916_v40  ;;  %v3620_v20 = vpop.eup %3619  ;;  %v3983_v24 = vadd.f32 %v178_v19, %v123_v21 }
 0x200   :  { %v176_v26 = vmul.f32 %v3620_v20, %v3908_v33  ;;  %v4000_v33 = vshrl.u32 %v190_v57, 7 }
 0x201   :  { %v179_v22 = vmul.f32 %v175_v18, %v122_v16 }
 0x202   :  { %v3622_v23 = vpop.eup %3621  ;;  %v180_v30 = vmul.f32 %v176_v26, %v122_v16  ;;  %v231_v35 = vsub.s32 0, %v4000_v33  ;;  %v235_v38 = vsub.s32 1, %v4000_v33 }
 0x203   :  { %v3985_v25 = vadd.f32 %v179_v22, %v123_v21  ;;  %v177_v27 = vmul.f32 %v3622_v23, %v3914_v39 }
 0x204   :  { %v3995_v32 = vadd.f32 %v180_v30, %v123_v21  ;;  %v232_v37 = vrot.slane %v3016_v36, %v231_v35  ;;  %v236_v42 = vrot.slane %v3016_v36, %v235_v38 }
 0x205   :  { %v216_v28 = vpack.c.bf16 %v3985_v25, %v3983_v24  ;;  %v181_v29 = vmul.f32 %v177_v27, %v122_v16 }
 0x207   :  { %3025 = vmatmul.mubr.msk.bf16.vlgmr.msra.gmra.mxu1 %vm124_vm1, %v216_v28  ;;  %v3993_v31 = vadd.f32 %v181_v29, %v123_v21 }
 0x208   :  { %327 = vmatprep.mubr.bf16.mxu1 %v3811_v49 }
 0x209   :  { %v217_v34 = vpack.c.bf16 %v3993_v31, %v3995_v32 }
 0x20f   :  { %3026 = vmatmul.mubr.msk.bf16.gmra.mxu1 %vm124_vm1, %v217_v34 }
 0x2c7   :  { %v319_v39 = vpop.f32.mrf.mxu1 }
 0x2c8   :  { %v320_v41 = vadd.f32 %v319_v39, %v232_v37 }
 0x2c9   :  { %v321_v40 = vpop.f32.mrf.mxu1 }
 0x2ca   :  { %v338_v46 = vmul.f32 0.25, %v320_v41  ;;  %v322_v47 = vadd.f32 %v321_v40, %v236_v42 }
 0x2cb   :  { %v323_v43 = vpop.f32.mrf.mxu1 }
 0x2cc   :  { %v324_v44 = vadd.f32 %v323_v43, %v232_v37 }
 0x2cd   :  { %v325_v45 = vpop.f32.mrf.mxu1 }
 0x2ce   :  { %v339_v48 = vmul.f32 0.25, %v324_v44  ;;  %v326_v50 = vadd.f32 %v325_v45, %v236_v42  ;;  %v4025_v4 = vpack.c.bf16 %v324_v44, %v320_v41  ;;  %v4092_v41 = vld [vmem:[%s4802_s2 + $0x10] sm:$0xff]  ;;  %v4097_v44 = vld [vmem:[%s4802_s2] sm:$0xff] }
 0x2cf   :  { %v329_v51 = vpop.f32.mrf.mxu1 }
 0x2d0   :  { %v4011_v52 = vpack.c.bf16 %v339_v48, %v338_v46  ;;  %v4013_v53 = vpack.c.bf16 %v326_v50, %v322_v47  ;;  %v330_v55 = vadd.f32 %v329_v51, %v232_v37  ;;  %v352_v8 = vmul.bf16 %v4021_v2, %v4025_v4 }
 0x2d1   :  { %v331_v54 = vpop.f32.mrf.mxu1  ;;  %v474_v9 = vmul.bf16 %v4023_v3, %v4025_v4  ;;  %v699_v11 = vmul.bf16 %v4039_v10, %v4025_v4 }
 0x2d2   :  { %3295 = vmatprep.mubr.msk.bf16.mxu0 %vm124_vm1, %v4011_v52  ;;  %3303 = vmatprep.mubr.msk.bf16.mxu1 %vm124_vm1, %v4011_v52  ;;  %v340_v60 = vmul.f32 0.25, %v330_v55  ;;  %v332_v19 = vadd.f32 %v331_v54, %v236_v42  ;;  %v476_v30 = vmul.bf16 %v4013_v53, %v3964_v63  ;;  %v4105_v54 = vld [vmem:[%s4802_s2 + $0x8] sm:$0xff] }
 0x2d3   :  { %v333_v56 = vpop.f32.mrf.mxu1 }
 0x2d4   :  { %v334_v57 = vadd.f32 %v333_v56, %v232_v37  ;;  %v4080_v37 = vpack.c.bf16 %v3015_v58, %v3015_v58 }
 0x2d5   :  { %v335_v13 = vpop.f32.mrf.mxu1 }
 0x2d6   :  { %v341_v62 = vmul.f32 0.25, %v334_v57  ;;  %v4019_v0 = vpack.c.bf16 %v334_v57, %v330_v55  ;;  %v336_v16 = vadd.f32 %v335_v13, %v236_v42  ;;  %v875_v59 = vmul.bf16 %v4013_v53, %v4080_v37  ;;  %v4112_v57 = vld [vmem:[%s4802_s2 + $0x18] sm:$0xff] }
 0x2d8   :  { %v4027_v5 = vpack.c.bf16 %v341_v62, %v340_v60  ;;  %v353_v6 = vmul.bf16 %v4021_v2, %v4019_v0  ;;  %v475_v7 = vmul.bf16 %v4023_v3, %v4019_v0  ;;  %v700_v12 = vmul.bf16 %v4039_v10, %v4019_v0 }
 0x2d9   :  { %v4053_v22 = vpack.c.bf16 %v336_v16, %v332_v19 }
 0x2da   :  { %360 = vrot.lane.b32.xlu0 %v353_v6, %s3813_s30  ;;  %482 = vrot.lane.b32.xlu1 %v475_v7, %s3813_s30 }
 0x2db   :  { %v477_v27 = vmul.bf16 %v4053_v22, %v3964_v63  ;;  %v4077_v36 = vmul.bf16 %v4053_v22, %v3961_v61  ;;  %v876_v40 = vmul.bf16 %v4053_v22, %v4080_v37 }
 0x2de   :  { %358 = vrot.lane.b32.xlu0 %v352_v8, %s3813_s30  ;;  %480 = vrot.lane.b32.xlu1 %v474_v9, %s3813_s30 }
 0x2e2   :  { %705 = vrot.lane.b32.xlu0 %v699_v11, %s3813_s30  ;;  %707 = vrot.lane.b32.xlu1 %v700_v12, %s3813_s30 }
 0x34c   :  { %v483_v14 = vpop.permute.xlu1 %482  ;;  %v361_v15 = vpop.permute.xlu0 %360 }
 0x34d   :  { %3531 = vmatprep.subr.msk.bf16.mxu0 %vm124_vm1, %v361_v15  ;;  %3533 = vmatprep.subr.msk.bf16.mxu1 %vm124_vm1, %v483_v14  ;;  %v372_v17 = vsel %vm124_vm1, %v361_v15, 0  ;;  %v488_v18 = vsel %vm124_vm1, %v483_v14, 0 }
 0x34e   :  { %3292 = vmatpush3.bf16.xpose.msra.mxu0 %v372_v17  ;;  %3300 = vmatpush3.bf16.xpose.msra.mxu1 %v488_v18 }
 0x350   :  { %v481_v20 = vpop.permute.xlu1 %480  ;;  %v359_v21 = vpop.permute.xlu0 %358 }
 0x351   :  { %3532 = vmatprep.subr.msk.bf16.mxu0 %vm124_vm1, %v359_v21  ;;  %3534 = vmatprep.subr.msk.bf16.mxu1 %vm124_vm1, %v481_v20  ;;  %v485_v23 = vsel %vm124_vm1, %v481_v20, 0  ;;  %v369_v26 = vsel %vm124_vm1, %v359_v21, 0 }
 0x354   :  { %v708_v28 = vpop.permute.xlu1 %707  ;;  %v706_v34 = vpop.permute.xlu0 %705 }
 0x355   :  { %v713_v29 = vsel %vm124_vm1, %v708_v28, 0  ;;  %v710_v39 = vsel %vm124_vm1, %v706_v34, 0 }
 0x356   :  { %3294 = vmatpush3.bf16.xpose.msra.mxu0 %v369_v26  ;;  %3302 = vmatpush3.bf16.xpose.msra.mxu1 %v485_v23 }
 0x357   :  { %3307 = vmatprep.subr.bf16.mxu0 %v477_v27  ;;  %3535 = vmatprep.subr.msk.bf16.mxu1 %vm124_vm1, %v708_v28 }
 0x35d   :  { %3296 = vmatmul.mubr.msk.bf16.vlgmr.msra.gmra.mxu0 %vm124_vm1, %v4027_v5  ;;  %3304 = vmatmul.mubr.msk.bf16.vlgmr.msra.gmra.mxu1 %vm124_vm1, %v4027_v5 }
 0x35e   :  { %3308 = vmatpush3.bf16.msra.mxu0 %v477_v27  ;;  %3324 = vmatpush3.bf16.xpose.msra.mxu1 %v713_v29 }
 0x35f   :  { %3327 = vmatprep.mubr.msk.bf16.mxu1 %vm124_vm1, %v4011_v52  ;;  %3309 = vmatprep.subr.bf16.mxu0 %v476_v30 }
 0x360   :  { %3536 = vmatprep.subr.msk.bf16.mxu1 %vm124_vm1, %v706_v34 }
 0x362   :  { %3310 = vmatpush3.bf16.msra.mxu0 %v476_v30 }
 0x363   :  { %3315 = vmatprep.subr.bf16.mxu0 %v4077_v36 }
 0x366   :  { %3326 = vmatpush3.bf16.xpose.msra.mxu1 %v710_v39 }
 0x367   :  { %3347 = vmatprep.subr.bf16.mxu1 %v876_v40 }
 0x36d   :  { %3328 = vmatmul.mubr.msk.bf16.vlgmr.msra.gmra.mxu1 %vm124_vm1, %v4027_v5 }
 0x36e   :  { %3348 = vmatpush3.bf16.msra.mxu1 %v876_v40 }
 0x36f   :  { %3349 = vmatprep.subr.bf16.mxu1 %v875_v59 }
 0x372   :  { %3350 = vmatpush3.bf16.msra.mxu1 %v875_v59 }
 0x41d   :  { %v3297_v42 = vpop.f32.mrf.mxu0  ;;  %v3305_v43 = vpop.f32.mrf.mxu1 }
 0x41e   :  { %v533_v45 = vadd.f32 %v3305_v43, %v4092_v41  ;;  %v417_v7 = vadd.f32 %v3297_v42, %v4092_v41 }
 0x41f   :  { %v408_v46 = vpop.f32.mrf.mxu0  ;;  %v524_v47 = vpop.f32.mrf.mxu1 }
 0x420   :  { %v525_v48 = vadd.f32 %v524_v47, %v4097_v44  ;;  %v545_v50 = vsel %vm423_vm12, %v533_v45, -inf  ;;  %v409_v55 = vadd.f32 %v408_v46, %v4097_v44  ;;  %v430_v15 = vsel %vm423_vm12, %v417_v7, -inf }
 0x421   :  { %546 = vmax.xlane.f32.xlu0 %v545_v50  ;;  %v3306_v51 = vpop.f32.mrf.mxu1  ;;  %v3298_v60 = vpop.f32.mrf.mxu0 }
 0x422   :  { %v539_v56 = vsel %vm423_vm12, %v525_v48, -inf  ;;  %v536_v8 = vadd.f32 %v3306_v51, %v4112_v57  ;;  %v424_v11 = vsel %vm423_vm12, %v409_v55, -inf  ;;  %v420_v17 = vadd.f32 %v3298_v60, %v4112_v57 }
 0x423   :  { %v527_v62 = vpop.f32.mrf.mxu1  ;;  %540 = vmax.xlane.f32.xlu1 %v539_v56  ;;  %v411_v12 = vpop.f32.mrf.mxu0 }
 0x424   :  { %v4115_v6 = vadd.f32 %v527_v62, %v4105_v54  ;;  %v4123_v13 = vadd.f32 %v411_v12, %v4105_v54  ;;  %v548_v14 = vsel %vm423_vm12, %v536_v8, -inf  ;;  %v433_v26 = vsel %vm423_vm12, %v420_v17, -inf }
 0x426   :  { %v542_v9 = vsel %vm423_vm12, %v4115_v6, -inf  ;;  %v427_v18 = vsel %vm423_vm12, %v4123_v13, -inf }
 0x427   :  { %543 = vmax.xlane.f32.xlu0 %v542_v9  ;;  %425 = vmax.xlane.f32.xlu1 %v424_v11 }
 0x42b   :  { %549 = vmax.xlane.f32.xlu0 %v548_v14  ;;  %431 = vmax.xlane.f32.xlu1 %v430_v15 }
 0x42d   :  { %v3329_v16 = vpop.f32.mrf.mxu1 }
 0x42e   :  { %v4134_v23 = vadd.f32 %v3329_v16, %v4092_v41 }
 0x42f   :  { %428 = vmax.xlane.f32.xlu0 %v427_v18  ;;  %v749_v19 = vpop.f32.mrf.mxu1 }
 0x430   :  { %v4131_v20 = vadd.f32 %v749_v19, %v4097_v44  ;;  %v770_v58 = vsel %vm423_vm12, %v4134_v23, -inf }
 0x431   :  { %v3330_v21 = vpop.f32.mrf.mxu1 }
 0x432   :  { %v764_v27 = vsel %vm423_vm12, %v4131_v20, -inf  ;;  %v4143_v30 = vadd.f32 %v3330_v21, %v4112_v57 }
 0x433   :  { %434 = vmax.xlane.f32.xlu0 %v433_v26  ;;  %v752_v28 = vpop.f32.mrf.mxu1  ;;  %765 = vmax.xlane.f32.xlu1 %v764_v27 }
 0x434   :  { %v4140_v29 = vadd.f32 %v752_v28, %v4105_v54  ;;  %v773_v39 = vsel %vm423_vm12, %v4143_v30, -inf }
 0x436   :  { %v767_v34 = vsel %vm423_vm12, %v4140_v29, -inf }
 0x437   :  { %768 = vmax.xlane.f32.xlu0 %v767_v34  ;;  %771 = vmax.xlane.f32.xlu1 %v770_v58 }
 0x43b   :  { %774 = vmax.xlane.f32.xlu0 %v773_v39 }
 0x448   :  { %870 = vrot.lane.b32.xlu1 %v4080_v37, %s3813_s30 }
 0x4aa   :  { %v547_v40 = vpop.xlane.xlu0 %546 }
 0x4ab   :  { %v553_v59 = vsub.f32 %v533_v45, %v547_v40 }
 0x4ac   :  { %v541_v42 = vpop.xlane.xlu1 %540 }
 0x4ad   :  { %v559_v43 = vmul.f32 1.442695, %v553_v59  ;;  %v551_v46 = vsub.f32 %v525_v48, %v541_v42 }
 0x4af   :  { %3623 = vpow2.f32 %v559_v43  ;;  %v555_v47 = vmul.f32 1.442695, %v551_v46 }
 0x4b0   :  { %v426_v50 = vpop.xlane.xlu1 %425  ;;  %v544_v51 = vpop.xlane.xlu0 %543 }
 0x4b1   :  { %3625 = vpow2.f32 %v555_v47  ;;  %v436_v56 = vsub.f32 %v409_v55, %v426_v50  ;;  %v552_v48 = vsub.f32 %v4115_v6, %v544_v51 }
 0x4b3   :  { %v440_v60 = vmul.f32 1.442695, %v436_v56 }
 0x4b4   :  { %v432_v62 = vpop.xlane.xlu1 %431  ;;  %v550_v9 = vpop.xlane.xlu0 %549 }
 0x4b5   :  { %3627 = vpow2.f32 %v440_v60  ;;  %v438_v11 = vsub.f32 %v417_v7, %v432_v62  ;;  %v554_v12 = vsub.f32 %v536_v8, %v550_v9  ;;  %v557_v8 = vmul.f32 1.442695, %v552_v48 }
 0x4b7   :  { %v444_v14 = vmul.f32 1.442695, %v438_v11  ;;  %v561_v15 = vmul.f32 1.442695, %v554_v12 }
 0x4b8   :  { %v429_v16 = vpop.xlane.xlu0 %428 }
 0x4b9   :  { %3629 = vpow2.f32 %v444_v14  ;;  %v437_v27 = vsub.f32 %v4123_v13, %v429_v16 }
 0x4ba   :  { %3631 = vpow2.f32 %v561_v15 }
 0x4bb   :  { %v442_v39 = vmul.f32 1.442695, %v437_v27 }
 0x4bc   :  { %v4153_v45 = vpop.eup %3623  ;;  %v766_v18 = vpop.xlane.xlu1 %765 }
 0x4bd   :  { %v435_v19 = vpop.xlane.xlu0 %434  ;;  %v569_v55 = vsel %vm423_vm12, %v4153_v45, 0.0  ;;  %v776_v43 = vsub.f32 %v4131_v20, %v766_v18 }
 0x4be   :  { %v439_v21 = vsub.f32 %v420_v17, %v435_v19  ;;  %v4158_v26 = vpop.eup %3625  ;;  %570 = vadd.xlane.f32.xlu0 %v569_v55 }
 0x4bf   :  { %v563_v34 = vsel %vm423_vm12, %v4158_v26, 0.0  ;;  %v780_v51 = vmul.f32 1.442695, %v776_v43 }
 0x4c0   :  { %v446_v7 = vmul.f32 1.442695, %v439_v21  ;;  %v772_v28 = vpop.xlane.xlu1 %771 }
 0x4c1   :  { %v769_v6 = vpop.xlane.xlu0 %768  ;;  %v778_v40 = vsub.f32 %v4134_v23, %v772_v28 }
 0x4c2   :  { %v4163_v58 = vpop.eup %3627  ;;  %3633 = vpow2.f32 %v446_v7  ;;  %564 = vadd.xlane.f32.xlu0 %v563_v34  ;;  %v777_v60 = vsub.f32 %v4140_v29, %v769_v6 }
 0x4c3   :  { %v448_v17 = vsel %vm423_vm12, %v4163_v58, 0.0  ;;  %3635 = vpow2.f32 %v557_v8  ;;  %v784_v46 = vmul.f32 1.442695, %v778_v40 }
 0x4c4   :  { %449 = vadd.xlane.f32.xlu1 %v448_v17  ;;  %3637 = vpow2.f32 %v442_v39  ;;  %v4181_v62 = vpop.permute.xlu1 %870  ;;  %v782_v14 = vmul.f32 1.442695, %v777_v60 }
 0x4c5   :  { %v775_v47 = vpop.xlane.xlu0 %774  ;;  %3639 = vpow2.f32 %v784_v46  ;;  %v873_v12 = vmul.bf16 %v4181_v62, %v4025_v4  ;;  %v874_v8 = vmul.bf16 %v4181_v62, %v4019_v0 }
 0x4c6   :  { %v4168_v59 = vpop.eup %3629  ;;  %v779_v23 = vsub.f32 %v4143_v30, %v775_v47  ;;  %3641 = vpow2.f32 %v780_v51 }
 0x4c7   :  { %v454_v13 = vsel %vm423_vm12, %v4168_v59, 0.0  ;;  %v4172_v42 = vpop.eup %3631 }
 0x4c8   :  { %455 = vadd.xlane.f32.xlu0 %v454_v13  ;;  %v572_v50 = vsel %vm423_vm12, %v4172_v42, 0.0  ;;  %v786_v9 = vmul.f32 1.442695, %v779_v23 }
 0x4ca   :  { %3643 = vpow2.f32 %v786_v9 }
 0x4cb   :  { %3645 = vpow2.f32 %v782_v14 }
 0x4cc   :  { %573 = vadd.xlane.f32.xlu0 %v572_v50 }
 0x4cf   :  { %v4178_v56 = vpop.eup %3633 }
 0x4d0   :  { %v457_v20 = vsel %vm423_vm12, %v4178_v56, 0.0  ;;  %v3636_v11 = vpop.eup %3635 }
 0x4d1   :  { %458 = vadd.xlane.f32.xlu0 %v457_v20  ;;  %v566_v30 = vsel %vm423_vm12, %v3636_v11, 0.0  ;;  %v3638_v15 = vpop.eup %3637 }
 0x4d2   :  { %v451_v29 = vsel %vm423_vm12, %v3638_v15, 0.0  ;;  %v4190_v16 = vpop.eup %3639 }
 0x4d3   :  { %v794_v48 = vsel %vm423_vm12, %v4190_v16, 0.0  ;;  %v4194_v18 = vpop.eup %3641 }
 0x4d4   :  { %v788_v4 = vsel %vm423_vm12, %v4194_v18, 0.0 }
 0x4d5   :  { %567 = vadd.xlane.f32.xlu0 %v566_v30  ;;  %879 = vrot.lane.b32.xlu1 %v873_v12, %s3813_s30 }
 0x4d7   :  { %v4198_v19 = vpop.eup %3643 }
 0x4d8   :  { %v797_v21 = vsel %vm423_vm12, %v4198_v19, 0.0  ;;  %v4202_v55 = vpop.eup %3645 }
 0x4d9   :  { %452 = vadd.xlane.f32.xlu0 %v451_v29  ;;  %v791_v7 = vsel %vm423_vm12, %v4202_v55, 0.0 }
 0x4dd   :  { %795 = vadd.xlane.f32.xlu0 %v794_v48 }
 0x4e1   :  { %789 = vadd.xlane.f32.xlu0 %v788_v4 }
 0x4e5   :  { %798 = vadd.xlane.f32.xlu0 %v797_v21 }
 0x4e9   :  { %792 = vadd.xlane.f32.xlu0 %v791_v7 }
 0x4ff   :  { %881 = vrot.lane.b32.xlu0 %v874_v8, %s3813_s30 }
 0x547   :  { %v571_v27 = vpop.xlane.xlu0 %570 }
 0x54b   :  { %v565_v28 = vpop.xlane.xlu0 %564 }
 0x54d   :  { %v450_v39 = vpop.xlane.xlu1 %449 }
 0x551   :  { %v456_v34 = vpop.xlane.xlu0 %455 }
 0x555   :  { %v574_v6 = vpop.xlane.xlu0 %573 }
 0x556   :  { %3647 = vrcp.f32 %v574_v6 }
 0x557   :  { %3649 = vrcp.f32 %v565_v28 }
 0x558   :  { %3651 = vrcp.f32 %v571_v27 }
 0x55a   :  { %v459_v17 = vpop.xlane.xlu0 %458 }
 0x55e   :  { %v568_v40 = vpop.xlane.xlu0 %567 }
 0x55f   :  { %3653 = vrcp.f32 %v568_v40 }
 0x560   :  { %3655 = vrcp.f32 %v450_v39 }
 0x562   :  { %v453_v13 = vpop.xlane.xlu0 %452 }
 0x563   :  { %3657 = vrcp.f32 %v453_v13  ;;  %v3648_v0 = vpop.eup %3647 }
 0x564   :  { %3659 = vrcp.f32 %v459_v17  ;;  %v3650_v46 = vpop.eup %3649  ;;  %v582_v23 = vmul.f32 %v3648_v0, %v4172_v42  ;;  %v354_v42 = vmul.bf16 %v4013_v53, %v3961_v61  ;;  %v880_v0 = vpop.permute.xlu1 %879 }
 0x565   :  { %3661 = vrcp.f32 %v456_v34  ;;  %v3652_v50 = vpop.eup %3651  ;;  %v579_v60 = vmul.f32 %v3650_v46, %v4158_v26 }
 0x566   :  { %v796_v43 = vpop.xlane.xlu0 %795  ;;  %v581_v14 = vmul.f32 %v3652_v50, %v4153_v45 }
 0x568   :  { %v584_v48 = vpack.c.bf16 %v582_v23, %v581_v14 }
 0x56a   :  { %v790_v47 = vpop.xlane.xlu0 %789 }
 0x56c   :  { %v3654_v51 = vpop.eup %3653 }
 0x56d   :  { %v580_v9 = vmul.f32 %v3654_v51, %v3636_v11  ;;  %v3656_v20 = vpop.eup %3655 }
 0x56e   :  { %v799_v12 = vpop.xlane.xlu0 %798  ;;  %v464_v21 = vmul.f32 %v3656_v20, %v4163_v58  ;;  %v702_v58 = vmul.bf16 %v4053_v22, %v3969_v1 }
 0x56f   :  { %v583_v30 = vpack.c.bf16 %v580_v9, %v579_v60  ;;  %3663 = vrcp.f32 %v799_v12 }
 0x570   :  { %v3658_v29 = vpop.eup %3657  ;;  %3665 = vrcp.f32 %v790_v47 }
 0x571   :  { %v3660_v4 = vpop.eup %3659  ;;  %3311 = vmatprep.mubr.msk.bf16.mxu0 %vm423_vm12, %v583_v30  ;;  %v465_v7 = vmul.f32 %v3658_v29, %v3638_v15  ;;  %3667 = vrcp.f32 %v796_v43 }
 0x572   :  { %3312 = vmatmul.mubr.msk.bf16.vlgmr.msra.gmra.mxu0 %vm423_vm12, %v584_v48  ;;  %v793_v26 = vpop.xlane.xlu0 %792  ;;  %v3662_v11 = vpop.eup %3661  ;;  %v467_v8 = vmul.f32 %v3660_v4, %v4178_v56 }
 0x573   :  { %3316 = vmatpush3.bf16.msra.mxu0 %v4077_v36  ;;  %3669 = vrcp.f32 %v793_v26  ;;  %v468_v45 = vpack.c.bf16 %v465_v7, %v464_v21  ;;  %v466_v15 = vmul.f32 %v3662_v11, %v4168_v59  ;;  %v701_v36 = vmul.bf16 %v4013_v53, %v3969_v1 }
 0x574   :  { %3317 = vmatprep.subr.bf16.mxu0 %v354_v42 }
 0x575   :  { %3319 = vmatprep.mubr.msk.bf16.mxu0 %vm423_vm12, %v468_v45  ;;  %v469_v27 = vpack.c.bf16 %v467_v8, %v466_v15 }
 0x576   :  { %v882_v6 = vpop.permute.xlu0 %881 }
 0x577   :  { %3318 = vmatpush3.bf16.msra.mxu0 %v354_v42  ;;  %v887_v43 = vsel %vm124_vm1, %v882_v6, 0 }
 0x578   :  { %3331 = vmatprep.subr.bf16.mxu0 %v702_v58 }
 0x57a   :  { %3320 = vmatmul.mubr.msk.bf16.vlgmr.msra.gmra.mxu0 %vm423_vm12, %v469_v27 }
 0x57b   :  { %3332 = vmatpush3.bf16.msra.mxu0 %v702_v58 }
 0x57c   :  { %3333 = vmatprep.subr.bf16.mxu0 %v701_v36  ;;  %v3664_v28 = vpop.eup %3663 }
 0x57d   :  { %v3666_v34 = vpop.eup %3665  ;;  %v807_v22 = vmul.f32 %v3664_v28, %v4198_v19 }
 0x57e   :  { %v3668_v56 = vpop.eup %3667  ;;  %v804_v59 = vmul.f32 %v3666_v34, %v4194_v18  ;;  %v884_v18 = vsel %vm124_vm1, %v880_v0, 0 }
 0x57f   :  { %3334 = vmatpush3.bf16.msra.mxu0 %v701_v36  ;;  %v806_v40 = vmul.f32 %v3668_v56, %v4190_v16 }
 0x580   :  { %v3670_v17 = vpop.eup %3669  ;;  %3537 = vmatprep.subr.msk.bf16.mxu0 %vm124_vm1, %v882_v6 }
 0x581   :  { %v805_v39 = vmul.f32 %v3670_v17, %v4202_v55  ;;  %v809_v53 = vpack.c.bf16 %v807_v22, %v806_v40 }
 0x583   :  { %v808_v13 = vpack.c.bf16 %v805_v39, %v804_v59 }
 0x585   :  { %3335 = vmatprep.mubr.msk.bf16.mxu0 %vm423_vm12, %v808_v13 }
 0x586   :  { %3336 = vmatmul.mubr.msk.bf16.vlgmr.msra.gmra.mxu0 %vm423_vm12, %v809_v53 }
 0x587   :  { %3340 = vmatpush3.bf16.xpose.msra.mxu0 %v887_v43  ;;  %3343 = vmatprep.mubr.msk.bf16.mxu0 %vm124_vm1, %v4011_v52 }
 0x588   :  { %3538 = vmatprep.subr.msk.bf16.mxu0 %vm124_vm1, %v880_v0 }
 0x58f   :  { %3342 = vmatpush3.bf16.xpose.msra.mxu0 %v884_v18 }
 0x596   :  { %3344 = vmatmul.mubr.msk.bf16.vlgmr.msra.gmra.mxu0 %vm124_vm1, %v4027_v5 }
 0x632   :  { %v3313_v16 = vpop.f32.mrf.mxu0 }
 0x634   :  { %v625_v19 = vpop.f32.mrf.mxu0 }
 0x636   :  { %v3314_v55 = vpop.f32.mrf.mxu0 }
 0x638   :  { %v628_v46 = vpop.f32.mrf.mxu0 }
 0x63a   :  { %v3321_v47 = vpop.f32.mrf.mxu0 }
 0x63b   :  { %v689_v50 = vadd.f32 %v3321_v47, %v3313_v16  ;;  %v3563_v47 = vld [vmem:[%s4803_s5 + $0x18] sm:$0xff]  }
 0x63c   :  { %v680_v51 = vpop.f32.mrf.mxu0  ;;  %3355 = vmatprep.subr.bf16.mxu1 %v3563_v47 }
 0x63d   :  { %v681_v23 = vadd.f32 %v680_v51, %v625_v19 }
 0x63e   :  { %v3322_v60 = vpop.f32.mrf.mxu0 }
 0x63f   :  { %v692_v9 = vadd.f32 %v3322_v60, %v3314_v55 }
 0x640   :  { %v683_v20 = vpop.f32.mrf.mxu0 }
 0x641   :  { %v684_v52 = vadd.f32 %v683_v20, %v628_v46 }
 0x646   :  { %v3337_v12 = vpop.f32.mrf.mxu0 }
 0x647   :  { %v4240_v14 = vadd.f32 %v3337_v12, %v689_v50 }
 0x648   :  { %v850_v30 = vpop.f32.mrf.mxu0 }
 0x649   :  { %v4242_v29 = vadd.f32 %v850_v30, %v681_v23 }
 0x64a   :  { %v3338_v48 = vpop.f32.mrf.mxu0 }
 0x64b   :  { %v4244_v5 = vadd.f32 %v3338_v48, %v692_v9 }
 0x64c   :  { %v853_v4 = vpop.f32.mrf.mxu0 }
 0x64d   :  { %v4246_v21 = vadd.f32 %v853_v4, %v684_v52 }
 0x656   :  { %v3345_v7 = vpop.f32.mrf.mxu0 }
 0x657   :  { %v932_v45 = vadd.f32 %v3345_v7, %v4092_v41 }
 0x658   :  { %v923_v26 = vpop.f32.mrf.mxu0 }
 0x659   :  { %v924_v42 = vadd.f32 %v923_v26, %v4097_v44  ;;  %v944_v28 = vsel %vm423_vm12, %v932_v45, -inf }
 0x65a   :  { %v3346_v11 = vpop.f32.mrf.mxu0 }
 0x65b   :  { %v938_v8 = vsel %vm423_vm12, %v924_v42, -inf  ;;  %v935_v27 = vadd.f32 %v3346_v11, %v4112_v57  ;;  %v3564_v11 = vld [vmem:[%s4803_s5 + $0x10] sm:$0xff]  }
 0x65c   :  { %v926_v58 = vpop.f32.mrf.mxu0  ;;  %939 = vmax.xlane.f32.xlu0 %v938_v8  ;;  %v3566_v8 = vld [vmem:[%s4803_s5] sm:$0xff]  }
 0x65d   :  { %v927_v15 = vadd.f32 %v926_v58, %v4105_v54  ;;  %v947_v34 = vsel %vm423_vm12, %v935_v27, -inf }
 0x65f   :  { %v941_v36 = vsel %vm423_vm12, %v927_v15, -inf }
 0x660   :  { %942 = vmax.xlane.f32.xlu1 %v941_v36  ;;  %945 = vmax.xlane.f32.xlu0 %v944_v28 }
 0x664   :  { %948 = vmax.xlane.f32.xlu0 %v947_v34 }
 0x6e5   :  { %v940_v44 = vpop.xlane.xlu0 %939 }
 0x6e6   :  { %v950_v56 = vsub.f32 %v924_v42, %v940_v44 }
 0x6e8   :  { %v954_v41 = vmul.f32 1.442695, %v950_v56 }
 0x6e9   :  { %v943_v6 = vpop.xlane.xlu1 %942  ;;  %v946_v17 = vpop.xlane.xlu0 %945 }
 0x6ea   :  { %3671 = vpow2.f32 %v954_v41  ;;  %v951_v22 = vsub.f32 %v927_v15, %v943_v6  ;;  %v952_v59 = vsub.f32 %v932_v45, %v946_v17  ;;  %v3565_v45 = vld [vmem:[%s4803_s5 + $0x8] sm:$0xff]  }
 0x6ec   :  { %v956_v54 = vmul.f32 1.442695, %v951_v22  ;;  %v958_v39 = vmul.f32 1.442695, %v952_v59  ;;  %v1053_v22 = vld [vmem:[%s4800_s10 + $0x6] ss:$0 sm:$0xff] }
 0x6ed   :  { %v949_v57 = vpop.xlane.xlu0 %948 }
 0x6ee   :  { %3673 = vpow2.f32 %v956_v54  ;;  %v953_v40 = vsub.f32 %v935_v27, %v949_v57 }
 0x6ef   :  { %3675 = vpow2.f32 %v958_v39 }
 0x6f0   :  { %v960_v13 = vmul.f32 1.442695, %v953_v40 }
 0x6f2   :  { %3677 = vpow2.f32 %v960_v13 }
 0x6f7   :  { %v3672_v53 = vpop.eup %3671 }
 0x6f8   :  { %v962_v43 = vsel %vm423_vm12, %v3672_v53, 0.0 }
 0x6f9   :  { %963 = vadd.xlane.f32.xlu1 %v962_v43 }
 0x6fb   :  { %v3674_v0 = vpop.eup %3673 }
 0x6fc   :  { %v3676_v18 = vpop.eup %3675  ;;  %v965_v16 = vsel %vm423_vm12, %v3674_v0, 0.0 }
 0x6fd   :  { %966 = vadd.xlane.f32.xlu0 %v965_v16  ;;  %v968_v19 = vsel %vm423_vm12, %v3676_v18, 0.0 }
 0x6fe   :  { %969 = vadd.xlane.f32.xlu1 %v968_v19 }
 0x6ff   :  { %v3678_v55 = vpop.eup %3677 }
 0x700   :  { %v971_v46 = vsel %vm423_vm12, %v3678_v55, 0.0 }
 0x701   :  { %972 = vadd.xlane.f32.xlu0 %v971_v46 }
 0x782   :  { %v964_v50 = vpop.xlane.xlu1 %963 }
 0x783   :  { %3679 = vrcp.f32 %v964_v50 }
 0x786   :  { %v967_v51 = vpop.xlane.xlu0 %966 }
 0x787   :  { %v970_v23 = vpop.xlane.xlu1 %969  ;;  %3681 = vrcp.f32 %v967_v51 }
 0x788   :  { %3683 = vrcp.f32 %v970_v23 }
 0x78a   :  { %v973_v60 = vpop.xlane.xlu0 %972 }
 0x78b   :  { %3685 = vrcp.f32 %v973_v60 }
 0x790   :  { %v3680_v9 = vpop.eup %3679 }
 0x791   :  { %v978_v52 = vmul.f32 %v3680_v9, %v3672_v53 }
 0x794   :  { %v3682_v20 = vpop.eup %3681 }
 0x795   :  { %v979_v12 = vmul.f32 %v3682_v20, %v3674_v0  ;;  %v3684_v30 = vpop.eup %3683 }
 0x796   :  { %v980_v7 = vmul.f32 %v3684_v30, %v3676_v18 }
 0x797   :  { %v982_v48 = vpack.c.bf16 %v979_v12, %v978_v52 }
 0x798   :  { %v3686_v4 = vpop.eup %3685 }
 0x799   :  { %3351 = vmatprep.mubr.msk.bf16.mxu1 %vm423_vm12, %v982_v48  ;;  %v981_v26 = vmul.f32 %v3686_v4, %v3678_v55 }
 0x79b   :  { %v983_v42 = vpack.c.bf16 %v981_v26, %v980_v7  ;;  %v3567_v26 = vld [vmem:[%s4804_s6 + $0x18] sm:$0xff]  }
 0x79c   :  { %3367 = vmatprep.subr.bf16.mxu0 %v3567_v26 }
 0x79d   :  { %3352 = vmatmul.mubr.msk.bf16.vlgmr.msra.gmra.mxu1 %vm423_vm12, %v983_v42  ;;  %3368 = vmatpush3.bf16.msra.mxu0 %v3567_v26  ;;  %v3568_v42 = vld [vmem:[%s4804_s6 + $0x10] sm:$0xff]  }
 0x79e   :  { %3356 = vmatpush3.bf16.msra.mxu1 %v3563_v47  ;;  %3369 = vmatprep.subr.bf16.mxu0 %v3568_v42 }
 0x79f   :  { %3357 = vmatprep.subr.bf16.mxu1 %v3564_v11 }
 0x7a1   :  { %3370 = vmatpush3.bf16.msra.mxu0 %v3568_v42 }
 0x7a2   :  { %3358 = vmatpush3.bf16.msra.mxu1 %v3564_v11  ;;  %v3569_v11 = vld [vmem:[%s4804_s6 + $0x8] sm:$0xff]  }
 0x7a3   :  { %3359 = vmatprep.subr.bf16.mxu1 %v3565_v45  ;;  %3371 = vmatprep.subr.bf16.mxu0 %v3569_v11 }
 0x7a5   :  { %3372 = vmatpush3.bf16.msra.mxu0 %v3569_v11 }
 0x7a6   :  { %3360 = vmatpush3.bf16.msra.mxu1 %v3565_v45  ;;  %v3570_v45 = vld [vmem:[%s4804_s6] sm:$0xff]  }
 0x7a7   :  { %3361 = vmatprep.subr.bf16.mxu1 %v3566_v8  ;;  %3373 = vmatprep.subr.bf16.mxu0 %v3570_v45 }
 0x7a9   :  { %3374 = vmatpush3.bf16.msra.mxu0 %v3570_v45 }
 0x7aa   :  { %3362 = vmatpush3.bf16.msra.mxu1 %v3566_v8 }
 0x85d   :  { %v3353_v58 = vpop.f32.mrf.mxu1 }
 0x85e   :  { %v1041_v36 = vadd.f32 %v3353_v58, %v4240_v14 }
 0x85f   :  { %v1024_v15 = vpop.f32.mrf.mxu1 }
 0x860   :  { %v1039_v44 = vadd.f32 %v1024_v15, %v4242_v29 }
 0x861   :  { %v3354_v27 = vpop.f32.mrf.mxu1 }
 0x862   :  { %v1042_v28 = vadd.f32 %v3354_v27, %v4244_v5 }
 0x863   :  { %v1027_v34 = vpop.f32.mrf.mxu1 }
 0x864   :  { %v1044_v56 = vpack.c.bf16 %v1042_v28, %v1041_v36  ;;  %v1040_v41 = vadd.f32 %v1027_v34, %v4246_v21 }
 0x866   :  { %v1043_v6 = vpack.c.bf16 %v1040_v41, %v1039_v44 }
 0x868   :  { %3363 = vmatprep.mubr.msk.bf16.mxu1 %vm124_vm1, %v1043_v6 }
 0x869   :  { %3364 = vmatmul.mubr.msk.bf16.vlgmr.msra.gmra.mxu1 %vm124_vm1, %v1044_v56 }
 0x929   :  { %v3365_v17 = vpop.f32.mrf.mxu1 }
 0x92a   :  { %v1127_v14 = vadd.f32 %v3365_v17, %v1053_v22 }
 0x92b   :  { %v1118_v59 = vpop.f32.mrf.mxu1 }
 0x92c   :  { %v1119_v54 = vadd.f32 %v1118_v59, %v1053_v22  ;;  %v1135_v13 = vadd.f32 %v1127_v14, %v3995_v32  ;;  %v1137_v14 = vld [vmem:[%s4800_s10 + $0x7] ss:$0 sm:$0xff] }
 0x92d   :  { %v3366_v5 = vpop.f32.mrf.mxu1 }
 0x92e   :  { %v1133_v39 = vadd.f32 %v1119_v54, %v3983_v24  ;;  %v1130_v57 = vadd.f32 %v3366_v5, %v1053_v22  ;;  %v1145_v0 = vsel %vm124_vm1, %v1135_v13, 0.0 }
 0x92f   :  { %v1121_v29 = vpop.f32.mrf.mxu1 }
 0x930   :  { %v1122_v40 = vadd.f32 %v1121_v29, %v1053_v22  ;;  %v1139_v21 = vsel %vm124_vm1, %v1133_v39, 0.0  ;;  %v1136_v18 = vadd.f32 %v1130_v57, %v3993_v31 }
 0x931   :  { %1140 = vadd.xlane.f32.xlu1 %v1139_v21 }
 0x932   :  { %v1134_v53 = vadd.f32 %v1122_v40, %v3985_v25  ;;  %v1148_v24 = vsel %vm124_vm1, %v1136_v18, 0.0  ;;  %v1138_v40 = vld [vmem:[%s4800_s10 + $0x10] ss:$0 sm:$0xff] }
 0x934   :  { %v1142_v43 = vsel %vm124_vm1, %v1134_v53, 0.0 }
 0x935   :  { %1143 = vadd.xlane.f32.xlu0 %v1142_v43  ;;  %1146 = vadd.xlane.f32.xlu1 %v1145_v0 }
 0x939   :  { %1149 = vadd.xlane.f32.xlu0 %v1148_v24 }
 0x9ba   :  { %v1141_v16 = vpop.xlane.xlu1 %1140 }
 0x9bb   :  { %v1151_v19 = vmul.f32 0.015625, %v1141_v16 }
 0x9bd   :  { %v1155_v55 = vsub.f32 %v1133_v39, %v1151_v19 }
 0x9be   :  { %v1144_v46 = vpop.xlane.xlu0 %1143  ;;  %v1147_v47 = vpop.xlane.xlu1 %1146 }
 0x9bf   :  { %v1152_v32 = vmul.f32 0.015625, %v1144_v46  ;;  %v1153_v50 = vmul.f32 0.015625, %v1147_v47  ;;  %v1159_v51 = vmul.f32 %v1155_v55, %v1155_v55  ;;  %v3571_v47 = vld [vmem:[%s4805_s7 + $0x38] sm:$0xff]  }
 0x9c0   :  { %3379 = vmatprep.subr.bf16.mxu1 %v3571_v47 }
 0x9c1   :  { %v1156_v25 = vsub.f32 %v1134_v53, %v1152_v32  ;;  %v1157_v23 = vsub.f32 %v1135_v13, %v1153_v50  ;;  %v1163_v60 = vsel %vm124_vm1, %v1159_v51, 0.0  ;;  %3380 = vmatpush3.bf16.msra.mxu1 %v3571_v47  ;;  %v3572_v32 = vld [vmem:[%s4805_s7 + $0x30] sm:$0xff]   ;;  %v3573_v50 = vld [vmem:[%s4805_s7 + $0x28] sm:$0xff]   ;;  %v3574_v51 = vld [vmem:[%s4805_s7 + $0x20] sm:$0xff]  }
 0x9c2   :  { %v1150_v9 = vpop.xlane.xlu0 %1149  ;;  %1164 = vadd.xlane.f32.xlu1 %v1163_v60  ;;  %3381 = vmatprep.subr.bf16.mxu1 %v3572_v32  ;;  %v3577_v60 = vld [vmem:[%s4805_s7 + $0x8] sm:$0xff]  }
 0x9c3   :  { %v1154_v31 = vmul.f32 0.015625, %v1150_v9  ;;  %v1160_v20 = vmul.f32 %v1156_v25, %v1156_v25  ;;  %v1161_v52 = vmul.f32 %v1157_v23, %v1157_v23  ;;  %v3578_v9 = vld [vmem:[%s4805_s7] sm:$0xff]  }
 0x9c5   :  { %v1158_v12 = vsub.f32 %v1136_v18, %v1154_v31  ;;  %v1166_v30 = vsel %vm124_vm1, %v1160_v20, 0.0  ;;  %v1169_v48 = vsel %vm124_vm1, %v1161_v52, 0.0  ;;  %3382 = vmatpush3.bf16.msra.mxu1 %v3572_v32  ;;  %v1209_v31 = vld [vmem:[%s4800_s10 + $0x11] ss:$0 sm:$0xff] }
 0x9c6   :  { %1167 = vadd.xlane.f32.xlu0 %v1166_v30  ;;  %1170 = vadd.xlane.f32.xlu1 %v1169_v48 }
 0x9c7   :  { %v1162_v4 = vmul.f32 %v1158_v12, %v1158_v12  ;;  %3383 = vmatprep.subr.bf16.mxu1 %v3573_v50 }
 0x9c9   :  { %v1172_v7 = vsel %vm124_vm1, %v1162_v4, 0.0  ;;  %3384 = vmatpush3.bf16.msra.mxu1 %v3573_v50 }
 0x9ca   :  { %1173 = vadd.xlane.f32.xlu0 %v1172_v7  ;;  %3385 = vmatprep.subr.bf16.mxu1 %v3574_v51 }
 0x9cd   :  { %3386 = vmatpush3.bf16.msra.mxu1 %v3574_v51 }
 0xa4b   :  { %v1165_v8 = vpop.xlane.xlu1 %1164 }
 0xa4c   :  { %v1175_v58 = vmul.f32 0.015625, %v1165_v8 }
 0xa4e   :  { %v1179_v15 = vadd.f32 1e-12, %v1175_v58 }
 0xa4f   :  { %v1168_v27 = vpop.xlane.xlu0 %1167  ;;  %v1171_v36 = vpop.xlane.xlu1 %1170 }
 0xa50   :  { %3687 = vrsqrt.f32 %v1179_v15  ;;  %v1176_v28 = vmul.f32 0.015625, %v1168_v27  ;;  %v1177_v34 = vmul.f32 0.015625, %v1171_v36 }
 0xa52   :  { %v1180_v44 = vadd.f32 1e-12, %v1176_v28  ;;  %v1181_v56 = vadd.f32 1e-12, %v1177_v34 }
 0xa53   :  { %v1174_v41 = vpop.xlane.xlu0 %1173 }
 0xa54   :  { %3689 = vrsqrt.f32 %v1180_v44  ;;  %v1178_v6 = vmul.f32 0.015625, %v1174_v41 }
 0xa55   :  { %3691 = vrsqrt.f32 %v1181_v56 }
 0xa56   :  { %v1182_v17 = vadd.f32 1e-12, %v1178_v6 }
 0xa58   :  { %3693 = vrsqrt.f32 %v1182_v17 }
 0xa5d   :  { %v3688_v22 = vpop.eup %3687 }
 0xa5e   :  { %v1187_v59 = vmul.f32 %v3688_v22, %v1155_v55 }
 0xa60   :  { %v1191_v29 = vmul.f32 %v1187_v59, %v1137_v14 }
 0xa61   :  { %v3690_v54 = vpop.eup %3689 }
 0xa62   :  { %v3692_v5 = vpop.eup %3691  ;;  %v1188_v39 = vmul.f32 %v3690_v54, %v1156_v25  ;;  %v4313_v43 = vadd.f32 %v1191_v29, %v1138_v40  ;;  %v3575_v25 = vld [vmem:[%s4805_s7 + $0x18] sm:$0xff]  }
 0xa63   :  { %v1189_v57 = vmul.f32 %v3692_v5, %v1157_v23  ;;  %3387 = vmatprep.subr.bf16.mxu1 %v3575_v25  ;;  %v3576_v23 = vld [vmem:[%s4805_s7 + $0x10] sm:$0xff]  }
 0xa64   :  { %v1192_v21 = vmul.f32 %v1188_v39, %v1137_v14  ;;  %3388 = vmatpush3.bf16.msra.mxu1 %v3575_v25 }
 0xa65   :  { %v3694_v13 = vpop.eup %3693  ;;  %v1193_v18 = vmul.f32 %v1189_v57, %v1137_v14  ;;  %3389 = vmatprep.subr.bf16.mxu1 %v3576_v23 }
 0xa66   :  { %v1190_v53 = vmul.f32 %v3694_v13, %v1158_v12  ;;  %v4315_v0 = vadd.f32 %v1192_v21, %v1138_v40 }
 0xa67   :  { %v4320_v19 = vadd.f32 %v1193_v18, %v1138_v40 }
 0xa68   :  { %v1199_v24 = vpack.c.bf16 %v4315_v0, %v4313_v43  ;;  %v1194_v16 = vmul.f32 %v1190_v53, %v1137_v14  ;;  %3390 = vmatpush3.bf16.msra.mxu1 %v3576_v23 }
 0xa69   :  { %3391 = vmatprep.subr.bf16.mxu1 %v3577_v60 }
 0xa6a   :  { %3375 = vmatprep.mubr.msk.bf16.mxu0 %vm124_vm1, %v1199_v24  ;;  %v4322_v55 = vadd.f32 %v1194_v16, %v1138_v40 }
 0xa6c   :  { %v1200_v46 = vpack.c.bf16 %v4322_v55, %v4320_v19  ;;  %3392 = vmatpush3.bf16.msra.mxu1 %v3577_v60 }
 0xa6d   :  { %3393 = vmatprep.subr.bf16.mxu1 %v3578_v9 }
 0xa6e   :  { %3376 = vmatmul.mubr.msk.bf16.vlgmr.msra.gmra.mxu0 %vm124_vm1, %v1200_v46 }
 0xa6f   :  { %1609 = vmatprep.mubr.bf16.mxu0 %v3811_v49 }
 0xa70   :  { %3394 = vmatpush3.bf16.msra.mxu1 %v3578_v9 }
 0xb2e   :  { %v3377_v20 = vpop.f32.mrf.mxu0 }
 0xb2f   :  { %v1283_v52 = vadd.f32 %v3377_v20, %v1209_v31 }
 0xb30   :  { %v1274_v12 = vpop.f32.mrf.mxu0 }
 0xb31   :  { %v1295_v30 = vmul.f32 0.044715, %v1283_v52  ;;  %v1275_v48 = vadd.f32 %v1274_v12, %v1209_v31  ;;  %v1291_v47 = vmul.f32 0.5, %v1283_v52 }
 0xb32   :  { %v3378_v4 = vpop.f32.mrf.mxu0 }
 0xb33   :  { %v1299_v7 = vmul.f32 %v1295_v30, %v1283_v52  ;;  %v1293_v26 = vmul.f32 0.044715, %v1275_v48  ;;  %v1286_v42 = vadd.f32 %v3378_v4, %v1209_v31  ;;  %v1289_v24 = vmul.f32 0.5, %v1275_v48 }
 0xb34   :  { %v1277_v11 = vpop.f32.mrf.mxu0 }
 0xb35   :  { %v1303_v45 = vmul.f32 %v1299_v7, %v1283_v52  ;;  %v1297_v8 = vmul.f32 %v1293_v26, %v1275_v48  ;;  %v1296_v58 = vmul.f32 0.044715, %v1286_v42  ;;  %v1278_v15 = vadd.f32 %v1277_v11, %v1209_v31  ;;  %v1343_v31 = vld [vmem:[%s4800_s10 + $0x12] ss:$0 sm:$0xff] }
 0xb36   :  { %v1292_v53 = vmul.f32 0.5, %v1286_v42 }
 0xb37   :  { %v1307_v27 = vadd.f32 %v1303_v45, %v1283_v52  ;;  %v1301_v36 = vmul.f32 %v1297_v8, %v1275_v48  ;;  %v1300_v28 = vmul.f32 %v1296_v58, %v1286_v42  ;;  %v1294_v34 = vmul.f32 0.044715, %v1278_v15 }
 0xb38   :  { %v1290_v16 = vmul.f32 0.5, %v1278_v15 }
 0xb39   :  { %v1304_v44 = vmul.f32 %v1300_v28, %v1286_v42  ;;  %v1298_v56 = vmul.f32 %v1294_v34, %v1278_v15  ;;  %v1305_v41 = vadd.f32 %v1301_v36, %v1275_v48  ;;  %v1311_v6 = vmul.f32 0.7978846, %v1307_v27 }
 0xb3b   :  { %v1308_v17 = vadd.f32 %v1304_v44, %v1286_v42  ;;  %v1302_v22 = vmul.f32 %v1298_v56, %v1278_v15  ;;  %v1309_v59 = vmul.f32 0.7978846, %v1305_v41 }
 0xb3d   :  { %v1312_v14 = vmul.f32 0.7978846, %v1308_v17  ;;  %v1306_v54 = vadd.f32 %v1302_v22, %v1278_v15  ;;  %3695 = vtanh.f32 %v1309_v59 }
 0xb3e   :  { %3697 = vtanh.f32 %v1311_v6 }
 0xb3f   :  { %3699 = vtanh.f32 %v1312_v14  ;;  %v1310_v5 = vmul.f32 0.7978846, %v1306_v54 }
 0xb41   :  { %3701 = vtanh.f32 %v1310_v5 }
 0xb4a   :  { %v3696_v39 = vpop.eup %3695 }
 0xb4b   :  { %v3698_v29 = vpop.eup %3697  ;;  %v1317_v40 = vadd.f32 1.0, %v3696_v39 }
 0xb4c   :  { %v3700_v57 = vpop.eup %3699  ;;  %v1319_v18 = vadd.f32 1.0, %v3698_v29 }
 0xb4d   :  { %v1320_v21 = vadd.f32 1.0, %v3700_v57  ;;  %v1321_v50 = vmul.f32 %v1317_v40, %v1289_v24  ;;  %v3581_v40 = vld [vmem:[%s4801_s4 + $0x74] ss:$8 sps:$4 sm:$0xff]   ;;  %v3585_v24 = vld [vmem:[%s4801_s4 + $0x50] ss:$8 sps:$4 sm:$0xff]  }
 0xb4e   :  { %v3702_v13 = vpop.eup %3701  ;;  %v1323_v25 = vmul.f32 %v1319_v18, %v1291_v47  ;;  %1585 = vmatprep.subr.bf16.mxu0 %v3581_v40  ;;  %v3587_v18 = vld [vmem:[%s4801_s4 + $0x54] ss:$8 sps:$4 sm:$0xff]  }
 0xb4f   :  { %v1318_v46 = vadd.f32 1.0, %v3702_v13  ;;  %v1324_v32 = vmul.f32 %v1320_v21, %v1292_v53  ;;  %v3579_v21 = vld [vmem:[%s4801_s4 + $0x70] ss:$8 sps:$4 sm:$0xff]   ;;  %v3584_v13 = vld [vmem:[%s4801_s4 + $0x64] ss:$8 sps:$4 sm:$0xff]  }
 0xb50   :  { %1586 = vmatpush1.bf16.msra.mxu0 %v3579_v21  ;;  %v3582_v53 = vld [vmem:[%s4801_s4 + $0x60] ss:$8 sps:$4 sm:$0xff]  }
 0xb51   :  { %v1322_v51 = vmul.f32 %v1318_v46, %v1290_v16  ;;  %v1326_v60 = vpack.c.bf16 %v1324_v32, %v1323_v25  ;;  %1587 = vmatprep.subr.bf16.mxu0 %v3584_v13  ;;  %v3590_v16 = vld [vmem:[%s4801_s4 + $0x44] ss:$8 sps:$4 sm:$0xff]   ;;  %v3588_v46 = vld [vmem:[%s4801_s4 + $0x40] ss:$8 sps:$4 sm:$0xff]  }
 0xb53   :  { %v1325_v23 = vpack.c.bf16 %v1322_v51, %v1321_v50 }
 0xb54   :  { %1588 = vmatpush1.bf16.msra.mxu0 %v3582_v53 }
 0xb55   :  { %3395 = vmatprep.mubr.bf16.mxu1 %v1325_v23  ;;  %1589 = vmatprep.subr.bf16.mxu0 %v3587_v18 }
 0xb56   :  { %3396 = vmatmul.mubr.bf16.vlgmr.msra.gmra.mxu1 %v1326_v60 }
 0xb58   :  { %1590 = vmatpush1.bf16.msra.mxu0 %v3585_v24 }
 0xb59   :  { %1591 = vmatprep.subr.bf16.mxu0 %v3590_v16 }
 0xb5c   :  { %1592 = vmatpush1.bf16.msra.mxu0 %v3588_v46 }
 0xc16   :  { %v3397_v9 = vpop.f32.mrf.mxu1 }
 0xc17   :  { %v1435_v12 = vadd.f32 %v3397_v9, %v1343_v31 }
 0xc18   :  { %v1426_v20 = vpop.f32.mrf.mxu1 }
 0xc19   :  { %v1427_v30 = vadd.f32 %v1426_v20, %v1343_v31  ;;  %v1443_v11 = vadd.f32 %v1435_v12, %v4320_v19 }
 0xc1a   :  { %v3398_v48 = vpop.f32.mrf.mxu1 }
 0xc1b   :  { %v1441_v4 = vadd.f32 %v1427_v30, %v4313_v43  ;;  %v1438_v7 = vadd.f32 %v3398_v48, %v1343_v31  ;;  %v1453_v58 = vsel %vm124_vm1, %v1443_v11, 0.0 }
 0xc1c   :  { %v1429_v52 = vpop.f32.mrf.mxu1 }
 0xc1d   :  { %v1430_v26 = vadd.f32 %v1429_v52, %v1343_v31  ;;  %v1447_v42 = vsel %vm124_vm1, %v1441_v4, 0.0  ;;  %v1444_v15 = vadd.f32 %v1438_v7, %v4322_v55  ;;  %v1445_v52 = vld [vmem:[%s4800_s10 + $0x13] ss:$0 sm:$0xff] }
 0xc1e   :  { %1448 = vadd.xlane.f32.xlu1 %v1447_v42 }
 0xc1f   :  { %v1442_v45 = vadd.f32 %v1430_v26, %v4315_v0  ;;  %v1456_v43 = vsel %vm124_vm1, %v1444_v15, 0.0 }
 0xc21   :  { %v1450_v8 = vsel %vm124_vm1, %v1442_v45, 0.0 }
 0xc22   :  { %1451 = vadd.xlane.f32.xlu0 %v1450_v8  ;;  %1454 = vadd.xlane.f32.xlu1 %v1453_v58 }
 0xc26   :  { %1457 = vadd.xlane.f32.xlu0 %v1456_v43 }
 0xca7   :  { %v1449_v27 = vpop.xlane.xlu1 %1448 }
 0xca8   :  { %v1459_v36 = vmul.f32 0.015625, %v1449_v27 }
 0xcaa   :  { %v1463_v28 = vsub.f32 %v1441_v4, %v1459_v36 }
 0xcab   :  { %v1452_v34 = vpop.xlane.xlu0 %1451  ;;  %v1455_v44 = vpop.xlane.xlu1 %1454 }
 0xcac   :  { %v1460_v19 = vmul.f32 0.015625, %v1452_v34  ;;  %v1461_v56 = vmul.f32 0.015625, %v1455_v44  ;;  %v1467_v41 = vmul.f32 %v1463_v28, %v1463_v28 }
 0xcae   :  { %v1464_v0 = vsub.f32 %v1442_v45, %v1460_v19  ;;  %v1465_v6 = vsub.f32 %v1443_v11, %v1461_v56  ;;  %v1471_v17 = vsel %vm124_vm1, %v1467_v41, 0.0  ;;  %v1446_v45 = vld [vmem:[%s4800_s10 + $0x14] ss:$0 sm:$0xff] }
 0xcaf   :  { %v1458_v22 = vpop.xlane.xlu0 %1457  ;;  %1472 = vadd.xlane.f32.xlu1 %v1471_v17 }
 0xcb0   :  { %v1462_v55 = vmul.f32 0.015625, %v1458_v22  ;;  %v1468_v59 = vmul.f32 %v1464_v0, %v1464_v0  ;;  %v1469_v14 = vmul.f32 %v1465_v6, %v1465_v6 }
 0xcb2   :  { %v1466_v54 = vsub.f32 %v1444_v15, %v1462_v55  ;;  %v1474_v5 = vsel %vm124_vm1, %v1468_v59, 0.0  ;;  %v1477_v39 = vsel %vm124_vm1, %v1469_v14, 0.0 }
 0xcb3   :  { %1475 = vadd.xlane.f32.xlu0 %v1474_v5  ;;  %1478 = vadd.xlane.f32.xlu1 %v1477_v39 }
 0xcb4   :  { %v1470_v29 = vmul.f32 %v1466_v54, %v1466_v54 }
 0xcb6   :  { %v1480_v57 = vsel %vm124_vm1, %v1470_v29, 0.0 }
 0xcb7   :  { %1481 = vadd.xlane.f32.xlu0 %v1480_v57 }
 0xd38   :  { %v1473_v47 = vpop.xlane.xlu1 %1472 }
 0xd39   :  { %v1483_v32 = vmul.f32 0.015625, %v1473_v47 }
 0xd3b   :  { %v1487_v50 = vadd.f32 1e-12, %v1483_v32 }
 0xd3c   :  { %v1476_v51 = vpop.xlane.xlu0 %1475  ;;  %v1479_v25 = vpop.xlane.xlu1 %1478 }
 0xd3d   :  { %3703 = vrsqrt.f32 %v1487_v50  ;;  %v1484_v23 = vmul.f32 0.015625, %v1476_v51  ;;  %v1485_v60 = vmul.f32 0.015625, %v1479_v25 }
 0xd3f   :  { %v1488_v9 = vadd.f32 1e-12, %v1484_v23  ;;  %v1489_v31 = vadd.f32 1e-12, %v1485_v60 }
 0xd40   :  { %v1482_v20 = vpop.xlane.xlu0 %1481 }
 0xd41   :  { %3705 = vrsqrt.f32 %v1488_v9  ;;  %v1486_v12 = vmul.f32 0.015625, %v1482_v20 }
 0xd42   :  { %3707 = vrsqrt.f32 %v1489_v31 }
 0xd43   :  { %v1490_v30 = vadd.f32 1e-12, %v1486_v12 }
 0xd45   :  { %3709 = vrsqrt.f32 %v1490_v30 }
 0xd4a   :  { %v3704_v48 = vpop.eup %3703 }
 0xd4b   :  { %v1495_v4 = vmul.f32 %v3704_v48, %v1463_v28 }
 0xd4d   :  { %v1499_v42 = vmul.f32 %v1495_v4, %v1445_v52 }
 0xd4e   :  { %v3706_v7 = vpop.eup %3705 }
 0xd4f   :  { %v1496_v26 = vmul.f32 %v3706_v7, %v1464_v0  ;;  %v3708_v11 = vpop.eup %3707  ;;  %v4400_v15 = vadd.f32 %v1499_v42, %v1446_v45  ;;  %v3071_v0 = vld [vmem:[%s4800_s10 + $0x15] ss:$8 sm:$0x3] }
 0xd50   :  { %v1497_v27 = vmul.f32 %v3708_v11, %v1465_v6  ;;  %v1524_v6 = vrot.slane %v3071_v0, %v231_v35 }
 0xd51   :  { %v1500_v8 = vmul.f32 %v1496_v26, %v1445_v52 }
 0xd52   :  { %v3710_v58 = vpop.eup %3709  ;;  %v1501_v44 = vmul.f32 %v1497_v27, %v1445_v52 }
 0xd53   :  { %v4402_v43 = vadd.f32 %v1500_v8, %v1446_v45  ;;  %v1498_v36 = vmul.f32 %v3710_v58, %v1466_v54 }
 0xd54   :  { %v4410_v56 = vadd.f32 %v1501_v44, %v1446_v45 }
 0xd55   :  { %v1507_v28 = vpack.c.bf16 %v4402_v43, %v4400_v15  ;;  %v1502_v34 = vmul.f32 %v1498_v36, %v1445_v52 }
 0xd57   :  { %3080 = vmatmul.mubr.msk.bf16.vlgmr.msra.gmra.mxu0 %vm124_vm1, %v1507_v28  ;;  %v4408_v19 = vadd.f32 %v1502_v34, %v1446_v45 }
 0xd58   :  { %1619 = vmatprep.mubr.bf16.mxu0 %v3811_v49  ;;  %v1528_v49 = vrot.slane %v3071_v0, %v235_v38  ;;  %v4492_v0 = vld [vmem:[%s4802_s2] sm:$0xff] }
 0xd59   :  { %v1508_v41 = vpack.c.bf16 %v4408_v19, %v4410_v56 }
 0xd5f   :  { %3081 = vmatmul.mubr.msk.bf16.gmra.mxu0 %vm124_vm1, %v1508_v41 }
 0xe17   :  { %v1611_v17 = vpop.f32.mrf.mxu0 }
 0xe18   :  { %v1612_v55 = vadd.f32 %v1611_v17, %v1524_v6 }
 0xe19   :  { %v1613_v22 = vpop.f32.mrf.mxu0 }
 0xe1a   :  { %v1630_v5 = vmul.f32 0.25, %v1612_v55  ;;  %v1614_v39 = vadd.f32 %v1613_v22, %v1528_v49  ;;  %v4498_v22 = vld [vmem:[%s4802_s2 + $0x10] sm:$0xff] }
 0xe1b   :  { %v1615_v59 = vpop.f32.mrf.mxu0 }
 0xe1c   :  { %v1616_v14 = vadd.f32 %v1615_v59, %v1524_v6 }
 0xe1d   :  { %v1617_v54 = vpop.f32.mrf.mxu0 }
 0xe1e   :  { %v1631_v29 = vmul.f32 0.25, %v1616_v14  ;;  %v1618_v57 = vadd.f32 %v1617_v54, %v1528_v49  ;;  %v4432_v46 = vpack.c.bf16 %v1616_v14, %v1612_v55  ;;  %v4505_v14 = vld [vmem:[%s4802_s2 + $0x8] sm:$0xff] }
 0xe1f   :  { %v1621_v40 = vpop.f32.mrf.mxu0 }
 0xe20   :  { %v4422_v21 = vpack.c.bf16 %v1631_v29, %v1630_v5  ;;  %v4424_v13 = vpack.c.bf16 %v1618_v57, %v1614_v39  ;;  %v1622_v35 = vadd.f32 %v1621_v40, %v1524_v6  ;;  %v1757_v51 = vmul.bf16 %v4432_v46, %v4023_v3  ;;  %v4512_v39 = vld [vmem:[%s4802_s2 + $0x18] sm:$0xff] }
 0xe21   :  { %v1623_v53 = vpop.f32.mrf.mxu0  ;;  %v1640_v23 = vmul.bf16 %v4432_v46, %v4021_v2  ;;  %v1978_v60 = vmul.bf16 %v4432_v46, %v4039_v10 }
 0xe22   :  { %3403 = vmatprep.mubr.msk.bf16.mxu0 %vm124_vm1, %v4422_v21  ;;  %3411 = vmatprep.mubr.msk.bf16.mxu1 %vm124_vm1, %v4422_v21  ;;  %v1632_v18 = vmul.f32 0.25, %v1622_v35  ;;  %v1759_v45 = vmul.bf16 %v4424_v13, %v3964_v63  ;;  %v2150_v36 = vmul.bf16 %v4424_v13, %v4080_v37 }
 0xe23   :  { %v1625_v33 = vpop.f32.mrf.mxu0 }
 0xe24   :  { %v1626_v38 = vadd.f32 %v1625_v33, %v1524_v6 }
 0xe25   :  { %v1627_v9 = vpop.f32.mrf.mxu0 }
 0xe26   :  { %v1633_v24 = vmul.f32 0.25, %v1626_v38  ;;  %v4430_v16 = vpack.c.bf16 %v1626_v38, %v1622_v35  ;;  %v1628_v20 = vadd.f32 %v1627_v9, %v1528_v49 }
 0xe28   :  { %v4434_v47 = vpack.c.bf16 %v1633_v24, %v1632_v18  ;;  %v1758_v32 = vmul.bf16 %v4430_v16, %v4023_v3  ;;  %v1641_v50 = vmul.bf16 %v4430_v16, %v4021_v2  ;;  %v1979_v25 = vmul.bf16 %v4430_v16, %v4039_v10 }
 0xe29   :  { %v1624_v2 = vadd.f32 %v1623_v53, %v1528_v49 }
 0xe2a   :  { %1765 = vrot.lane.b32.xlu1 %v1758_v32, %s3813_s30  ;;  %1648 = vrot.lane.b32.xlu0 %v1641_v50, %s3813_s30 }
 0xe2b   :  { %v4458_v4 = vpack.c.bf16 %v1628_v20, %v1624_v2 }
 0xe2d   :  { %v1760_v26 = vmul.bf16 %v4458_v4, %v3964_v63  ;;  %v4479_v58 = vmul.bf16 %v4458_v4, %v3961_v61  ;;  %v2151_v63 = vmul.bf16 %v4458_v4, %v4080_v37 }
 0xe2e   :  { %1763 = vrot.lane.b32.xlu1 %v1757_v51, %s3813_s30  ;;  %1986 = vrot.lane.b32.xlu0 %v1979_v25, %s3813_s30 }
 0xe32   :  { %1646 = vrot.lane.b32.xlu1 %v1640_v23, %s3813_s30 }
 0xe36   :  { %1984 = vrot.lane.b32.xlu1 %v1978_v60, %s3813_s30 }
 0xe9c   :  { %v1766_v31 = vpop.permute.xlu1 %1765  ;;  %v1649_v3 = vpop.permute.xlu0 %1648 }
 0xe9d   :  { %v1771_v12 = vsel %vm124_vm1, %v1766_v31, 0  ;;  %v1660_v30 = vsel %vm124_vm1, %v1649_v3, 0  ;;  %3539 = vmatprep.subr.msk.bf16.mxu0 %vm124_vm1, %v1649_v3  ;;  %3541 = vmatprep.subr.msk.bf16.mxu1 %vm124_vm1, %v1766_v31 }
 0xe9e   :  { %3400 = vmatpush3.bf16.xpose.msra.mxu0 %v1660_v30  ;;  %3408 = vmatpush3.bf16.xpose.msra.mxu1 %v1771_v12 }
 0xea0   :  { %v1764_v48 = vpop.permute.xlu1 %1763  ;;  %v1987_v42 = vpop.permute.xlu0 %1986 }
 0xea1   :  { %3542 = vmatprep.subr.msk.bf16.mxu1 %vm124_vm1, %v1764_v48  ;;  %v1768_v52 = vsel %vm124_vm1, %v1764_v48, 0  ;;  %v1992_v11 = vsel %vm124_vm1, %v1987_v42, 0 }
 0xea4   :  { %v1647_v10 = vpop.permute.xlu1 %1646 }
 0xea5   :  { %v1657_v7 = vsel %vm124_vm1, %v1647_v10, 0  ;;  %3540 = vmatprep.subr.msk.bf16.mxu0 %vm124_vm1, %v1647_v10 }
 0xea6   :  { %3402 = vmatpush3.bf16.xpose.msra.mxu0 %v1657_v7  ;;  %3410 = vmatpush3.bf16.xpose.msra.mxu1 %v1768_v52 }
 0xea7   :  { %3415 = vmatprep.subr.bf16.mxu0 %v1760_v26  ;;  %3543 = vmatprep.subr.msk.bf16.mxu1 %vm124_vm1, %v1987_v42 }
 0xea8   :  { %v1985_v8 = vpop.permute.xlu1 %1984 }
 0xea9   :  { %v1989_v27 = vsel %vm124_vm1, %v1985_v8, 0 }
 0xead   :  { %3404 = vmatmul.mubr.msk.bf16.vlgmr.msra.gmra.mxu0 %vm124_vm1, %v4434_v47  ;;  %3412 = vmatmul.mubr.msk.bf16.vlgmr.msra.gmra.mxu1 %vm124_vm1, %v4434_v47 }
 0xeae   :  { %3416 = vmatpush3.bf16.msra.mxu0 %v1760_v26  ;;  %3432 = vmatpush3.bf16.xpose.msra.mxu1 %v1992_v11 }
 0xeaf   :  { %3435 = vmatprep.mubr.msk.bf16.mxu1 %vm124_vm1, %v4422_v21  ;;  %3417 = vmatprep.subr.bf16.mxu0 %v1759_v45 }
 0xeb0   :  { %3544 = vmatprep.subr.msk.bf16.mxu1 %vm124_vm1, %v1985_v8 }
 0xeb2   :  { %3418 = vmatpush3.bf16.msra.mxu0 %v1759_v45 }
 0xeb3   :  { %3423 = vmatprep.subr.bf16.mxu0 %v4479_v58 }
 0xeb6   :  { %3434 = vmatpush3.bf16.xpose.msra.mxu1 %v1989_v27 }
 0xeb7   :  { %3455 = vmatprep.subr.bf16.mxu1 %v2151_v63 }
 0xebd   :  { %3436 = vmatmul.mubr.msk.bf16.vlgmr.msra.gmra.mxu1 %vm124_vm1, %v4434_v47 }
 0xebe   :  { %3456 = vmatpush3.bf16.msra.mxu1 %v2151_v63 }
 0xebf   :  { %3457 = vmatprep.subr.bf16.mxu1 %v2150_v36 }
 0xec2   :  { %3458 = vmatpush3.bf16.msra.mxu1 %v2150_v36 }
 0xf6d   :  { %v3405_v28 = vpop.f32.mrf.mxu0  ;;  %v3413_v34 = vpop.f32.mrf.mxu1 }
 0xf6e   :  { %v1816_v37 = vadd.f32 %v4498_v22, %v3413_v34  ;;  %v1705_v35 = vadd.f32 %v4498_v22, %v3405_v28 }
 0xf6f   :  { %v1696_v44 = vpop.f32.mrf.mxu0  ;;  %v1807_v41 = vpop.f32.mrf.mxu1 }
 0xf70   :  { %v1808_v6 = vadd.f32 %v4492_v0, %v1807_v41  ;;  %v1697_v5 = vadd.f32 %v4492_v0, %v1696_v44  ;;  %v1828_v40 = vsel %vm423_vm12, %v1816_v37, -inf  ;;  %v1717_v51 = vsel %vm423_vm12, %v1705_v35, -inf }
 0xf71   :  { %v3414_v17 = vpop.f32.mrf.mxu1  ;;  %v3406_v49 = vpop.f32.mrf.mxu0 }
 0xf72   :  { %v1822_v55 = vsel %vm423_vm12, %v1808_v6, -inf  ;;  %v1819_v29 = vadd.f32 %v4512_v39, %v3414_v17  ;;  %v1711_v18 = vsel %vm423_vm12, %v1697_v5, -inf  ;;  %v1708_v32 = vadd.f32 %v4512_v39, %v3406_v49 }
 0xf73   :  { %v1810_v59 = vpop.f32.mrf.mxu1  ;;  %1823 = vmax.xlane.f32.xlu0 %v1822_v55  ;;  %v1699_v53 = vpop.f32.mrf.mxu0 }
 0xf74   :  { %v1811_v54 = vadd.f32 %v4505_v14, %v1810_v59  ;;  %v1700_v33 = vadd.f32 %v4505_v14, %v1699_v53  ;;  %v1831_v38 = vsel %vm423_vm12, %v1819_v29, -inf  ;;  %v1720_v31 = vsel %vm423_vm12, %v1708_v32, -inf }
 0xf76   :  { %v1825_v57 = vsel %vm423_vm12, %v1811_v54, -inf  ;;  %v1714_v50 = vsel %vm423_vm12, %v1700_v33, -inf }
 0xf77   :  { %1826 = vmax.xlane.f32.xlu1 %v1825_v57  ;;  %1829 = vmax.xlane.f32.xlu0 %v1828_v40 }
 0xf7b   :  { %1832 = vmax.xlane.f32.xlu0 %v1831_v38  ;;  %1712 = vmax.xlane.f32.xlu1 %v1711_v18 }
 0xf7d   :  { %v3437_v24 = vpop.f32.mrf.mxu1 }
 0xf7e   :  { %v2037_v9 = vadd.f32 %v4498_v22, %v3437_v24 }
 0xf7f   :  { %v2028_v25 = vpop.f32.mrf.mxu1  ;;  %1715 = vmax.xlane.f32.xlu0 %v1714_v50  ;;  %1718 = vmax.xlane.f32.xlu1 %v1717_v51 }
 0xf80   :  { %v2029_v23 = vadd.f32 %v4492_v0, %v2028_v25  ;;  %v2049_v48 = vsel %vm423_vm12, %v2037_v9, -inf }
 0xf81   :  { %v3438_v60 = vpop.f32.mrf.mxu1 }
 0xf82   :  { %v2043_v3 = vsel %vm423_vm12, %v2029_v23, -inf  ;;  %v2040_v30 = vadd.f32 %v4512_v39, %v3438_v60 }
 0xf83   :  { %v2031_v20 = vpop.f32.mrf.mxu1  ;;  %1721 = vmax.xlane.f32.xlu0 %v1720_v31  ;;  %2044 = vmax.xlane.f32.xlu1 %v2043_v3 }
 0xf84   :  { %v2032_v12 = vadd.f32 %v4505_v14, %v2031_v20  ;;  %v2052_v10 = vsel %vm423_vm12, %v2040_v30, -inf }
 0xf86   :  { %v2046_v2 = vsel %vm423_vm12, %v2032_v12, -inf }
 0xf87   :  { %2047 = vmax.xlane.f32.xlu0 %v2046_v2  ;;  %2050 = vmax.xlane.f32.xlu1 %v2049_v48 }
 0xf8b   :  { %2053 = vmax.xlane.f32.xlu0 %v2052_v10 }
 0xffc   :  { %v1824_v52 = vpop.xlane.xlu0 %1823 }
 0xffd   :  { %v1834_v7 = vsub.f32 %v1808_v6, %v1824_v52 }
 0xfff   :  { %v1838_v63 = vmul.f32 1.442695, %v1834_v7 }
0x1000   :  { %v1827_v26 = vpop.xlane.xlu1 %1826  ;;  %v1830_v42 = vpop.xlane.xlu0 %1829 }
0x1001   :  { %v1835_v11 = vsub.f32 %v1811_v54, %v1827_v26  ;;  %v1836_v45 = vsub.f32 %v1816_v37, %v1830_v42 }
0x1003   :  { %v1840_v8 = vmul.f32 1.442695, %v1835_v11  ;;  %v1842_v27 = vmul.f32 1.442695, %v1836_v45 }
0x1004   :  { %v1833_v36 = vpop.xlane.xlu0 %1832  ;;  %v1713_v28 = vpop.xlane.xlu1 %1712 }
0x1005   :  { %3711 = vpow2.f32 %v1840_v8  ;;  %v1837_v34 = vsub.f32 %v1819_v29, %v1833_v36  ;;  %v1723_v44 = vsub.f32 %v1697_v5, %v1713_v28 }
0x1006   :  { %3713 = vpow2.f32 %v1842_v27 }
0x1007   :  { %v1844_v41 = vmul.f32 1.442695, %v1837_v34  ;;  %3715 = vpow2.f32 %v1838_v63  ;;  %v1727_v17 = vmul.f32 1.442695, %v1723_v44 }
0x1008   :  { %v1716_v55 = vpop.xlane.xlu0 %1715  ;;  %v1719_v49 = vpop.xlane.xlu1 %1718 }
0x1009   :  { %3717 = vpow2.f32 %v1844_v41  ;;  %v1724_v6 = vsub.f32 %v1700_v33, %v1716_v55  ;;  %v1725_v59 = vsub.f32 %v1705_v35, %v1719_v49  ;;  %v2148_v55 = vmul.bf16 %v4432_v46, %v4181_v62 }
0x100a   :  { %3719 = vpow2.f32 %v1727_v17  ;;  %v2149_v17 = vmul.bf16 %v4430_v16, %v4181_v62 }
0x100b   :  { %v1729_v57 = vmul.f32 1.442695, %v1724_v6  ;;  %v1731_v37 = vmul.f32 1.442695, %v1725_v59 }
0x100c   :  { %v1722_v54 = vpop.xlane.xlu0 %1721  ;;  %v2045_v40 = vpop.xlane.xlu1 %2044 }
0x100d   :  { %3721 = vpow2.f32 %v1729_v57  ;;  %v1726_v53 = vsub.f32 %v1708_v32, %v1722_v54  ;;  %v2055_v29 = vsub.f32 %v2029_v23, %v2045_v40 }
0x100e   :  { %3723 = vpow2.f32 %v1731_v37 }
0x100f   :  { %v1733_v38 = vmul.f32 1.442695, %v1726_v53  ;;  %v2059_v31 = vmul.f32 1.442695, %v2055_v29 }
0x1010   :  { %v2048_v5 = vpop.xlane.xlu0 %2047  ;;  %v2051_v18 = vpop.xlane.xlu1 %2050 }
0x1011   :  { %3725 = vpow2.f32 %v1733_v38  ;;  %v2056_v24 = vsub.f32 %v2032_v12, %v2048_v5  ;;  %v2057_v50 = vsub.f32 %v2037_v9, %v2051_v18 }
0x1012   :  { %v4533_v51 = vpop.eup %3711 }
0x1013   :  { %v4535_v25 = vpop.eup %3713  ;;  %v2061_v35 = vmul.f32 1.442695, %v2056_v24  ;;  %v2063_v33 = vmul.f32 1.442695, %v2057_v50  ;;  %v1849_v60 = vsel %vm423_vm12, %v4533_v51, 0.0 }
0x1014   :  { %1850 = vadd.xlane.f32.xlu0 %v1849_v60  ;;  %v2054_v32 = vpop.xlane.xlu0 %2053  ;;  %v1852_v23 = vsel %vm423_vm12, %v4535_v25, 0.0  ;;  %v4541_v3 = vpop.eup %3715 }
0x1015   :  { %3727 = vpow2.f32 %v2061_v35  ;;  %v2058_v20 = vsub.f32 %v2040_v30, %v2054_v32  ;;  %1853 = vadd.xlane.f32.xlu1 %v1852_v23  ;;  %v1846_v48 = vsel %vm423_vm12, %v4541_v3, 0.0 }
0x1016   :  { %v3718_v9 = vpop.eup %3717  ;;  %3729 = vpow2.f32 %v2063_v33 }
0x1017   :  { %v2065_v12 = vmul.f32 1.442695, %v2058_v20  ;;  %v1855_v2 = vsel %vm423_vm12, %v3718_v9, 0.0  ;;  %3731 = vpow2.f32 %v2059_v31  ;;  %v4546_v10 = vpop.eup %3719 }
0x1018   :  { %1856 = vadd.xlane.f32.xlu0 %v1855_v2  ;;  %v1735_v7 = vsel %vm423_vm12, %v4546_v10, 0.0 }
0x1019   :  { %3733 = vpow2.f32 %v2065_v12  ;;  %1847 = vadd.xlane.f32.xlu1 %v1846_v48 }
0x101a   :  { %v4548_v52 = vpop.eup %3721 }
0x101b   :  { %v1738_v30 = vsel %vm423_vm12, %v4548_v52, 0.0  ;;  %v4554_v26 = vpop.eup %3723 }
0x101c   :  { %1739 = vadd.xlane.f32.xlu0 %v1738_v30  ;;  %v1741_v45 = vsel %vm423_vm12, %v4554_v26, 0.0 }
0x101d   :  { %1736 = vadd.xlane.f32.xlu1 %v1735_v7 }
0x101e   :  { %v4556_v42 = vpop.eup %3725 }
0x101f   :  { %v1744_v11 = vsel %vm423_vm12, %v4556_v42, 0.0 }
0x1020   :  { %1745 = vadd.xlane.f32.xlu0 %v1744_v11 }
0x1021   :  { %1742 = vadd.xlane.f32.xlu1 %v1741_v45 }
0x1022   :  { %v4562_v8 = vpop.eup %3727 }
0x1023   :  { %v4564_v27 = vpop.eup %3729  ;;  %v2070_v63 = vsel %vm423_vm12, %v4562_v8, 0.0 }
0x1024   :  { %2071 = vadd.xlane.f32.xlu0 %v2070_v63  ;;  %v2073_v36 = vsel %vm423_vm12, %v4564_v27, 0.0  ;;  %v4570_v28 = vpop.eup %3731 }
0x1025   :  { %2074 = vadd.xlane.f32.xlu1 %v2073_v36  ;;  %v2067_v41 = vsel %vm423_vm12, %v4570_v28, 0.0 }
0x1026   :  { %v4572_v34 = vpop.eup %3733 }
0x1027   :  { %v2076_v44 = vsel %vm423_vm12, %v4572_v34, 0.0 }
0x1028   :  { %2077 = vadd.xlane.f32.xlu0 %v2076_v44 }
0x1029   :  { %2068 = vadd.xlane.f32.xlu1 %v2067_v41 }
0x103a   :  { %2156 = vrot.lane.b32.xlu1 %v2149_v17, %s3813_s30 }
0x103e   :  { %2154 = vrot.lane.b32.xlu0 %v2148_v55, %s3813_s30 }
0x109d   :  { %v1851_v49 = vpop.xlane.xlu0 %1850 }
0x109e   :  { %v1854_v6 = vpop.xlane.xlu1 %1853 }
0x109f   :  { %3735 = vrcp.f32 %v1854_v6 }
0x10a0   :  { %3737 = vrcp.f32 %v1851_v49 }
0x10a1   :  { %v1857_v59 = vpop.xlane.xlu0 %1856 }
0x10a2   :  { %3739 = vrcp.f32 %v1857_v59  ;;  %v1848_v57 = vpop.xlane.xlu1 %1847 }
0x10a3   :  { %3741 = vrcp.f32 %v1848_v57 }
0x10a5   :  { %v1740_v37 = vpop.xlane.xlu0 %1739 }
0x10a6   :  { %3743 = vrcp.f32 %v1740_v37  ;;  %v1737_v54 = vpop.xlane.xlu1 %1736 }
0x10a7   :  { %3745 = vrcp.f32 %v1737_v54 }
0x10a9   :  { %v1746_v16 = vpop.xlane.xlu0 %1745 }
0x10aa   :  { %3747 = vrcp.f32 %v1746_v16  ;;  %v1743_v40 = vpop.xlane.xlu1 %1742 }
0x10ab   :  { %3749 = vrcp.f32 %v1743_v40 }
0x10ac   :  { %v3736_v53 = vpop.eup %3735 }
0x10ad   :  { %v2072_v62 = vpop.xlane.xlu0 %2071  ;;  %v3738_v46 = vpop.eup %3737  ;;  %v1864_v18 = vmul.f32 %v3736_v53, %v4535_v25 }
0x10ae   :  { %v2075_v38 = vpop.xlane.xlu1 %2074  ;;  %v1863_v33 = vmul.f32 %v3738_v46, %v4533_v51 }
0x10af   :  { %v3740_v29 = vpop.eup %3739  ;;  %3751 = vrcp.f32 %v2075_v38 }
0x10b0   :  { %v3742_v5 = vpop.eup %3741  ;;  %v1865_v24 = vmul.f32 %v3740_v29, %v3718_v9  ;;  %3753 = vrcp.f32 %v2072_v62 }
0x10b1   :  { %v2078_v50 = vpop.xlane.xlu0 %2077  ;;  %v1862_v35 = vmul.f32 %v3742_v5, %v4541_v3  ;;  %v1642_v3 = vmul.bf16 %v4424_v13, %v3961_v61 }
0x10b2   :  { %3755 = vrcp.f32 %v2078_v50  ;;  %v2069_v60 = vpop.xlane.xlu1 %2068  ;;  %v1867_v31 = vpack.c.bf16 %v1865_v24, %v1864_v18 }
0x10b3   :  { %v3744_v32 = vpop.eup %3743  ;;  %3757 = vrcp.f32 %v2069_v60  ;;  %v1866_v23 = vpack.c.bf16 %v1863_v33, %v1862_v35 }
0x10b4   :  { %v3746_v20 = vpop.eup %3745  ;;  %v1752_v12 = vmul.f32 %v3744_v32, %v4548_v52 }
0x10b5   :  { %3419 = vmatprep.mubr.msk.bf16.mxu0 %vm423_vm12, %v1866_v23  ;;  %v1751_v25 = vmul.f32 %v3746_v20, %v4546_v10  ;;  %v1981_v10 = vmul.bf16 %v4458_v4, %v3969_v1 }
0x10b6   :  { %3420 = vmatmul.mubr.msk.bf16.vlgmr.msra.gmra.mxu0 %vm423_vm12, %v1867_v31  ;;  %v2157_v44 = vpop.permute.xlu1 %2156 }
0x10b7   :  { %v3748_v9 = vpop.eup %3747  ;;  %3424 = vmatpush3.bf16.msra.mxu0 %v4479_v58  ;;  %v1755_v51 = vpack.c.bf16 %v1752_v12, %v1751_v25  ;;  %v1980_v58 = vmul.bf16 %v4424_v13, %v3969_v1  ;;  %v2162_v1 = vsel %vm124_vm1, %v2157_v44, 0  ;;  %v2155_v13 = vpop.permute.xlu0 %2154 }
0x10b8   :  { %v3750_v2 = vpop.eup %3749  ;;  %3425 = vmatprep.subr.bf16.mxu0 %v1642_v3  ;;  %v1754_v48 = vmul.f32 %v3748_v9, %v4556_v42 }
0x10b9   :  { %3427 = vmatprep.mubr.msk.bf16.mxu0 %vm423_vm12, %v1755_v51  ;;  %v1753_v52 = vmul.f32 %v3750_v2, %v4554_v26 }
0x10bb   :  { %3426 = vmatpush3.bf16.msra.mxu0 %v1642_v3  ;;  %v1756_v30 = vpack.c.bf16 %v1754_v48, %v1753_v52 }
0x10bc   :  { %3439 = vmatprep.subr.bf16.mxu0 %v1981_v10  ;;  %v3752_v7 = vpop.eup %3751 }
0x10bd   :  { %v3754_v61 = vpop.eup %3753  ;;  %v2085_v45 = vmul.f32 %v3752_v7, %v4564_v27 }
0x10be   :  { %3428 = vmatmul.mubr.msk.bf16.vlgmr.msra.gmra.mxu0 %vm423_vm12, %v1756_v30  ;;  %v2084_v63 = vmul.f32 %v3754_v61, %v4562_v8  ;;  %v2159_v8 = vsel %vm124_vm1, %v2155_v13, 0 }
0x10bf   :  { %v3756_v11 = vpop.eup %3755  ;;  %3440 = vmatpush3.bf16.msra.mxu0 %v1981_v10 }
0x10c0   :  { %v3758_v42 = vpop.eup %3757  ;;  %3441 = vmatprep.subr.bf16.mxu0 %v1980_v58  ;;  %v2086_v26 = vmul.f32 %v3756_v11, %v4572_v34 }
0x10c1   :  { %v2083_v4 = vmul.f32 %v3758_v42, %v4570_v28 }
0x10c2   :  { %v2088_v36 = vpack.c.bf16 %v2086_v26, %v2085_v45 }
0x10c3   :  { %3442 = vmatpush3.bf16.msra.mxu0 %v1980_v58  ;;  %v2087_v41 = vpack.c.bf16 %v2084_v63, %v2083_v4  ;;  %v3591_v4 = vld [vmem:[%s4803_s5 + $0x38] sm:$0xff]  }
0x10c4   :  { %3545 = vmatprep.subr.msk.bf16.mxu0 %vm124_vm1, %v2157_v44  ;;  %3463 = vmatprep.subr.bf16.mxu1 %v3591_v4 }
0x10c5   :  { %3443 = vmatprep.mubr.msk.bf16.mxu0 %vm423_vm12, %v2087_v41 }
0x10c6   :  { %3444 = vmatmul.mubr.msk.bf16.vlgmr.msra.gmra.mxu0 %vm423_vm12, %v2088_v36 }
0x10c7   :  { %3448 = vmatpush3.bf16.xpose.msra.mxu0 %v2162_v1  ;;  %3451 = vmatprep.mubr.msk.bf16.mxu0 %vm124_vm1, %v4422_v21 }
0x10c8   :  { %3546 = vmatprep.subr.msk.bf16.mxu0 %vm124_vm1, %v2155_v13 }
0x10cf   :  { %3450 = vmatpush3.bf16.xpose.msra.mxu0 %v2159_v8 }
0x10d6   :  { %3452 = vmatmul.mubr.msk.bf16.vlgmr.msra.gmra.mxu0 %vm124_vm1, %v4434_v47 }
0x1176   :  { %v3421_v27 = vpop.f32.mrf.mxu0 }
0x1178   :  { %v1908_v28 = vpop.f32.mrf.mxu0 }
0x117a   :  { %v3422_v34 = vpop.f32.mrf.mxu0 }
0x117c   :  { %v1911_v17 = vpop.f32.mrf.mxu0 }
0x117e   :  { %v3429_v55 = vpop.f32.mrf.mxu0 }
0x117f   :  { %v1972_v49 = vadd.f32 %v3429_v55, %v3421_v27 }
0x1180   :  { %v1963_v6 = vpop.f32.mrf.mxu0 }
0x1181   :  { %v1964_v59 = vadd.f32 %v1963_v6, %v1908_v28 }
0x1182   :  { %v3430_v57 = vpop.f32.mrf.mxu0 }
0x1183   :  { %v1975_v37 = vadd.f32 %v3430_v57, %v3422_v34  ;;  %v3593_v57 = vld [vmem:[%s4803_s5 + $0x28] sm:$0xff]  }
0x1184   :  { %v1966_v54 = vpop.f32.mrf.mxu0 }
0x1185   :  { %v1967_v21 = vadd.f32 %v1966_v54, %v1911_v17 }
0x1186   :  { %v3445_v16 = vpop.f32.mrf.mxu0 }
0x1187   :  { %v4616_v40 = vadd.f32 %v3445_v16, %v1972_v49 }
0x1188   :  { %v2129_v53 = vpop.f32.mrf.mxu0 }
0x1189   :  { %v4618_v62 = vadd.f32 %v2129_v53, %v1964_v59  ;;  %v3592_v59 = vld [vmem:[%s4803_s5 + $0x30] sm:$0xff]  }
0x118a   :  { %v3446_v46 = vpop.f32.mrf.mxu0 }
0x118b   :  { %v4620_v47 = vadd.f32 %v3446_v46, %v1975_v37  ;;  %v3594_v37 = vld [vmem:[%s4803_s5 + $0x20] sm:$0xff]  }
0x118c   :  { %v2132_v38 = vpop.f32.mrf.mxu0 }
0x118d   :  { %v4622_v29 = vadd.f32 %v2132_v38, %v1967_v21 }
0x1196   :  { %v3453_v5 = vpop.f32.mrf.mxu0 }
0x1197   :  { %v2207_v35 = vadd.f32 %v4498_v22, %v3453_v5 }
0x1198   :  { %v2198_v18 = vpop.f32.mrf.mxu0 }
0x1199   :  { %v2199_v24 = vadd.f32 %v4492_v0, %v2198_v18  ;;  %v2219_v20 = vsel %vm423_vm12, %v2207_v35, -inf }
0x119a   :  { %v3454_v50 = vpop.f32.mrf.mxu0 }
0x119b   :  { %v2213_v33 = vsel %vm423_vm12, %v2199_v24, -inf  ;;  %v2210_v32 = vadd.f32 %v4512_v39, %v3454_v50 }
0x119c   :  { %v2201_v60 = vpop.f32.mrf.mxu0  ;;  %2214 = vmax.xlane.f32.xlu1 %v2213_v33  ;;  %v2329_v33 = vld [vmem:[%s4800_s10 + $0x16] ss:$0 sm:$0xff] }
0x119d   :  { %v2202_v31 = vadd.f32 %v4505_v14, %v2201_v60  ;;  %v2222_v12 = vsel %vm423_vm12, %v2210_v32, -inf }
0x119f   :  { %v2216_v23 = vsel %vm423_vm12, %v2202_v31, -inf }
0x11a0   :  { %2217 = vmax.xlane.f32.xlu0 %v2216_v23  ;;  %2220 = vmax.xlane.f32.xlu1 %v2219_v20 }
0x11a4   :  { %2223 = vmax.xlane.f32.xlu0 %v2222_v12 }
0x1225   :  { %v2215_v0 = vpop.xlane.xlu1 %2214 }
0x1226   :  { %v2225_v25 = vsub.f32 %v2199_v24, %v2215_v0 }
0x1228   :  { %v2229_v22 = vmul.f32 1.442695, %v2225_v25 }
0x1229   :  { %v2218_v3 = vpop.xlane.xlu0 %2217  ;;  %v2221_v9 = vpop.xlane.xlu1 %2220 }
0x122a   :  { %3759 = vpow2.f32 %v2229_v22  ;;  %v2226_v51 = vsub.f32 %v2202_v31, %v2218_v3  ;;  %v2227_v2 = vsub.f32 %v2207_v35, %v2221_v9 }
0x122c   :  { %v2231_v14 = vmul.f32 1.442695, %v2226_v51  ;;  %v2233_v48 = vmul.f32 1.442695, %v2227_v2 }
0x122d   :  { %v2224_v39 = vpop.xlane.xlu0 %2223 }
0x122e   :  { %3761 = vpow2.f32 %v2231_v14  ;;  %v2228_v52 = vsub.f32 %v2210_v32, %v2224_v39 }
0x122f   :  { %3763 = vpow2.f32 %v2233_v48 }
0x1230   :  { %v2235_v10 = vmul.f32 1.442695, %v2228_v52 }
0x1232   :  { %3765 = vpow2.f32 %v2235_v10 }
0x1237   :  { %v3760_v30 = vpop.eup %3759 }
0x1238   :  { %v2237_v7 = vsel %vm423_vm12, %v3760_v30, 0.0 }
0x1239   :  { %2238 = vadd.xlane.f32.xlu1 %v2237_v7 }
0x123b   :  { %v3762_v61 = vpop.eup %3761 }
0x123c   :  { %v3764_v58 = vpop.eup %3763  ;;  %v2240_v11 = vsel %vm423_vm12, %v3762_v61, 0.0 }
0x123d   :  { %2241 = vadd.xlane.f32.xlu0 %v2240_v11  ;;  %v2243_v42 = vsel %vm423_vm12, %v3764_v58, 0.0 }
0x123e   :  { %2244 = vadd.xlane.f32.xlu1 %v2243_v42 }
0x123f   :  { %v3766_v45 = vpop.eup %3765 }
0x1240   :  { %v2246_v26 = vsel %vm423_vm12, %v3766_v45, 0.0 }
0x1241   :  { %2247 = vadd.xlane.f32.xlu0 %v2246_v26 }
0x12c2   :  { %v2239_v63 = vpop.xlane.xlu1 %2238 }
0x12c3   :  { %3767 = vrcp.f32 %v2239_v63  ;;  %v3595_v63 = vld [vmem:[%s4804_s6 + $0x38] sm:$0xff]  }
0x12c4   :  { %3475 = vmatprep.subr.bf16.mxu0 %v3595_v63 }
0x12c5   :  { %3476 = vmatpush3.bf16.msra.mxu0 %v3595_v63 }
0x12c6   :  { %v2242_v36 = vpop.xlane.xlu0 %2241 }
0x12c7   :  { %3769 = vrcp.f32 %v2242_v36  ;;  %v2245_v44 = vpop.xlane.xlu1 %2244  ;;  %v3596_v36 = vld [vmem:[%s4804_s6 + $0x30] sm:$0xff]  }
0x12c8   :  { %3771 = vrcp.f32 %v2245_v44  ;;  %3477 = vmatprep.subr.bf16.mxu0 %v3596_v36  ;;  %v3597_v44 = vld [vmem:[%s4804_s6 + $0x28] sm:$0xff]  }
0x12c9   :  { %3478 = vmatpush3.bf16.msra.mxu0 %v3596_v36 }
0x12ca   :  { %v2248_v41 = vpop.xlane.xlu0 %2247  ;;  %3479 = vmatprep.subr.bf16.mxu0 %v3597_v44 }
0x12cb   :  { %3773 = vrcp.f32 %v2248_v41  ;;  %v3598_v41 = vld [vmem:[%s4804_s6 + $0x20] sm:$0xff]  }
0x12cd   :  { %3480 = vmatpush3.bf16.msra.mxu0 %v3597_v44 }
0x12ce   :  { %3481 = vmatprep.subr.bf16.mxu0 %v3598_v41 }
0x12d0   :  { %v3768_v1 = vpop.eup %3767 }
0x12d1   :  { %v2253_v8 = vmul.f32 %v3768_v1, %v3760_v30  ;;  %3482 = vmatpush3.bf16.msra.mxu0 %v3598_v41 }
0x12d4   :  { %v3770_v13 = vpop.eup %3769 }
0x12d5   :  { %v2254_v27 = vmul.f32 %v3770_v13, %v3762_v61  ;;  %v3772_v28 = vpop.eup %3771 }
0x12d6   :  { %v2255_v55 = vmul.f32 %v3772_v28, %v3764_v58 }
0x12d7   :  { %v2257_v34 = vpack.c.bf16 %v2254_v27, %v2253_v8 }
0x12d8   :  { %v3774_v17 = vpop.eup %3773 }
0x12d9   :  { %3459 = vmatprep.mubr.msk.bf16.mxu1 %vm423_vm12, %v2257_v34  ;;  %v2256_v49 = vmul.f32 %v3774_v17, %v3766_v45 }
0x12db   :  { %v2258_v6 = vpack.c.bf16 %v2256_v49, %v2255_v55 }
0x12dd   :  { %3460 = vmatmul.mubr.msk.bf16.vlgmr.msra.gmra.mxu1 %vm423_vm12, %v2258_v6 }
0x12de   :  { %3464 = vmatpush3.bf16.msra.mxu1 %v3591_v4 }
0x12df   :  { %3465 = vmatprep.subr.bf16.mxu1 %v3592_v59 }
0x12e2   :  { %3466 = vmatpush3.bf16.msra.mxu1 %v3592_v59 }
0x12e3   :  { %3467 = vmatprep.subr.bf16.mxu1 %v3593_v57 }
0x12e6   :  { %3468 = vmatpush3.bf16.msra.mxu1 %v3593_v57 }
0x12e7   :  { %3469 = vmatprep.subr.bf16.mxu1 %v3594_v37 }
0x12ea   :  { %3470 = vmatpush3.bf16.msra.mxu1 %v3594_v37 }
0x139d   :  { %v3461_v54 = vpop.f32.mrf.mxu1 }
0x139e   :  { %v2316_v53 = vadd.f32 %v3461_v54, %v4616_v40 }
0x139f   :  { %v2299_v21 = vpop.f32.mrf.mxu1 }
0x13a0   :  { %v2314_v5 = vadd.f32 %v2299_v21, %v4618_v62  ;;  %v2413_v21 = vld [vmem:[%s4800_s10 + $0x17] ss:$0 sm:$0xff] }
0x13a1   :  { %v3462_v16 = vpop.f32.mrf.mxu1 }
0x13a2   :  { %v2317_v46 = vadd.f32 %v3462_v16, %v4620_v47 }
0x13a3   :  { %v2302_v38 = vpop.f32.mrf.mxu1 }
0x13a4   :  { %v2319_v18 = vpack.c.bf16 %v2317_v46, %v2316_v53  ;;  %v2315_v24 = vadd.f32 %v2302_v38, %v4622_v29 }
0x13a6   :  { %v2318_v50 = vpack.c.bf16 %v2315_v24, %v2314_v5 }
0x13a8   :  { %3471 = vmatprep.mubr.msk.bf16.mxu1 %vm124_vm1, %v2318_v50 }
0x13a9   :  { %3472 = vmatmul.mubr.msk.bf16.vlgmr.msra.gmra.mxu1 %vm124_vm1, %v2319_v18  ;;  %v2414_v18 = vld [vmem:[%s4800_s10 + $0x20] ss:$0 sm:$0xff] }
0x1469   :  { %v3473_v35 = vpop.f32.mrf.mxu1 }
0x146a   :  { %v2403_v40 = vadd.f32 %v3473_v35, %v2329_v33 }
0x146b   :  { %v2394_v60 = vpop.f32.mrf.mxu1 }
0x146c   :  { %v2395_v31 = vadd.f32 %v2394_v60, %v2329_v33  ;;  %v2411_v23 = vadd.f32 %v2403_v40, %v4410_v56 }
0x146d   :  { %v3474_v47 = vpop.f32.mrf.mxu1 }
0x146e   :  { %v2409_v32 = vadd.f32 %v2395_v31, %v4400_v15  ;;  %v2406_v29 = vadd.f32 %v3474_v47, %v2329_v33  ;;  %v2421_v3 = vsel %vm124_vm1, %v2411_v23, 0.0 }
0x146f   :  { %v2397_v62 = vpop.f32.mrf.mxu1 }
0x1470   :  { %v2398_v20 = vadd.f32 %v2397_v62, %v2329_v33  ;;  %v2415_v12 = vsel %vm124_vm1, %v2409_v32, 0.0  ;;  %v2412_v25 = vadd.f32 %v2406_v29, %v4408_v19  ;;  %v3599_v29 = vld [vmem:[%s4805_s7 + $0x78] sm:$0xff]  }
0x1471   :  { %2416 = vadd.xlane.f32.xlu1 %v2415_v12  ;;  %3487 = vmatprep.subr.bf16.mxu1 %v3599_v29  ;;  %v3601_v12 = vld [vmem:[%s4805_s7 + $0x68] sm:$0xff]  }
0x1472   :  { %v2410_v0 = vadd.f32 %v2398_v20, %v4402_v43  ;;  %v2424_v15 = vsel %vm124_vm1, %v2412_v25, 0.0  ;;  %3488 = vmatpush3.bf16.msra.mxu1 %v3599_v29  ;;  %v3600_v20 = vld [vmem:[%s4805_s7 + $0x70] sm:$0xff]  }
0x1473   :  { %3489 = vmatprep.subr.bf16.mxu1 %v3600_v20 }
0x1474   :  { %v2418_v22 = vsel %vm124_vm1, %v2410_v0, 0.0 }
0x1475   :  { %2419 = vadd.xlane.f32.xlu0 %v2418_v22  ;;  %2422 = vadd.xlane.f32.xlu1 %v2421_v3  ;;  %v3604_v22 = vld [vmem:[%s4805_s7 + $0x50] sm:$0xff]   ;;  %v3605_v3 = vld [vmem:[%s4805_s7 + $0x48] sm:$0xff]  }
0x1476   :  { %3490 = vmatpush3.bf16.msra.mxu1 %v3600_v20 }
0x1477   :  { %3491 = vmatprep.subr.bf16.mxu1 %v3601_v12 }
0x1479   :  { %2425 = vadd.xlane.f32.xlu0 %v2424_v15  ;;  %v3606_v15 = vld [vmem:[%s4805_s7 + $0x40] sm:$0xff]  }
0x147a   :  { %3492 = vmatpush3.bf16.msra.mxu1 %v3601_v12 }
0x14fa   :  { %v2417_v9 = vpop.xlane.xlu1 %2416 }
0x14fb   :  { %v2427_v56 = vmul.f32 0.015625, %v2417_v9  ;;  %v2486_v9 = vld [vmem:[%s4800_s10 + $0x21] ss:$0 sm:$0xff] }
0x14fd   :  { %v2431_v51 = vsub.f32 %v2409_v32, %v2427_v56 }
0x14fe   :  { %v2420_v2 = vpop.xlane.xlu0 %2419  ;;  %v2423_v14 = vpop.xlane.xlu1 %2422 }
0x14ff   :  { %v2428_v48 = vmul.f32 0.015625, %v2420_v2  ;;  %v2429_v39 = vmul.f32 0.015625, %v2423_v14  ;;  %v2435_v52 = vmul.f32 %v2431_v51, %v2431_v51 }
0x1501   :  { %v2432_v43 = vsub.f32 %v2410_v0, %v2428_v48  ;;  %v2433_v10 = vsub.f32 %v2411_v23, %v2429_v39  ;;  %v2439_v19 = vsel %vm124_vm1, %v2435_v52, 0.0  ;;  %v3602_v0 = vld [vmem:[%s4805_s7 + $0x60] sm:$0xff]  }
0x1502   :  { %v2426_v30 = vpop.xlane.xlu0 %2425  ;;  %2440 = vadd.xlane.f32.xlu1 %v2439_v19  ;;  %3493 = vmatprep.subr.bf16.mxu1 %v3602_v0 }
0x1503   :  { %v2430_v7 = vmul.f32 0.015625, %v2426_v30  ;;  %v2436_v61 = vmul.f32 %v2432_v43, %v2432_v43  ;;  %v2437_v58 = vmul.f32 %v2433_v10, %v2433_v10  ;;  %3494 = vmatpush3.bf16.msra.mxu1 %v3602_v0 }
0x1505   :  { %v2434_v11 = vsub.f32 %v2412_v25, %v2430_v7  ;;  %v2442_v42 = vsel %vm124_vm1, %v2436_v61, 0.0  ;;  %v2445_v45 = vsel %vm124_vm1, %v2437_v58, 0.0  ;;  %v3603_v25 = vld [vmem:[%s4805_s7 + $0x58] sm:$0xff]  }
0x1506   :  { %2443 = vadd.xlane.f32.xlu0 %v2442_v42  ;;  %2446 = vadd.xlane.f32.xlu1 %v2445_v45 }
0x1507   :  { %v2438_v26 = vmul.f32 %v2434_v11, %v2434_v11  ;;  %3495 = vmatprep.subr.bf16.mxu1 %v3603_v25 }
0x1508   :  { %3496 = vmatpush3.bf16.msra.mxu1 %v3603_v25 }
0x1509   :  { %v2448_v4 = vsel %vm124_vm1, %v2438_v26, 0.0  ;;  %3497 = vmatprep.subr.bf16.mxu1 %v3604_v22 }
0x150a   :  { %2449 = vadd.xlane.f32.xlu0 %v2448_v4 }
0x150c   :  { %3498 = vmatpush3.bf16.msra.mxu1 %v3604_v22 }
0x150d   :  { %3499 = vmatprep.subr.bf16.mxu1 %v3605_v3 }
0x1510   :  { %3500 = vmatpush3.bf16.msra.mxu1 %v3605_v3 }
0x1511   :  { %3501 = vmatprep.subr.bf16.mxu1 %v3606_v15 }
0x1514   :  { %3502 = vmatpush3.bf16.msra.mxu1 %v3606_v15 }
0x158b   :  { %v2441_v1 = vpop.xlane.xlu1 %2440 }
0x158c   :  { %v2451_v13 = vmul.f32 0.015625, %v2441_v1 }
0x158e   :  { %v2455_v8 = vadd.f32 1e-12, %v2451_v13 }
0x158f   :  { %v2444_v27 = vpop.xlane.xlu0 %2443  ;;  %v2447_v28 = vpop.xlane.xlu1 %2446 }
0x1590   :  { %3775 = vrsqrt.f32 %v2455_v8  ;;  %v2452_v34 = vmul.f32 0.015625, %v2444_v27  ;;  %v2453_v17 = vmul.f32 0.015625, %v2447_v28 }
0x1592   :  { %v2456_v55 = vadd.f32 1e-12, %v2452_v34  ;;  %v2457_v49 = vadd.f32 1e-12, %v2453_v17 }
0x1593   :  { %v2450_v6 = vpop.xlane.xlu0 %2449 }
0x1594   :  { %3777 = vrsqrt.f32 %v2456_v55  ;;  %v2454_v59 = vmul.f32 0.015625, %v2450_v6 }
0x1595   :  { %3779 = vrsqrt.f32 %v2457_v49 }
0x1596   :  { %v2458_v57 = vadd.f32 1e-12, %v2454_v59 }
0x1598   :  { %3781 = vrsqrt.f32 %v2458_v57 }
0x159d   :  { %v3776_v37 = vpop.eup %3775 }
0x159e   :  { %v2463_v54 = vmul.f32 %v3776_v37, %v2431_v51 }
0x15a0   :  { %v2467_v38 = vmul.f32 %v2463_v54, %v2413_v21 }
0x15a1   :  { %v3778_v16 = vpop.eup %3777 }
0x15a2   :  { %v3780_v53 = vpop.eup %3779  ;;  %v2464_v46 = vmul.f32 %v3778_v16, %v2432_v43  ;;  %v4689_v33 = vadd.f32 %v2467_v38, %v2414_v18 }
0x15a3   :  { %v2465_v5 = vmul.f32 %v3780_v53, %v2433_v10 }
0x15a4   :  { %v2468_v24 = vmul.f32 %v2464_v46, %v2413_v21 }
0x15a5   :  { %v3782_v50 = vpop.eup %3781  ;;  %v2469_v40 = vmul.f32 %v2465_v5, %v2413_v21 }
0x15a6   :  { %v2466_v35 = vmul.f32 %v3782_v50, %v2434_v11  ;;  %v4691_v60 = vadd.f32 %v2468_v24, %v2414_v18 }
0x15a7   :  { %v4696_v32 = vadd.f32 %v2469_v40, %v2414_v18  ;;  %v2621_v40 = vld [vmem:[%s4800_s10 + $0x22] ss:$0 sm:$0xff] }
0x15a8   :  { %v2475_v31 = vpack.c.bf16 %v4691_v60, %v4689_v33  ;;  %v2470_v47 = vmul.f32 %v2466_v35, %v2413_v21 }
0x15aa   :  { %3483 = vmatprep.mubr.msk.bf16.mxu0 %vm124_vm1, %v2475_v31  ;;  %v4698_v62 = vadd.f32 %v2470_v47, %v2414_v18 }
0x15ac   :  { %v2476_v23 = vpack.c.bf16 %v4698_v62, %v4696_v32 }
0x15ae   :  { %3484 = vmatmul.mubr.msk.bf16.vlgmr.msra.gmra.mxu0 %vm124_vm1, %v2476_v23 }
0x166e   :  { %v3485_v56 = vpop.f32.mrf.mxu0 }
0x166f   :  { %v2560_v51 = vadd.f32 %v3485_v56, %v2486_v9 }
0x1670   :  { %v2551_v2 = vpop.f32.mrf.mxu0 }
0x1671   :  { %v2572_v14 = vmul.f32 0.044715, %v2560_v51  ;;  %v2552_v48 = vadd.f32 %v2551_v2, %v2486_v9  ;;  %v2568_v53 = vmul.f32 0.5, %v2560_v51 }
0x1672   :  { %v3486_v39 = vpop.f32.mrf.mxu0 }
0x1673   :  { %v2576_v52 = vmul.f32 %v2572_v14, %v2560_v51  ;;  %v2570_v43 = vmul.f32 0.044715, %v2552_v48  ;;  %v2563_v10 = vadd.f32 %v3486_v39, %v2486_v9  ;;  %v2566_v54 = vmul.f32 0.5, %v2552_v48 }
0x1674   :  { %v2554_v19 = vpop.f32.mrf.mxu0 }
0x1675   :  { %v2580_v30 = vmul.f32 %v2576_v52, %v2560_v51  ;;  %v2574_v7 = vmul.f32 %v2570_v43, %v2552_v48  ;;  %v2573_v61 = vmul.f32 0.044715, %v2563_v10  ;;  %v2555_v58 = vadd.f32 %v2554_v19, %v2486_v9 }
0x1676   :  { %v2569_v57 = vmul.f32 0.5, %v2563_v10 }
0x1677   :  { %v2584_v11 = vadd.f32 %v2580_v30, %v2560_v51  ;;  %v2578_v42 = vmul.f32 %v2574_v7, %v2552_v48  ;;  %v2577_v45 = vmul.f32 %v2573_v61, %v2563_v10  ;;  %v2571_v26 = vmul.f32 0.044715, %v2555_v58 }
0x1678   :  { %v2567_v21 = vmul.f32 0.5, %v2555_v58 }
0x1679   :  { %v2581_v4 = vmul.f32 %v2577_v45, %v2563_v10  ;;  %v2575_v63 = vmul.f32 %v2571_v26, %v2555_v58  ;;  %v2582_v36 = vadd.f32 %v2578_v42, %v2552_v48  ;;  %v2588_v44 = vmul.f32 0.7978846, %v2584_v11 }
0x167b   :  { %v2585_v41 = vadd.f32 %v2581_v4, %v2563_v10  ;;  %v2579_v1 = vmul.f32 %v2575_v63, %v2555_v58  ;;  %v2586_v13 = vmul.f32 0.7978846, %v2582_v36  ;;  %v3607_v63 = vld [vmem:[%s4806_s8 + $0x18] sm:$0xff]   ;;  %v3608_v36 = vld [vmem:[%s4806_s8 + $0x10] sm:$0xff]  }
0x167c   :  { %3507 = vmatprep.subr.bf16.mxu0 %v3607_v63 }
0x167d   :  { %v2589_v8 = vmul.f32 0.7978846, %v2585_v41  ;;  %v2583_v27 = vadd.f32 %v2579_v1, %v2555_v58  ;;  %3783 = vtanh.f32 %v2586_v13  ;;  %3508 = vmatpush3.bf16.msra.mxu0 %v3607_v63  ;;  %v3610_v41 = vld [vmem:[%s4806_s8] sm:$0xff]  }
0x167e   :  { %3785 = vtanh.f32 %v2588_v44  ;;  %3509 = vmatprep.subr.bf16.mxu0 %v3608_v36  ;;  %v3609_v44 = vld [vmem:[%s4806_s8 + $0x8] sm:$0xff]  }
0x167f   :  { %3787 = vtanh.f32 %v2589_v8  ;;  %v2587_v28 = vmul.f32 0.7978846, %v2583_v27 }
0x1681   :  { %3789 = vtanh.f32 %v2587_v28  ;;  %3510 = vmatpush3.bf16.msra.mxu0 %v3608_v36 }
0x1682   :  { %3511 = vmatprep.subr.bf16.mxu0 %v3609_v44 }
0x1685   :  { %3512 = vmatpush3.bf16.msra.mxu0 %v3609_v44 }
0x1686   :  { %3513 = vmatprep.subr.bf16.mxu0 %v3610_v41 }
0x1689   :  { %3514 = vmatpush3.bf16.msra.mxu0 %v3610_v41 }
0x168a   :  { %v3784_v34 = vpop.eup %3783 }
0x168b   :  { %v3786_v17 = vpop.eup %3785  ;;  %v2594_v49 = vadd.f32 1.0, %v3784_v34 }
0x168c   :  { %v3788_v55 = vpop.eup %3787  ;;  %v2596_v37 = vadd.f32 1.0, %v3786_v17 }
0x168d   :  { %v2597_v6 = vadd.f32 1.0, %v3788_v55  ;;  %v2598_v38 = vmul.f32 %v2594_v49, %v2566_v54 }
0x168e   :  { %v3790_v59 = vpop.eup %3789  ;;  %v2600_v18 = vmul.f32 %v2596_v37, %v2568_v53 }
0x168f   :  { %v2595_v16 = vadd.f32 1.0, %v3790_v59  ;;  %v2601_v46 = vmul.f32 %v2597_v6, %v2569_v57 }
0x1691   :  { %v2599_v5 = vmul.f32 %v2595_v16, %v2567_v21  ;;  %v2603_v50 = vpack.c.bf16 %v2601_v46, %v2600_v18  ;;  %v2723_v21 = vld [vmem:[%s4800_s10 + $0x23] ss:$0 sm:$0xff]  ;;  %v2724_v18 = vld [vmem:[%s4800_s10 + $0x24] ss:$0 sm:$0xff] }
0x1693   :  { %v2602_v24 = vpack.c.bf16 %v2599_v5, %v2598_v38 }
0x1695   :  { %3503 = vmatprep.mubr.bf16.mxu1 %v2602_v24 }
0x1696   :  { %3504 = vmatmul.mubr.bf16.vlgmr.msra.gmra.mxu1 %v2603_v50 }
0x1756   :  { %v3505_v35 = vpop.f32.mrf.mxu1 }
0x1757   :  { %v2713_v47 = vadd.f32 %v3505_v35, %v2621_v40 }
0x1758   :  { %v2704_v31 = vpop.f32.mrf.mxu1 }
0x1759   :  { %v2705_v23 = vadd.f32 %v2704_v31, %v2621_v40  ;;  %v2721_v0 = vadd.f32 %v2713_v47, %v4696_v32 }
0x175a   :  { %v3506_v29 = vpop.f32.mrf.mxu1 }
0x175b   :  { %v2719_v20 = vadd.f32 %v2705_v23, %v4689_v33  ;;  %v2716_v25 = vadd.f32 %v3506_v29, %v2621_v40  ;;  %v2731_v51 = vsel %vm124_vm1, %v2721_v0, 0.0 }
0x175c   :  { %v2707_v12 = vpop.f32.mrf.mxu1 }
0x175d   :  { %v2708_v22 = vadd.f32 %v2707_v12, %v2621_v40  ;;  %v2725_v3 = vsel %vm124_vm1, %v2719_v20, 0.0  ;;  %v2722_v9 = vadd.f32 %v2716_v25, %v4698_v62  ;;  %v3611_v25 = vld [vmem:[%s4807_s9 + $0x18] sm:$0xff]  }
0x175e   :  { %2726 = vadd.xlane.f32.xlu1 %v2725_v3  ;;  %3519 = vmatprep.subr.bf16.mxu0 %v3611_v25  ;;  %v3613_v3 = vld [vmem:[%s4807_s9 + $0x8] sm:$0xff]  }
0x175f   :  { %v2720_v15 = vadd.f32 %v2708_v22, %v4691_v60  ;;  %v2734_v33 = vsel %vm124_vm1, %v2722_v9, 0.0  ;;  %v3612_v22 = vld [vmem:[%s4807_s9 + $0x10] sm:$0xff]  }
0x1761   :  { %v2728_v56 = vsel %vm124_vm1, %v2720_v15, 0.0 }
0x1762   :  { %2729 = vadd.xlane.f32.xlu0 %v2728_v56  ;;  %2732 = vadd.xlane.f32.xlu1 %v2731_v51 }
0x1766   :  { %2735 = vadd.xlane.f32.xlu0 %v2734_v33 }
0x17e7   :  { %v2727_v2 = vpop.xlane.xlu1 %2726 }
0x17e8   :  { %v2737_v32 = vmul.f32 0.015625, %v2727_v2 }
0x17ea   :  { %v2741_v14 = vsub.f32 %v2719_v20, %v2737_v32 }
0x17eb   :  { %v2730_v48 = vpop.xlane.xlu0 %2729  ;;  %v2733_v39 = vpop.xlane.xlu1 %2732 }
0x17ec   :  { %v2738_v52 = vmul.f32 0.015625, %v2730_v48  ;;  %v2739_v43 = vmul.f32 0.015625, %v2733_v39  ;;  %v2745_v10 = vmul.f32 %v2741_v14, %v2741_v14 }
0x17ee   :  { %v2742_v60 = vsub.f32 %v2720_v15, %v2738_v52  ;;  %v2743_v19 = vsub.f32 %v2721_v0, %v2739_v43  ;;  %v2749_v62 = vsel %vm124_vm1, %v2745_v10, 0.0  ;;  %v3614_v15 = vld [vmem:[%s4807_s9] sm:$0xff]  }
0x17ef   :  { %v2736_v30 = vpop.xlane.xlu0 %2735  ;;  %2750 = vadd.xlane.f32.xlu1 %v2749_v62 }
0x17f0   :  { %v2740_v7 = vmul.f32 0.015625, %v2736_v30  ;;  %v2746_v61 = vmul.f32 %v2742_v60, %v2742_v60  ;;  %v2747_v58 = vmul.f32 %v2743_v19, %v2743_v19 }
0x17f2   :  { %v2744_v11 = vsub.f32 %v2722_v9, %v2740_v7  ;;  %v2752_v42 = vsel %vm124_vm1, %v2746_v61, 0.0  ;;  %v2755_v45 = vsel %vm124_vm1, %v2747_v58, 0.0  ;;  %v2795_v9 = vld [vmem:[%s4800_s10 + $0x3] ss:$0 sm:$0xff] }
0x17f3   :  { %2753 = vadd.xlane.f32.xlu0 %v2752_v42  ;;  %2756 = vadd.xlane.f32.xlu1 %v2755_v45 }
0x17f4   :  { %v2748_v26 = vmul.f32 %v2744_v11, %v2744_v11 }
0x17f6   :  { %v2758_v4 = vsel %vm124_vm1, %v2748_v26, 0.0 }
0x17f7   :  { %2759 = vadd.xlane.f32.xlu0 %v2758_v4 }
0x1878   :  { %v2751_v1 = vpop.xlane.xlu1 %2750 }
0x1879   :  { %v2761_v13 = vmul.f32 0.015625, %v2751_v1 }
0x187b   :  { %v2765_v8 = vadd.f32 1e-12, %v2761_v13 }
0x187c   :  { %v2754_v27 = vpop.xlane.xlu0 %2753  ;;  %v2757_v28 = vpop.xlane.xlu1 %2756 }
0x187d   :  { %3791 = vrsqrt.f32 %v2765_v8  ;;  %v2762_v34 = vmul.f32 0.015625, %v2754_v27  ;;  %v2763_v17 = vmul.f32 0.015625, %v2757_v28 }
0x187f   :  { %v2766_v55 = vadd.f32 1e-12, %v2762_v34  ;;  %v2767_v49 = vadd.f32 1e-12, %v2763_v17 }
0x1880   :  { %v2760_v6 = vpop.xlane.xlu0 %2759 }
0x1881   :  { %3793 = vrsqrt.f32 %v2766_v55  ;;  %v2764_v59 = vmul.f32 0.015625, %v2760_v6 }
0x1882   :  { %3795 = vrsqrt.f32 %v2767_v49 }
0x1883   :  { %v2768_v57 = vadd.f32 1e-12, %v2764_v59 }
0x1885   :  { %3797 = vrsqrt.f32 %v2768_v57 }
0x188a   :  { %v3792_v37 = vpop.eup %3791 }
0x188b   :  { %v2773_v54 = vmul.f32 %v3792_v37, %v2741_v14 }
0x188d   :  { %v2777_v38 = vmul.f32 %v2773_v54, %v2723_v21 }
0x188e   :  { %v3794_v16 = vpop.eup %3793 }
0x188f   :  { %v3796_v53 = vpop.eup %3795  ;;  %v2774_v46 = vmul.f32 %v3794_v16, %v2742_v60  ;;  %v2781_v40 = vadd.f32 %v2777_v38, %v2724_v18 }
0x1890   :  { %v2775_v5 = vmul.f32 %v3796_v53, %v2743_v19 }
0x1891   :  { %v2778_v24 = vmul.f32 %v2774_v46, %v2723_v21 }
0x1892   :  { %v3798_v50 = vpop.eup %3797  ;;  %v2779_v47 = vmul.f32 %v2775_v5, %v2723_v21  ;;  %v2921_v5 = vld [vmem:[%s4800_s10 + $0x4] ss:$0 sm:$0xff] }
0x1893   :  { %v2776_v35 = vmul.f32 %v3798_v50, %v2744_v11  ;;  %v2782_v31 = vadd.f32 %v2778_v24, %v2724_v18 }
0x1894   :  { %v2783_v20 = vadd.f32 %v2779_v47, %v2724_v18 }
0x1895   :  { %v2785_v23 = vpack.c.bf16 %v2782_v31, %v2781_v40  ;;  %v2780_v29 = vmul.f32 %v2776_v35, %v2723_v21 }
0x1897   :  { %3515 = vmatprep.mubr.msk.bf16.mxu0 %vm124_vm1, %v2785_v23  ;;  %v2784_v12 = vadd.f32 %v2780_v29, %v2724_v18 }
0x1899   :  { %v2786_v0 = vpack.c.bf16 %v2784_v12, %v2783_v20 }
0x189b   :  { %3516 = vmatmul.mubr.msk.bf16.vlgmr.msra.gmra.mxu0 %vm124_vm1, %v2786_v0 }
0x189c   :  { %3520 = vmatpush3.bf16.msra.mxu0 %v3611_v25 }
0x189d   :  { %3521 = vmatprep.subr.bf16.mxu0 %v3612_v22 }
0x18a0   :  { %3522 = vmatpush3.bf16.msra.mxu0 %v3612_v22 }
0x18a1   :  { %3523 = vmatprep.subr.bf16.mxu0 %v3613_v3 }
0x18a4   :  { %3524 = vmatpush3.bf16.msra.mxu0 %v3613_v3 }
0x18a5   :  { %3525 = vmatprep.subr.bf16.mxu0 %v3614_v15 }
0x18a8   :  { %3526 = vmatpush3.bf16.msra.mxu0 %v3614_v15 }
0x195b   :  { %v3517_v56 = vpop.f32.mrf.mxu0 }
0x195c   :  { %v2869_v51 = vadd.f32 %v3517_v56, %v2795_v9 }
0x195d   :  { %v2860_v33 = vpop.f32.mrf.mxu0 }
0x195e   :  { %v2881_v2 = vmul.f32 0.044715, %v2869_v51  ;;  %v2861_v32 = vadd.f32 %v2860_v33, %v2795_v9  ;;  %v2877_v37 = vmul.f32 0.5, %v2869_v51 }
0x195f   :  { %v3518_v14 = vpop.f32.mrf.mxu0 }
0x1960   :  { %v2885_v48 = vmul.f32 %v2881_v2, %v2869_v51  ;;  %v2879_v39 = vmul.f32 0.044715, %v2861_v32  ;;  %v2872_v52 = vadd.f32 %v3518_v14, %v2795_v9  ;;  %v2875_v6 = vmul.f32 0.5, %v2861_v32 }
0x1961   :  { %v2863_v43 = vpop.f32.mrf.mxu0 }
0x1962   :  { %v2889_v10 = vmul.f32 %v2885_v48, %v2869_v51  ;;  %v2883_v60 = vmul.f32 %v2879_v39, %v2861_v32  ;;  %v2882_v19 = vmul.f32 0.044715, %v2872_v52  ;;  %v2864_v62 = vadd.f32 %v2863_v43, %v2795_v9 }
0x1963   :  { %v2878_v55 = vmul.f32 0.5, %v2872_v52 }
0x1964   :  { %v2893_v30 = vadd.f32 %v2889_v10, %v2869_v51  ;;  %v2887_v7 = vmul.f32 %v2883_v60, %v2861_v32  ;;  %v2886_v61 = vmul.f32 %v2882_v19, %v2872_v52  ;;  %v2880_v58 = vmul.f32 0.044715, %v2864_v62 }
0x1965   :  { %v2876_v59 = vmul.f32 0.5, %v2864_v62 }
0x1966   :  { %v2897_v11 = vmul.f32 0.7978846, %v2893_v30  ;;  %v2891_v42 = vadd.f32 %v2887_v7, %v2861_v32  ;;  %v2890_v45 = vmul.f32 %v2886_v61, %v2872_v52  ;;  %v2884_v26 = vmul.f32 %v2880_v58, %v2864_v62 }
0x1968   :  { %v2895_v4 = vmul.f32 0.7978846, %v2891_v42  ;;  %v2894_v63 = vadd.f32 %v2890_v45, %v2872_v52  ;;  %v2888_v36 = vmul.f32 %v2884_v26, %v2864_v62  ;;  %3799 = vtanh.f32 %v2897_v11 }
0x196a   :  { %v2898_v44 = vmul.f32 0.7978846, %v2894_v63  ;;  %3801 = vtanh.f32 %v2895_v4  ;;  %v2892_v41 = vadd.f32 %v2888_v36, %v2864_v62 }
0x196c   :  { %3803 = vtanh.f32 %v2898_v44  ;;  %v2896_v1 = vmul.f32 0.7978846, %v2892_v41 }
0x196e   :  { %3805 = vtanh.f32 %v2896_v1 }
0x1975   :  { %v3800_v13 = vpop.eup %3799 }
0x1976   :  { %v2905_v49 = vadd.f32 1.0, %v3800_v13 }
0x1977   :  { %v3802_v8 = vpop.eup %3801 }
0x1978   :  { %v2903_v34 = vadd.f32 1.0, %v3802_v8  ;;  %v2909_v53 = vmul.f32 %v2905_v49, %v2877_v37 }
0x1979   :  { %v3804_v27 = vpop.eup %3803 }
0x197a   :  { %v2906_v28 = vadd.f32 1.0, %v3804_v27  ;;  %v2907_v21 = vmul.f32 %v2903_v34, %v2875_v6 }
0x197b   :  { %v3806_v17 = vpop.eup %3805 }
0x197c   :  { %v2904_v57 = vadd.f32 1.0, %v3806_v17  ;;  %v2910_v54 = vmul.f32 %v2906_v28, %v2878_v55 }
0x197e   :  { %v2908_v16 = vmul.f32 %v2904_v57, %v2876_v59  ;;  %v2912_v38 = vpack.c.bf16 %v2910_v54, %v2909_v53 }
0x1980   :  { %v2911_v46 = vpack.c.bf16 %v2908_v16, %v2907_v21 }
0x1982   :  { %3527 = vmatprep.mubr.msk.bf16.mxu0 %vm124_vm1, %v2911_v46 }
0x1983   :  { %3528 = vmatmul.mubr.msk.bf16.vlgmr.msra.gmra.mxu0 %vm124_vm1, %v2912_v38 }
0x1a43   :  { %v3529_v18 = vpop.f32.mrf.mxu0 }
0x1a44   :  { %v2995_v24 = vadd.f32 %v3529_v18, %v2921_v5 }
0x1a45   :  { %v2986_v50 = vpop.f32.mrf.mxu0 }
0x1a46   :  { %3003 = vst [vmem:[%s4808_s11 + $0x10] sm:$0xff] %v2995_v24  ;;  %v2987_v35 = vadd.f32 %v2986_v50, %v2921_v5 }
0x1a47   :  { %v3530_v40 = vpop.f32.mrf.mxu0 }
0x1a48   :  { %3001 = vst [vmem:[%s4808_s11] sm:$0xff] %v2987_v35  ;;  %v2998_v31 = vadd.f32 %v3530_v40, %v2921_v5 }
0x1a49   :  { %v2989_v47 = vpop.f32.mrf.mxu0 }
0x1a4a   :  { %3004 = vst [vmem:[%s4808_s11 + $0x18] sm:$0xff] %v2998_v31  ;;  %v2990_v23 = vadd.f32 %v2989_v47, %v2921_v5 }
0x1a4c   :  { %3002 = vst [vmem:[%s4808_s11 + $0x8] sm:$0xff] %v2990_v23 }

</bundles_post_ra>
